<compile_context>
chip_gen: v7x
topology: tpu7x:2x2x1
jax: 0.10.0
libtpu: 0.0.40
codegen_flags: <defaults>
</compile_context>

<pallas_src>
import functools

import jax
import jax.numpy as jnp
from jax import lax
from jax.experimental import pallas as pl
from jax.experimental.pallas import tpu as pltpu


def _layernorm(x, scale, shift, eps=1e-5):
    mean = jnp.mean(x, axis=-1, keepdims=True)
    xc = x - mean
    var = jnp.mean(xc * xc, axis=-1, keepdims=True)      # unbiased=False
    return xc * lax.rsqrt(var + eps) * scale + shift


def _gelu_tanh(x):
    c = jnp.float32(0.7978845608028654)                  # sqrt(2/pi)
    return 0.5 * x * (1.0 + jnp.tanh(c * (x + 0.044715 * (x * x * x))))


def _transformer_block_kernel(
    # inputs
    x_ref,                       # (1, TQ, D) f32 : query tile of x
    ln1_s_ref, ln1_b_ref,        # (1, D) f32
    wq_ref, wk_ref, wv_ref,      # (D, D) bf16
    wo_ref, bo_ref,              # (D, D) bf16, (1, D) f32
    ln2_s_ref, ln2_b_ref,        # (1, D) f32
    w1_ref, b1_ref,              # (D, 4D) bf16, (1, 4D) f32
    w2_ref, b2_ref,              # (4D, D) bf16, (1, D) f32
    # outputs
    o_ref,                       # (1, TQ, D) f32
    # scratch
    k_cache, v_cache,            # (nh, T, hd) bf16 : per-batch-element KV cache
    q_heads,                     # (nh, TQ, hd) bf16
    ctx_merge,                   # (TQ, D) bf16
    *, num_heads,
):
    qi = pl.program_id(1)
    _, tq, d = x_ref.shape
    nh = num_heads
    hd = d // nh
    scale = jnp.float32(1.0 / (hd ** 0.5))

    x = x_ref[0]                                         # (TQ, D) f32

    # ---- LayerNorm 1 (f32 statistics) ----
    xn = _layernorm(x, ln1_s_ref[...], ln1_b_ref[...])
    xn_bf = xn.astype(jnp.bfloat16)

    # ---- QKV projections (bf16 MXU, f32 accumulation); fold 1/sqrt(hd) into q ----
    q = jnp.dot(xn_bf, wq_ref[...], preferred_element_type=jnp.float32) * scale
    k = jnp.dot(xn_bf, wk_ref[...], preferred_element_type=jnp.float32)
    v = jnp.dot(xn_bf, wv_ref[...], preferred_element_type=jnp.float32)

    # ---- Head split with lane-aligned static slices; append this tile's K/V
    #      (positions [qi*TQ, (qi+1)*TQ)) to the per-batch cache. ----
    kv_start = pl.multiple_of(qi * tq, tq)
    for h in range(nh):
        sl = slice(h * hd, (h + 1) * hd)
        q_heads[h] = q[:, sl].astype(jnp.bfloat16)
        k_cache[h, pl.ds(kv_start, tq), :] = k[:, sl].astype(jnp.bfloat16)
        v_cache[h, pl.ds(kv_start, tq), :] = v[:, sl].astype(jnp.bfloat16)
    qh = q_heads[...]                                    # (nh, TQ, hd) bf16

    # ---- Flash-style online softmax over KV blocks 0..qi; fully-masked blocks
    #      above the causal diagonal are skipped by the loop bound. ----
    row_l = lax.broadcasted_iota(jnp.int32, (tq, tq), 0)
    col_l = lax.broadcasted_iota(jnp.int32, (tq, tq), 1)
    neg_big = jnp.float32(-1e30)

    def kv_step(j, carry):
        m, l, acc = carry
        start = pl.multiple_of(j * tq, tq)
        kb = k_cache[:, pl.ds(start, tq), :]             # (nh, TQ, hd) bf16
        vb = v_cache[:, pl.ds(start, tq), :]
        s = jnp.einsum("hqd,hkd->hqk", qh, kb,
                       preferred_element_type=jnp.float32)   # (nh, TQ, TQ) f32
        # The mask only bites on the diagonal block (j == qi); all-False otherwise.
        mask = (col_l + (j - qi) * tq) > row_l
        s = jnp.where(mask[None, :, :], neg_big, s)
        m_new = jnp.maximum(m, jnp.max(s, axis=-1, keepdims=True))
        alpha = jnp.exp(m - m_new)
        p = jnp.exp(s - m_new)
        l_new = alpha * l + jnp.sum(p, axis=-1, keepdims=True)
        acc_new = alpha * acc + jnp.einsum(
            "hqk,hkd->hqd", p.astype(jnp.bfloat16), vb,
            preferred_element_type=jnp.float32)
        return m_new, l_new, acc_new

    m0 = jnp.full((nh, tq, 1), neg_big, jnp.float32)
    l0 = jnp.zeros((nh, tq, 1), jnp.float32)
    a0 = jnp.zeros((nh, tq, hd), jnp.float32)
    _, l_f, acc_f = lax.fori_loop(0, qi + 1, kv_step, (m0, l0, a0))

    ctx = acc_f * pl.reciprocal(l_f, approx=True)        # (nh, TQ, hd) f32
    for h in range(nh):
        ctx_merge[:, h * hd:(h + 1) * hd] = ctx[h].astype(jnp.bfloat16)

    attn_out = jnp.dot(ctx_merge[...], wo_ref[...],
                       preferred_element_type=jnp.float32) + bo_ref[...]

    # residual 1 (shortcut dropout is identity in eval / drop_rate=0)
    x1 = attn_out + x

    # ---- LayerNorm 2 + FeedForward (Linear -> GELU(tanh) -> Linear) ----
    x1n = _layernorm(x1, ln2_s_ref[...], ln2_b_ref[...])
    h1 = jnp.dot(x1n.astype(jnp.bfloat16), w1_ref[...],
                 preferred_element_type=jnp.float32) + b1_ref[...]
    h1 = _gelu_tanh(h1)
    ff = jnp.dot(h1.astype(jnp.bfloat16), w2_ref[...],
                 preferred_element_type=jnp.float32) + b2_ref[...]

    # residual 2
    o_ref[0] = (ff + x1).astype(o_ref.dtype)


def transformer_block(x, params, num_heads, q_tile=None):
    """x: (B, T, D) float32.  params: dict of weights stored as
    (in_features, out_features) (i.e. PyTorch weight.T).  Returns (B, T, D)."""
    B, T, D = x.shape
    H = 4 * D
    nh = int(num_heads)
    assert D % nh == 0, "emb_dim must be divisible by n_heads"
    hd = D // nh
    if q_tile is None:
        q_tile = min(T, 256)
    TQ = int(q_tile)
    assert T % TQ == 0 and TQ % 8 == 0, "q_tile must divide T and be a multiple of 8"
    nQ = T // TQ

    bf16, f32 = jnp.bfloat16, jnp.float32
    row = lambda a: jnp.asarray(a, f32).reshape(1, -1)

    operands = (
        x.astype(f32),
        row(params["ln1_scale"]), row(params["ln1_shift"]),
        params["wq"].astype(bf16), params["wk"].astype(bf16), params["wv"].astype(bf16),
        params["wo"].astype(bf16), row(params["bo"]),
        row(params["ln2_scale"]), row(params["ln2_shift"]),
        params["w1"].astype(bf16), row(params["b1"]),
        params["w2"].astype(bf16), row(params["b2"]),
    )

    def full(shape):
        return pl.BlockSpec(shape, lambda b, qi: (0,) * len(shape))

    in_specs = [
        pl.BlockSpec((1, TQ, D), lambda b, qi: (b, qi, 0)),   # x (query tile)
        full((1, D)), full((1, D)),                           # ln1 scale/shift
        full((D, D)), full((D, D)), full((D, D)),             # Wq, Wk, Wv
        full((D, D)), full((1, D)),                           # Wo, bo
        full((1, D)), full((1, D)),                           # ln2 scale/shift
        full((D, H)), full((1, H)),                           # W1, b1
        full((H, D)), full((1, D)),                           # W2, b2
    ]

    # Explicit VMEM budget: bf16 weights (x2 pipeline buffers), KV caches, tiles.
    weight_bytes = 2 * 2 * (4 * D * D + 2 * D * H)
    cache_bytes = 2 * 2 * T * D
    act_bytes = 4 * (6 * TQ * D + TQ * H + 2 * nh * TQ * TQ)
    est = weight_bytes + cache_bytes + act_bytes + (4 << 20)
    vmem_limit = int(min(max(2 * est, 32 << 20), 96 << 20))

    kernel = functools.partial(_transformer_block_kernel, num_heads=nh)

    return pl.pallas_call(
        kernel,
        out_shape=jax.ShapeDtypeStruct((B, T, D), x.dtype),
        grid_spec=pltpu.PrefetchScalarGridSpec(
            num_scalar_prefetch=0,
            grid=(B, nQ),
            in_specs=in_specs,
            out_specs=pl.BlockSpec((1, TQ, D), lambda b, qi: (b, qi, 0)),
            scratch_shapes=[
                pltpu.VMEM((nh, T, hd), bf16),    # K cache (per batch element)
                pltpu.VMEM((nh, T, hd), bf16),    # V cache
                pltpu.VMEM((nh, TQ, hd), bf16),   # q split into heads
                pltpu.VMEM((TQ, D), bf16),        # merged attention context
            ],
        ),
        compiler_params=pltpu.CompilerParams(
            # batch axis is parallel (megacore); the q-tile axis is sequential
            # because the per-batch KV cache is built incrementally across tiles.
            dimension_semantics=("parallel", "arbitrary"),
            vmem_limit_bytes=vmem_limit,
        ),
    )(*operands)


def _reference(x, p, num_heads):
    """Pure-JAX f32 reference mirroring the PyTorch forward (eval mode)."""
    B, T, D = x.shape
    hd = D // num_heads

    def ln(y, s, b):
        m = jnp.mean(y, axis=-1, keepdims=True)
        v = jnp.mean((y - m) ** 2, axis=-1, keepdims=True)
        return s * ((y - m) / jnp.sqrt(v + 1e-5)) + b

    xn = ln(x, p["ln1_scale"], p["ln1_shift"])
    q = xn @ p["wq"]; k = xn @ p["wk"]; v = xn @ p["wv"]
    q = q.reshape(B, T, num_heads, hd).transpose(0, 2, 1, 3)
    k = k.reshape(B, T, num_heads, hd).transpose(0, 2, 1, 3)
    v = v.reshape(B, T, num_heads, hd).transpose(0, 2, 1, 3)
    scores = (q @ k.transpose(0, 1, 3, 2)) / jnp.sqrt(jnp.float32(hd))
    mask = jnp.triu(jnp.ones((T, T), bool), k=1)
    scores = jnp.where(mask, -jnp.inf, scores)
    att = jax.nn.softmax(scores, axis=-1)
    ctx = (att @ v).transpose(0, 2, 1, 3).reshape(B, T, D)
    attn_out = ctx @ p["wo"] + p["bo"]
    x1 = attn_out + x
    x1n = ln(x1, p["ln2_scale"], p["ln2_shift"])
    c = jnp.sqrt(2.0 / jnp.pi)
    h1 = x1n @ p["w1"] + p["b1"]
    h1 = 0.5 * h1 * (1.0 + jnp.tanh(c * (h1 + 0.044715 * h1 ** 3)))
    ff = h1 @ p["w2"] + p["b2"]
    return ff + x1


if __name__ == "__main__":
    # Small config consistent with TransformerBlock.__init__:
    #   emb_dim=256, context_length=128, n_heads=2 (head_dim=128 -> lane-dense),
    #   drop_rate=0.0, qkv_bias=False.  Two query tiles of 64 exercise the
    #   incremental KV cache + online-softmax path.
    B, T, D, NH = 2, 128, 256, 2
    H = 4 * D

    key = jax.random.PRNGKey(0)
    ks = jax.random.split(key, 13)
    s = 0.02
    params = {
        "ln1_scale": 1.0 + 0.1 * jax.random.normal(ks[0], (1, D), jnp.float32),
        "ln1_shift": 0.1 * jax.random.normal(ks[1], (1, D), jnp.float32),
        "wq": s * jax.random.normal(ks[2], (D, D), jnp.float32),
        "wk": s * jax.random.normal(ks[3], (D, D), jnp.float32),
        "wv": s * jax.random.normal(ks[4], (D, D), jnp.float32),
        "wo": s * jax.random.normal(ks[5], (D, D), jnp.float32),
        "bo": s * jax.random.normal(ks[6], (1, D), jnp.float32),
        "ln2_scale": 1.0 + 0.1 * jax.random.normal(ks[7], (1, D), jnp.float32),
        "ln2_shift": 0.1 * jax.random.normal(ks[8], (1, D), jnp.float32),
        "w1": s * jax.random.normal(ks[9], (D, H), jnp.float32),
        "b1": s * jax.random.normal(ks[10], (1, H), jnp.float32),
        "w2": s * jax.random.normal(ks[11], (H, D), jnp.float32),
        "b2": s * jax.random.normal(ks[12], (1, D), jnp.float32),
    }
    x = jax.random.normal(jax.random.PRNGKey(1), (B, T, D), jnp.float32)

    out = transformer_block(x, params, NH, q_tile=64)
    out = jax.block_until_ready(out)

    ref = _reference(x, params, NH)
    assert out.shape == (B, T, D)
    max_err = float(jnp.max(jnp.abs(out - ref)))
    # bf16 matmuls (f32 accumulation) vs. an all-f32 reference -> loose tolerance.
    assert jnp.allclose(out, ref, atol=3e-2, rtol=3e-2), (
        f"mismatch vs reference (max abs err={max_err})")
    print("KERNEL_OK")
</pallas_src>

<mosaic_0001>
module attributes {stable_mosaic.version = 11 : i64} {
  func.func @_transformer_block_kernel(%arg0: i32, %arg1: i32, %arg2: memref<1x64x256xf32, #tpu.memory_space<vmem>>, %arg3: memref<1x256xf32, #tpu.memory_space<vmem>>, %arg4: memref<1x256xf32, #tpu.memory_space<vmem>>, %arg5: memref<256x256xbf16, #tpu.memory_space<vmem>>, %arg6: memref<256x256xbf16, #tpu.memory_space<vmem>>, %arg7: memref<256x256xbf16, #tpu.memory_space<vmem>>, %arg8: memref<256x256xbf16, #tpu.memory_space<vmem>>, %arg9: memref<1x256xf32, #tpu.memory_space<vmem>>, %arg10: memref<1x256xf32, #tpu.memory_space<vmem>>, %arg11: memref<1x256xf32, #tpu.memory_space<vmem>>, %arg12: memref<256x1024xbf16, #tpu.memory_space<vmem>>, %arg13: memref<1x1024xf32, #tpu.memory_space<vmem>>, %arg14: memref<1024x256xbf16, #tpu.memory_space<vmem>>, %arg15: memref<1x256xf32, #tpu.memory_space<vmem>>, %arg16: memref<1x64x256xf32, #tpu.memory_space<vmem>>, %arg17: memref<2x128x128xbf16, #tpu.memory_space<vmem>>, %arg18: memref<2x128x128xbf16, #tpu.memory_space<vmem>>, %arg19: memref<2x64x128xbf16, #tpu.memory_space<vmem>>, %arg20: memref<64x256xbf16, #tpu.memory_space<vmem>>) attributes {dimension_semantics = [#tpu.dimension_semantics<parallel>, #tpu.dimension_semantics<arbitrary>], iteration_bounds = array<i64: 2, 2>, scalar_prefetch = 0 : i64, scratch_operands = 4 : i64, tpu.core_type = #tpu.core_type<tc>, window_params = [{transform_indices = @transform_0, window_bounds = array<i64: 1, 64, 256>}, {pipeline_mode = #tpu.pipeline_mode<synchronous>, transform_indices = @transform_1, window_bounds = array<i64: 1, 256>}, {pipeline_mode = #tpu.pipeline_mode<synchronous>, transform_indices = @transform_2, window_bounds = array<i64: 1, 256>}, {pipeline_mode = #tpu.pipeline_mode<synchronous>, transform_indices = @transform_3, window_bounds = array<i64: 256, 256>}, {pipeline_mode = #tpu.pipeline_mode<synchronous>, transform_indices = @transform_4, window_bounds = array<i64: 256, 256>}, {pipeline_mode = #tpu.pipeline_mode<synchronous>, transform_indices = @transform_5, window_bounds = array<i64: 256, 256>}, {pipeline_mode = #tpu.pipeline_mode<synchronous>, transform_indices = @transform_6, window_bounds = array<i64: 256, 256>}, {pipeline_mode = #tpu.pipeline_mode<synchronous>, transform_indices = @transform_7, window_bounds = array<i64: 1, 256>}, {pipeline_mode = #tpu.pipeline_mode<synchronous>, transform_indices = @transform_8, window_bounds = array<i64: 1, 256>}, {pipeline_mode = #tpu.pipeline_mode<synchronous>, transform_indices = @transform_9, window_bounds = array<i64: 1, 256>}, {pipeline_mode = #tpu.pipeline_mode<synchronous>, transform_indices = @transform_10, window_bounds = array<i64: 256, 1024>}, {pipeline_mode = #tpu.pipeline_mode<synchronous>, transform_indices = @transform_11, window_bounds = array<i64: 1, 1024>}, {pipeline_mode = #tpu.pipeline_mode<synchronous>, transform_indices = @transform_12, window_bounds = array<i64: 1024, 256>}, {pipeline_mode = #tpu.pipeline_mode<synchronous>, transform_indices = @transform_13, window_bounds = array<i64: 1, 256>}, {transform_indices = @transform_14, window_bounds = array<i64: 1, 64, 256>}]} {
    %c0 = arith.constant 0 : index
    %c0_0 = arith.constant 0 : index
    %c0_1 = arith.constant 0 : index
    %0 = vector.load %arg2[%c0, %c0_0, %c0_1] : memref<1x64x256xf32, #tpu.memory_space<vmem>>, vector<1x64x256xf32>
    %1 = vector.shape_cast %0 : vector<1x64x256xf32> to vector<64x256xf32>
    %c0_2 = arith.constant 0 : index
    %c0_3 = arith.constant 0 : index
    %2 = vector.load %arg3[%c0_2, %c0_3] : memref<1x256xf32, #tpu.memory_space<vmem>>, vector<1x256xf32>
    %c0_4 = arith.constant 0 : index
    %c0_5 = arith.constant 0 : index
    %3 = vector.load %arg4[%c0_4, %c0_5] : memref<1x256xf32, #tpu.memory_space<vmem>>, vector<1x256xf32>
    %cst = arith.constant dense<0.000000e+00> : vector<64xf32>
    %4 = vector.multi_reduction <add>, %1, %cst [1] : vector<64x256xf32> to vector<64xf32>
    %5 = vector.shape_cast %4 : vector<64xf32> to vector<64x1xf32>
    %cst_6 = arith.constant 2.560000e+02 : f32
    %6 = vector.broadcast %cst_6 : f32 to vector<64x1xf32>
    %7 = arith.divf %5, %6 : vector<64x1xf32>
    %8 = vector.broadcast %7 : vector<64x1xf32> to vector<64x256xf32>
    %9 = arith.subf %1, %8 : vector<64x256xf32>
    %10 = arith.mulf %9, %9 : vector<64x256xf32>
    %cst_7 = arith.constant dense<0.000000e+00> : vector<64xf32>
    %11 = vector.multi_reduction <add>, %10, %cst_7 [1] : vector<64x256xf32> to vector<64xf32>
    %12 = vector.shape_cast %11 : vector<64xf32> to vector<64x1xf32>
    %cst_8 = arith.constant 2.560000e+02 : f32
    %13 = vector.broadcast %cst_8 : f32 to vector<64x1xf32>
    %14 = arith.divf %12, %13 : vector<64x1xf32>
    %cst_9 = arith.constant 9.99999974E-6 : f32
    %15 = vector.broadcast %cst_9 : f32 to vector<64x1xf32>
    %16 = arith.addf %14, %15 : vector<64x1xf32>
    %17 = math.rsqrt %16 : vector<64x1xf32>
    %18 = vector.broadcast %17 : vector<64x1xf32> to vector<64x256xf32>
    %19 = arith.mulf %9, %18 : vector<64x256xf32>
    %20 = vector.broadcast %2 : vector<1x256xf32> to vector<64x256xf32>
    %21 = arith.mulf %19, %20 : vector<64x256xf32>
    %22 = vector.broadcast %3 : vector<1x256xf32> to vector<64x256xf32>
    %23 = arith.addf %21, %22 : vector<64x256xf32>
    %24 = arith.truncf %23 : vector<64x256xf32> to vector<64x256xbf16>
    %c0_10 = arith.constant 0 : index
    %c0_11 = arith.constant 0 : index
    %25 = vector.load %arg5[%c0_10, %c0_11] : memref<256x256xbf16, #tpu.memory_space<vmem>>, vector<256x256xbf16>
    %cst_12 = arith.constant dense<0.000000e+00> : vector<64x256xf32>
    %26 = tpu.matmul %24, %25, %cst_12 {dimension_numbers = #tpu.dot_dimension_numbers<[1], [0], [0], [1], [0, 0, 1, 1], [], []>} : vector<64x256xbf16>, vector<256x256xbf16>, vector<64x256xf32> -> vector<64x256xf32>
    %cst_13 = arith.constant 0.0883883461 : f32
    %27 = vector.broadcast %cst_13 : f32 to vector<64x256xf32>
    %28 = arith.mulf %26, %27 : vector<64x256xf32>
    %c0_14 = arith.constant 0 : index
    %c0_15 = arith.constant 0 : index
    %29 = vector.load %arg6[%c0_14, %c0_15] : memref<256x256xbf16, #tpu.memory_space<vmem>>, vector<256x256xbf16>
    %cst_16 = arith.constant dense<0.000000e+00> : vector<64x256xf32>
    %30 = tpu.matmul %24, %29, %cst_16 {dimension_numbers = #tpu.dot_dimension_numbers<[1], [0], [0], [1], [0, 0, 1, 1], [], []>} : vector<64x256xbf16>, vector<256x256xbf16>, vector<64x256xf32> -> vector<64x256xf32>
    %c0_17 = arith.constant 0 : index
    %c0_18 = arith.constant 0 : index
    %31 = vector.load %arg7[%c0_17, %c0_18] : memref<256x256xbf16, #tpu.memory_space<vmem>>, vector<256x256xbf16>
    %cst_19 = arith.constant dense<0.000000e+00> : vector<64x256xf32>
    %32 = tpu.matmul %24, %31, %cst_19 {dimension_numbers = #tpu.dot_dimension_numbers<[1], [0], [0], [1], [0, 0, 1, 1], [], []>} : vector<64x256xbf16>, vector<256x256xbf16>, vector<64x256xf32> -> vector<64x256xf32>
    %c64_i32 = arith.constant 64 : i32
    %33 = arith.muli %arg1, %c64_i32 : i32
    %34 = tpu.assume_multiple %33, 64 : i32
    %35 = vector.extract_strided_slice %28 {offsets = [0, 0], sizes = [64, 128], strides = [1, 1]} : vector<64x256xf32> to vector<64x128xf32>
    %36 = arith.truncf %35 : vector<64x128xf32> to vector<64x128xbf16>
    %c0_20 = arith.constant 0 : index
    %c0_21 = arith.constant 0 : index
    %c0_22 = arith.constant 0 : index
    %37 = vector.load %arg19[%c0_20, %c0_21, %c0_22] : memref<2x64x128xbf16, #tpu.memory_space<vmem>>, vector<1x64x128xbf16>
    %38 = vector.shape_cast %37 : vector<1x64x128xbf16> to vector<64x128xbf16>
    %39 = vector.shape_cast %36 : vector<64x128xbf16> to vector<1x64x128xbf16>
    tpu.vector_store %arg19[%c0_20, %c0_21, %c0_22], %39 {strides = array<i32>} : memref<2x64x128xbf16, #tpu.memory_space<vmem>>, vector<1x64x128xbf16>,
    %40 = vector.extract_strided_slice %30 {offsets = [0, 0], sizes = [64, 128], strides = [1, 1]} : vector<64x256xf32> to vector<64x128xf32>
    %41 = arith.truncf %40 : vector<64x128xf32> to vector<64x128xbf16>
    %c0_23 = arith.constant 0 : index
    %42 = arith.index_cast %34 : i32 to index
    %c0_24 = arith.constant 0 : index
    %43 = vector.load %arg17[%c0_23, %42, %c0_24] : memref<2x128x128xbf16, #tpu.memory_space<vmem>>, vector<1x64x128xbf16>
    %44 = vector.shape_cast %43 : vector<1x64x128xbf16> to vector<64x128xbf16>
    %45 = vector.shape_cast %41 : vector<64x128xbf16> to vector<1x64x128xbf16>
    tpu.vector_store %arg17[%c0_23, %42, %c0_24], %45 {strides = array<i32>} : memref<2x128x128xbf16, #tpu.memory_space<vmem>>, vector<1x64x128xbf16>,
    %46 = vector.extract_strided_slice %32 {offsets = [0, 0], sizes = [64, 128], strides = [1, 1]} : vector<64x256xf32> to vector<64x128xf32>
    %47 = arith.truncf %46 : vector<64x128xf32> to vector<64x128xbf16>
    %c0_25 = arith.constant 0 : index
    %48 = arith.index_cast %34 : i32 to index
    %c0_26 = arith.constant 0 : index
    %49 = vector.load %arg18[%c0_25, %48, %c0_26] : memref<2x128x128xbf16, #tpu.memory_space<vmem>>, vector<1x64x128xbf16>
    %50 = vector.shape_cast %49 : vector<1x64x128xbf16> to vector<64x128xbf16>
    %51 = vector.shape_cast %47 : vector<64x128xbf16> to vector<1x64x128xbf16>
    tpu.vector_store %arg18[%c0_25, %48, %c0_26], %51 {strides = array<i32>} : memref<2x128x128xbf16, #tpu.memory_space<vmem>>, vector<1x64x128xbf16>,
    %52 = vector.extract_strided_slice %28 {offsets = [0, 128], sizes = [64, 128], strides = [1, 1]} : vector<64x256xf32> to vector<64x128xf32>
    %53 = arith.truncf %52 : vector<64x128xf32> to vector<64x128xbf16>
    %c1 = arith.constant 1 : index
    %c0_27 = arith.constant 0 : index
    %c0_28 = arith.constant 0 : index
    %54 = vector.load %arg19[%c1, %c0_27, %c0_28] : memref<2x64x128xbf16, #tpu.memory_space<vmem>>, vector<1x64x128xbf16>
    %55 = vector.shape_cast %54 : vector<1x64x128xbf16> to vector<64x128xbf16>
    %56 = vector.shape_cast %53 : vector<64x128xbf16> to vector<1x64x128xbf16>
    tpu.vector_store %arg19[%c1, %c0_27, %c0_28], %56 {strides = array<i32>} : memref<2x64x128xbf16, #tpu.memory_space<vmem>>, vector<1x64x128xbf16>,
    %57 = vector.extract_strided_slice %30 {offsets = [0, 128], sizes = [64, 128], strides = [1, 1]} : vector<64x256xf32> to vector<64x128xf32>
    %58 = arith.truncf %57 : vector<64x128xf32> to vector<64x128xbf16>
    %c1_29 = arith.constant 1 : index
    %59 = arith.index_cast %34 : i32 to index
    %c0_30 = arith.constant 0 : index
    %60 = vector.load %arg17[%c1_29, %59, %c0_30] : memref<2x128x128xbf16, #tpu.memory_space<vmem>>, vector<1x64x128xbf16>
    %61 = vector.shape_cast %60 : vector<1x64x128xbf16> to vector<64x128xbf16>
    %62 = vector.shape_cast %58 : vector<64x128xbf16> to vector<1x64x128xbf16>
    tpu.vector_store %arg17[%c1_29, %59, %c0_30], %62 {strides = array<i32>} : memref<2x128x128xbf16, #tpu.memory_space<vmem>>, vector<1x64x128xbf16>,
    %63 = vector.extract_strided_slice %32 {offsets = [0, 128], sizes = [64, 128], strides = [1, 1]} : vector<64x256xf32> to vector<64x128xf32>
    %64 = arith.truncf %63 : vector<64x128xf32> to vector<64x128xbf16>
    %c1_31 = arith.constant 1 : index
    %65 = arith.index_cast %34 : i32 to index
    %c0_32 = arith.constant 0 : index
    %66 = vector.load %arg18[%c1_31, %65, %c0_32] : memref<2x128x128xbf16, #tpu.memory_space<vmem>>, vector<1x64x128xbf16>
    %67 = vector.shape_cast %66 : vector<1x64x128xbf16> to vector<64x128xbf16>
    %68 = vector.shape_cast %64 : vector<64x128xbf16> to vector<1x64x128xbf16>
    tpu.vector_store %arg18[%c1_31, %65, %c0_32], %68 {strides = array<i32>} : memref<2x128x128xbf16, #tpu.memory_space<vmem>>, vector<1x64x128xbf16>,
    %c0_33 = arith.constant 0 : index
    %c0_34 = arith.constant 0 : index
    %c0_35 = arith.constant 0 : index
    %69 = vector.load %arg19[%c0_33, %c0_34, %c0_35] : memref<2x64x128xbf16, #tpu.memory_space<vmem>>, vector<2x64x128xbf16>
    %70 = tpu.iota {dimensions = array<i32: 0>} : vector<64x64xi32>
    %71 = tpu.iota {dimensions = array<i32: 1>} : vector<64x64xi32>
    %cst_36 = arith.constant -1.000000e+30 : f32
    %72 = vector.broadcast %cst_36 : f32 to vector<2x64x1xf32>
    %cst_37 = arith.constant 0.000000e+00 : f32
    %73 = vector.broadcast %cst_37 : f32 to vector<2x64x1xf32>
    %cst_38 = arith.constant 0.000000e+00 : f32
    %74 = vector.broadcast %cst_38 : f32 to vector<2x64x128xf32>
    %c1_i32 = arith.constant 1 : i32
    %75 = arith.addi %arg1, %c1_i32 : i32
    %cst_39 = arith.constant -1.000000e+30 : f32
    %c0_i32 = arith.constant 0 : i32
    %76 = arith.subi %75, %c0_i32 : i32
    %77 = arith.addi %c0_i32, %76 : i32
    %c1_i32_40 = arith.constant 1 : i32
    %78:3 = scf.for %arg21 = %c0_i32 to %77 step %c1_i32_40 iter_args(%arg22 = %72, %arg23 = %73, %arg24 = %74) -> (vector<2x64x1xf32>, vector<2x64x1xf32>, vector<2x64x128xf32>)  : i32 {
      %c64_i32_77 = arith.constant 64 : i32
      %148 = arith.muli %arg21, %c64_i32_77 : i32
      %149 = tpu.assume_multiple %148, 64 : i32
      %c0_78 = arith.constant 0 : index
      %150 = arith.index_cast %149 : i32 to index
      %c0_79 = arith.constant 0 : index
      %151 = vector.load %arg17[%c0_78, %150, %c0_79] : memref<2x128x128xbf16, #tpu.memory_space<vmem>>, vector<2x64x128xbf16>
      %c0_80 = arith.constant 0 : index
      %152 = arith.index_cast %149 : i32 to index
      %c0_81 = arith.constant 0 : index
      %153 = vector.load %arg18[%c0_80, %152, %c0_81] : memref<2x128x128xbf16, #tpu.memory_space<vmem>>, vector<2x64x128xbf16>
      "tpu.trace_start"() <{level = 10 : i32, message = "hqd,hkd->hqk"}> : () -> ()
      %cst_82 = arith.constant dense<0.000000e+00> : vector<2x64x64xf32>
      %154 = tpu.matmul %69, %151, %cst_82 {dimension_numbers = #tpu.dot_dimension_numbers<[2], [2], [1], [1], [0, 0, 0, 1, 1, 1], [0], [0]>} : vector<2x64x128xbf16>, vector<2x64x128xbf16>, vector<2x64x64xf32> -> vector<2x64x64xf32>
      "tpu.trace_stop"() : () -> ()
      %155 = arith.subi %arg21, %arg1 : i32
      %c64_i32_83 = arith.constant 64 : i32
      %156 = arith.muli %155, %c64_i32_83 : i32
      %157 = vector.broadcast %156 : i32 to vector<64x64xi32>
      %158 = arith.addi %71, %157 : vector<64x64xi32>
      %159 = arith.cmpi sgt, %158, %70 : vector<64x64xi32>
      %160 = vector.shape_cast %159 : vector<64x64xi1> to vector<1x64x64xi1>
      %161 = vector.shape_cast %160 : vector<1x64x64xi1> to vector<1x64x64xi1>
      %162 = vector.broadcast %161 : vector<1x64x64xi1> to vector<2x64x64xi1>
      %163 = vector.broadcast %cst_39 : f32 to vector<2x64x64xf32>
      %164 = arith.select %162, %163, %154 : vector<2x64x64xi1>, vector<2x64x64xf32>
      %cst_84 = arith.constant dense<0xFF800000> : vector<2x64xf32>
      %165 = vector.multi_reduction <maximumf>, %164, %cst_84 [2] : vector<2x64x64xf32> to vector<2x64xf32>
      %166 = vector.shape_cast %165 : vector<2x64xf32> to vector<2x64x1xf32>
      %167 = arith.maximumf %arg22, %166 : vector<2x64x1xf32>
      %168 = arith.subf %arg22, %167 : vector<2x64x1xf32>
      %169 = math.exp %168 : vector<2x64x1xf32>
      %170 = vector.broadcast %167 : vector<2x64x1xf32> to vector<2x64x64xf32>
      %171 = arith.subf %164, %170 : vector<2x64x64xf32>
      %172 = math.exp %171 : vector<2x64x64xf32>
      %173 = arith.mulf %169, %arg23 : vector<2x64x1xf32>
      %cst_85 = arith.constant dense<0.000000e+00> : vector<2x64xf32>
      %174 = vector.multi_reduction <add>, %172, %cst_85 [2] : vector<2x64x64xf32> to vector<2x64xf32>
      %175 = vector.shape_cast %174 : vector<2x64xf32> to vector<2x64x1xf32>
      %176 = arith.addf %173, %175 : vector<2x64x1xf32>
      %177 = vector.broadcast %169 : vector<2x64x1xf32> to vector<2x64x128xf32>
      %178 = arith.mulf %177, %arg24 : vector<2x64x128xf32>
      %179 = arith.truncf %172 : vector<2x64x64xf32> to vector<2x64x64xbf16>
      "tpu.trace_start"() <{level = 10 : i32, message = "hqk,hkd->hqd"}> : () -> ()
      %cst_86 = arith.constant dense<0.000000e+00> : vector<2x64x128xf32>
      %180 = tpu.matmul %179, %153, %cst_86 {dimension_numbers = #tpu.dot_dimension_numbers<[2], [1], [1], [2], [0, 0, 0, 1, 1, 2], [0], [0]>} : vector<2x64x64xbf16>, vector<2x64x128xbf16>, vector<2x64x128xf32> -> vector<2x64x128xf32>
      "tpu.trace_stop"() : () -> ()
      %181 = arith.addf %178, %180 : vector<2x64x128xf32>
      scf.yield %167, %176, %181 : vector<2x64x1xf32>, vector<2x64x1xf32>, vector<2x64x128xf32>
    }
    %79 = tpu.reciprocal %78#1 {approx = true} : vector<2x64x1xf32> -> vector<2x64x1xf32>
    %80 = vector.broadcast %79 : vector<2x64x1xf32> to vector<2x64x128xf32>
    %81 = arith.mulf %78#2, %80 : vector<2x64x128xf32>
    %82 = vector.extract_strided_slice %81 {offsets = [0, 0, 0], sizes = [1, 64, 128], strides = [1, 1, 1]} : vector<2x64x128xf32> to vector<1x64x128xf32>
    %83 = vector.shape_cast %82 : vector<1x64x128xf32> to vector<64x128xf32>
    %84 = arith.truncf %83 : vector<64x128xf32> to vector<64x128xbf16>
    %c0_41 = arith.constant 0 : index
    %c0_42 = arith.constant 0 : index
    %85 = vector.load %arg20[%c0_41, %c0_42] : memref<64x256xbf16, #tpu.memory_space<vmem>>, vector<64x128xbf16>
    tpu.vector_store %arg20[%c0_41, %c0_42], %84 {strides = array<i32>} : memref<64x256xbf16, #tpu.memory_space<vmem>>, vector<64x128xbf16>,
    %86 = vector.extract_strided_slice %81 {offsets = [1, 0, 0], sizes = [1, 64, 128], strides = [1, 1, 1]} : vector<2x64x128xf32> to vector<1x64x128xf32>
    %87 = vector.shape_cast %86 : vector<1x64x128xf32> to vector<64x128xf32>
    %88 = arith.truncf %87 : vector<64x128xf32> to vector<64x128xbf16>
    %c0_43 = arith.constant 0 : index
    %c128 = arith.constant 128 : index
    %89 = vector.load %arg20[%c0_43, %c128] : memref<64x256xbf16, #tpu.memory_space<vmem>>, vector<64x128xbf16>
    tpu.vector_store %arg20[%c0_43, %c128], %88 {strides = array<i32>} : memref<64x256xbf16, #tpu.memory_space<vmem>>, vector<64x128xbf16>,
    %c0_44 = arith.constant 0 : index
    %c0_45 = arith.constant 0 : index
    %90 = vector.load %arg20[%c0_44, %c0_45] : memref<64x256xbf16, #tpu.memory_space<vmem>>, vector<64x256xbf16>
    %c0_46 = arith.constant 0 : index
    %c0_47 = arith.constant 0 : index
    %91 = vector.load %arg8[%c0_46, %c0_47] : memref<256x256xbf16, #tpu.memory_space<vmem>>, vector<256x256xbf16>
    %cst_48 = arith.constant dense<0.000000e+00> : vector<64x256xf32>
    %92 = tpu.matmul %90, %91, %cst_48 {dimension_numbers = #tpu.dot_dimension_numbers<[1], [0], [0], [1], [0, 0, 1, 1], [], []>} : vector<64x256xbf16>, vector<256x256xbf16>, vector<64x256xf32> -> vector<64x256xf32>
    %c0_49 = arith.constant 0 : index
    %c0_50 = arith.constant 0 : index
    %93 = vector.load %arg9[%c0_49, %c0_50] : memref<1x256xf32, #tpu.memory_space<vmem>>, vector<1x256xf32>
    %94 = vector.broadcast %93 : vector<1x256xf32> to vector<64x256xf32>
    %95 = arith.addf %92, %94 : vector<64x256xf32>
    %96 = arith.addf %95, %1 : vector<64x256xf32>
    %c0_51 = arith.constant 0 : index
    %c0_52 = arith.constant 0 : index
    %97 = vector.load %arg10[%c0_51, %c0_52] : memref<1x256xf32, #tpu.memory_space<vmem>>, vector<1x256xf32>
    %c0_53 = arith.constant 0 : index
    %c0_54 = arith.constant 0 : index
    %98 = vector.load %arg11[%c0_53, %c0_54] : memref<1x256xf32, #tpu.memory_space<vmem>>, vector<1x256xf32>
    %cst_55 = arith.constant dense<0.000000e+00> : vector<64xf32>
    %99 = vector.multi_reduction <add>, %96, %cst_55 [1] : vector<64x256xf32> to vector<64xf32>
    %100 = vector.shape_cast %99 : vector<64xf32> to vector<64x1xf32>
    %cst_56 = arith.constant 2.560000e+02 : f32
    %101 = vector.broadcast %cst_56 : f32 to vector<64x1xf32>
    %102 = arith.divf %100, %101 : vector<64x1xf32>
    %103 = vector.broadcast %102 : vector<64x1xf32> to vector<64x256xf32>
    %104 = arith.subf %96, %103 : vector<64x256xf32>
    %105 = arith.mulf %104, %104 : vector<64x256xf32>
    %cst_57 = arith.constant dense<0.000000e+00> : vector<64xf32>
    %106 = vector.multi_reduction <add>, %105, %cst_57 [1] : vector<64x256xf32> to vector<64xf32>
    %107 = vector.shape_cast %106 : vector<64xf32> to vector<64x1xf32>
    %cst_58 = arith.constant 2.560000e+02 : f32
    %108 = vector.broadcast %cst_58 : f32 to vector<64x1xf32>
    %109 = arith.divf %107, %108 : vector<64x1xf32>
    %cst_59 = arith.constant 9.99999974E-6 : f32
    %110 = vector.broadcast %cst_59 : f32 to vector<64x1xf32>
    %111 = arith.addf %109, %110 : vector<64x1xf32>
    %112 = math.rsqrt %111 : vector<64x1xf32>
    %113 = vector.broadcast %112 : vector<64x1xf32> to vector<64x256xf32>
    %114 = arith.mulf %104, %113 : vector<64x256xf32>
    %115 = vector.broadcast %97 : vector<1x256xf32> to vector<64x256xf32>
    %116 = arith.mulf %114, %115 : vector<64x256xf32>
    %117 = vector.broadcast %98 : vector<1x256xf32> to vector<64x256xf32>
    %118 = arith.addf %116, %117 : vector<64x256xf32>
    %119 = arith.truncf %118 : vector<64x256xf32> to vector<64x256xbf16>
    %c0_60 = arith.constant 0 : index
    %c0_61 = arith.constant 0 : index
    %120 = vector.load %arg12[%c0_60, %c0_61] : memref<256x1024xbf16, #tpu.memory_space<vmem>>, vector<256x1024xbf16>
    %cst_62 = arith.constant dense<0.000000e+00> : vector<64x1024xf32>
    %121 = tpu.matmul %119, %120, %cst_62 {dimension_numbers = #tpu.dot_dimension_numbers<[1], [0], [0], [1], [0, 0, 1, 1], [], []>} : vector<64x256xbf16>, vector<256x1024xbf16>, vector<64x1024xf32> -> vector<64x1024xf32>
    %c0_63 = arith.constant 0 : index
    %c0_64 = arith.constant 0 : index
    %122 = vector.load %arg13[%c0_63, %c0_64] : memref<1x1024xf32, #tpu.memory_space<vmem>>, vector<1x1024xf32>
    %123 = vector.broadcast %122 : vector<1x1024xf32> to vector<64x1024xf32>
    %124 = arith.addf %121, %123 : vector<64x1024xf32>
    %cst_65 = arith.constant 5.000000e-01 : f32
    %125 = vector.broadcast %cst_65 : f32 to vector<64x1024xf32>
    %126 = arith.mulf %125, %124 : vector<64x1024xf32>
    %127 = arith.mulf %124, %124 : vector<64x1024xf32>
    %128 = arith.mulf %127, %124 : vector<64x1024xf32>
    %cst_66 = arith.constant 4.471500e-02 : f32
    %129 = vector.broadcast %cst_66 : f32 to vector<64x1024xf32>
    %130 = arith.mulf %129, %128 : vector<64x1024xf32>
    %131 = arith.addf %124, %130 : vector<64x1024xf32>
    %cst_67 = arith.constant 0.797884583 : f32
    %132 = vector.broadcast %cst_67 : f32 to vector<64x1024xf32>
    %133 = arith.mulf %132, %131 : vector<64x1024xf32>
    %134 = math.tanh %133 : vector<64x1024xf32>
    %cst_68 = arith.constant 1.000000e+00 : f32
    %135 = vector.broadcast %cst_68 : f32 to vector<64x1024xf32>
    %136 = arith.addf %135, %134 : vector<64x1024xf32>
    %137 = arith.mulf %126, %136 : vector<64x1024xf32>
    %138 = arith.truncf %137 : vector<64x1024xf32> to vector<64x1024xbf16>
    %c0_69 = arith.constant 0 : index
    %c0_70 = arith.constant 0 : index
    %139 = vector.load %arg14[%c0_69, %c0_70] : memref<1024x256xbf16, #tpu.memory_space<vmem>>, vector<1024x256xbf16>
    %cst_71 = arith.constant dense<0.000000e+00> : vector<64x256xf32>
    %140 = tpu.matmul %138, %139, %cst_71 {dimension_numbers = #tpu.dot_dimension_numbers<[1], [0], [0], [1], [0, 0, 1, 1], [], []>} : vector<64x1024xbf16>, vector<1024x256xbf16>, vector<64x256xf32> -> vector<64x256xf32>
    %c0_72 = arith.constant 0 : index
    %c0_73 = arith.constant 0 : index
    %141 = vector.load %arg15[%c0_72, %c0_73] : memref<1x256xf32, #tpu.memory_space<vmem>>, vector<1x256xf32>
    %142 = vector.broadcast %141 : vector<1x256xf32> to vector<64x256xf32>
    %143 = arith.addf %140, %142 : vector<64x256xf32>
    %144 = arith.addf %143, %96 : vector<64x256xf32>
    %c0_74 = arith.constant 0 : index
    %c0_75 = arith.constant 0 : index
    %c0_76 = arith.constant 0 : index
    %145 = vector.load %arg16[%c0_74, %c0_75, %c0_76] : memref<1x64x256xf32, #tpu.memory_space<vmem>>, vector<1x64x256xf32>
    %146 = vector.shape_cast %145 : vector<1x64x256xf32> to vector<64x256xf32>
    %147 = vector.shape_cast %144 : vector<64x256xf32> to vector<1x64x256xf32>
    tpu.vector_store %arg16[%c0_74, %c0_75, %c0_76], %147 {strides = array<i32>} : memref<1x64x256xf32, #tpu.memory_space<vmem>>, vector<1x64x256xf32>,
    return
  }
  func.func @transform_0(%arg0: i32, %arg1: i32) -> (i32, i32, i32) {
    %c0_i32 = arith.constant 0 : i32
    %c0_i32_0 = arith.constant 0 : i32
    return %arg0, %arg1, %c0_i32 : i32, i32, i32
  }
  func.func @transform_1(%arg0: i32, %arg1: i32) -> (i32, i32) {
    %c0_i32 = arith.constant 0 : i32
    %c0_i32_0 = arith.constant 0 : i32
    %c0_i32_1 = arith.constant 0 : i32
    return %c0_i32, %c0_i32_0 : i32, i32
  }
  func.func @transform_2(%arg0: i32, %arg1: i32) -> (i32, i32) {
    %c0_i32 = arith.constant 0 : i32
    %c0_i32_0 = arith.constant 0 : i32
    %c0_i32_1 = arith.constant 0 : i32
    return %c0_i32, %c0_i32_0 : i32, i32
  }
  func.func @transform_3(%arg0: i32, %arg1: i32) -> (i32, i32) {
    %c0_i32 = arith.constant 0 : i32
    %c0_i32_0 = arith.constant 0 : i32
    %c0_i32_1 = arith.constant 0 : i32
    return %c0_i32, %c0_i32_0 : i32, i32
  }
  func.func @transform_4(%arg0: i32, %arg1: i32) -> (i32, i32) {
    %c0_i32 = arith.constant 0 : i32
    %c0_i32_0 = arith.constant 0 : i32
    %c0_i32_1 = arith.constant 0 : i32
    return %c0_i32, %c0_i32_0 : i32, i32
  }
  func.func @transform_5(%arg0: i32, %arg1: i32) -> (i32, i32) {
    %c0_i32 = arith.constant 0 : i32
    %c0_i32_0 = arith.constant 0 : i32
    %c0_i32_1 = arith.constant 0 : i32
    return %c0_i32, %c0_i32_0 : i32, i32
  }
  func.func @transform_6(%arg0: i32, %arg1: i32) -> (i32, i32) {
    %c0_i32 = arith.constant 0 : i32
    %c0_i32_0 = arith.constant 0 : i32
    %c0_i32_1 = arith.constant 0 : i32
    return %c0_i32, %c0_i32_0 : i32, i32
  }
  func.func @transform_7(%arg0: i32, %arg1: i32) -> (i32, i32) {
    %c0_i32 = arith.constant 0 : i32
    %c0_i32_0 = arith.constant 0 : i32
    %c0_i32_1 = arith.constant 0 : i32
    return %c0_i32, %c0_i32_0 : i32, i32
  }
  func.func @transform_8(%arg0: i32, %arg1: i32) -> (i32, i32) {
    %c0_i32 = arith.constant 0 : i32
    %c0_i32_0 = arith.constant 0 : i32
    %c0_i32_1 = arith.constant 0 : i32
    return %c0_i32, %c0_i32_0 : i32, i32
  }
  func.func @transform_9(%arg0: i32, %arg1: i32) -> (i32, i32) {
    %c0_i32 = arith.constant 0 : i32
    %c0_i32_0 = arith.constant 0 : i32
    %c0_i32_1 = arith.constant 0 : i32
    return %c0_i32, %c0_i32_0 : i32, i32
  }
  func.func @transform_10(%arg0: i32, %arg1: i32) -> (i32, i32) {
    %c0_i32 = arith.constant 0 : i32
    %c0_i32_0 = arith.constant 0 : i32
    %c0_i32_1 = arith.constant 0 : i32
    return %c0_i32, %c0_i32_0 : i32, i32
  }
  func.func @transform_11(%arg0: i32, %arg1: i32) -> (i32, i32) {
    %c0_i32 = arith.constant 0 : i32
    %c0_i32_0 = arith.constant 0 : i32
    %c0_i32_1 = arith.constant 0 : i32
    return %c0_i32, %c0_i32_0 : i32, i32
  }
  func.func @transform_12(%arg0: i32, %arg1: i32) -> (i32, i32) {
    %c0_i32 = arith.constant 0 : i32
    %c0_i32_0 = arith.constant 0 : i32
    %c0_i32_1 = arith.constant 0 : i32
    return %c0_i32, %c0_i32_0 : i32, i32
  }
  func.func @transform_13(%arg0: i32, %arg1: i32) -> (i32, i32) {
    %c0_i32 = arith.constant 0 : i32
    %c0_i32_0 = arith.constant 0 : i32
    %c0_i32_1 = arith.constant 0 : i32
    return %c0_i32, %c0_i32_0 : i32, i32
  }
  func.func @transform_14(%arg0: i32, %arg1: i32) -> (i32, i32, i32) {
    %c0_i32 = arith.constant 0 : i32
    %c0_i32_0 = arith.constant 0 : i32
    return %arg0, %arg1, %c0_i32 : i32, i32, i32
  }
}

</mosaic_0001>

<bundles_post_ra>
// kernel: tpu_custom_call.1
= control target key start
LH: loop header
LB: loop body
LE: loop exit
PB: predicated region body
PF: predicated region fallthrough
CT: control target
= control target key end

     0   :  { %s12245_s0 = inlined_call_operand.hbm [shape: f32[2,128,256], index: 0, kind: input, shape index: {}]   ;;  %s12246_s1 = inlined_call_operand.vmem [shape: f32[1,256], index: 1, kind: input, shape index: {}]   ;;  %s12247_s2 = inlined_call_operand.vmem [shape: f32[1,256], index: 2, kind: input, shape index: {}]   ;;  %s12248_s3 = inlined_call_operand.hbm [shape: bf16[256,256], index: 3, kind: input, shape index: {}]   ;;  %s12249_s4 = inlined_call_operand.hbm [shape: bf16[256,256], index: 4, kind: input, shape index: {}]   ;;  %s12250_s5 = inlined_call_operand.hbm [shape: bf16[256,256], index: 5, kind: input, shape index: {}]   ;;  %s12251_s6 = inlined_call_operand.hbm [shape: bf16[256,256], index: 6, kind: input, shape index: {}]   ;;  %s12252_s7 = inlined_call_operand.vmem [shape: f32[1,256], index: 7, kind: input, shape index: {}]   ;;  %s12253_s8 = inlined_call_operand.vmem [shape: f32[1,256], index: 8, kind: input, shape index: {}]   ;;  %s12254_s9 = inlined_call_operand.vmem [shape: f32[1,256], index: 9, kind: input, shape index: {}]   ;;  %s12255_s10 = inlined_call_operand.hbm [shape: bf16[256,1024], index: 10, kind: input, shape index: {}]   ;;  %s12256_s11 = inlined_call_operand.vmem [shape: f32[1,1024], index: 11, kind: input, shape index: {}]   ;;  %s12257_s12 = inlined_call_operand.hbm [shape: bf16[1024,256], index: 12, kind: input, shape index: {}]   ;;  %s12258_s13 = inlined_call_operand.vmem [shape: f32[1,256], index: 13, kind: input, shape index: {}]   ;;  %s12259_s14 = inlined_call_operand.hbm [shape: f32[2,128,256], index: 14, kind: output, shape index: {}]  }
   0x1   :  { %12361 = sst [smem:[#allocation121_spill]] %s12246_s1 }
   0x2   :  { %12362 = sst [smem:[#allocation122_spill]] %s12247_s2 }
   0x3   :  { %12363 = sst [smem:[#allocation123_spill]] %s12248_s3 }
   0x4   :  { %12364 = sst [smem:[#allocation124_spill]] %s12249_s4 }
   0x5   :  { %12365 = sst [smem:[#allocation125_spill]] %s12250_s5 }
   0x6   :  { %12366 = sst [smem:[#allocation126_spill]] %s12251_s6 }
   0x7   :  { %12367 = sst [smem:[#allocation127_spill]] %s12252_s7 }
   0x8   :  { %12368 = sst [smem:[#allocation128_spill]] %s12253_s8 }
   0x9   :  { %12369 = sst [smem:[#allocation129_spill]] %s12254_s9 }
   0xa   :  { %12370 = sst [smem:[#allocation130_spill]] %s12256_s11 }
   0xb   :  { %12371 = sst [smem:[#allocation131_spill]] %s12258_s13 }
   0xc   :  { %12372 = sst [smem:[#allocation132_spill]] %s12259_s14 }
   0xd   :  { %19 = vsyncpa [#allocation7], 0 }
   0xe   :  { %21 = vsyncpa [#allocation7 + $0x1], 0 }
   0xf   :  { %22 = vsyncpa [#allocation10], 0 }
  0x10   :  { %23 = vsyncpa [#allocation13], 0 }
  0x11   :  { %24 = vsyncpa [#allocation16], 0 }
  0x12   :  { %25 = vsyncpa [#allocation8], 0 }
  0x13   :  { %27 = vsyncpa [#allocation8 + $0x1], 0  ;;  %s9248_s29 = smov 0   ;;  %s9250_s30 = smov 0  }
  0x14   :  { %s9252_s15 = smov 0   ;;  %s9254_s16 = smov 0  }
  0x15   :  { %s9256_s17 = smov 0   ;;  %s9258_s18 = smov 0  }
  0x16   :  { %s9260_s19 = smov 0   ;;  %s9262_s20 = smov 0  }
  0x17 LB: > { %12373 = sst [smem:[#allocation24_spill]] %s8815_s16  ;;  %s12260_s21 = sadd.s32 4294967295, %s8831_s20   ;;  %s8831_s20 = sphi %s9262_s20, %s33_s20   ;;  %s8827_s19 = sphi %s9260_s19, %s12767_s19   ;;  %s8823_s18 = sphi %s9258_s18, %s12766_s18   ;;  %s8819_s17 = sphi %s9256_s17, %s12765_s17   ;;  %s8815_s16 = sphi %s9254_s16, %s12764_s16   ;;  %s8811_s15 = sphi %s9252_s15, %s12763_s15   ;;  %s8807_s30 = sphi %s9250_s30, %s12762_s30   ;;  %s8803_s29 = sphi %s9248_s29, %s12761_s29  }
  0x18   : > { %12374 = sst [smem:[#allocation25_spill]] %s8819_s17  ;;  %p6066_p0 = scmp.ge.s32.totalorder %s8831_s20, 1 }
  0x19   : > { %p9292_p1 = scmp.eq.s32.totalorder %s12260_s21, 0  ;;  %p379_p2 = scmp.lt.s32.totalorder %s8831_s20, 5 }
  0x1a   : > { %s9157_s24 = smov [#allocation9]   ;;  %s9158_s27 = smov [#allocation12]  }
  0x1b   : > { %s12375_s22 = scalar_select %p9292_p1, 1, 0 }
  0x1c   : > { %p9297_p3 = pnand %p6066_p0, %p379_p2  ;;  %s397_s25 = sshll.u32 %s9157_s24, 4  ;;  %s9301_s25 = int_to_ptr.vmem [resolvable:$true] %s397_s25 }
  0x1d   : > { %s423_s28 = sshll.u32 %s9158_s27, 4  ;;  %s9159_s21 = smov [#allocation15]   ;;  %s9311_s28 = int_to_ptr.vmem [resolvable:$true] %s423_s28 }
  0x1e   : > { %s12376_s23 = scalar_select %p9297_p3, 1, 0 }
  0x1f   : > { %p6759_p4 = pneg %p9297_p3  ;;  %s9313_s14 = sshll.u32 %s9159_s21, 4  ;;  %s459_s14 = int_to_ptr.vmem [resolvable:$true] %s9313_s14 }
  0x20   : > { %s12378_s3 = sld [smem:[#allocation123_spill]] }
  0x21   : > { %p9307_p5 = pnand %p6759_p4, %p9292_p1 }
  0x23   : > { %p9323_p7 = pneg %p9307_p5 }
  0x26   : > { %s8199_s24 = scalar_lea.hbm %s12378_s3, 4096 }
  0x27   : > { %p8200_p6 = scmp.ne.s32.totalorder %s12378_s3, %s8199_s24  ;;  %p8206_p10 = scmp.lt.u32.totalorder %s8199_s24, %s12378_s3 }
  0x29   : > { %p8202_p8 = pnand %p9323_p7, %p8200_p6 }
  0x2b   : > { %p8203_p9 = pneg %p8202_p8 }
  0x2d   : > { %p8208_p11 = pnand %p8206_p10, %p8203_p9 }
  0x2f   : > { %8211 = shalt.err (!%p8208_p11)
}
  0x30   : > { %s8212_s9 = scalar_lea.vmem %s9301_s25, 4096  ;;  %p8220_p2 = scmp.lt.s32.totalorder %s9301_s25, %s9301_s25 }
  0x31   : > { %p8213_p12 = scmp.ne.s32.totalorder %s9301_s25, %s8212_s9  ;;  %p8221_p4 = scmp.lt.s32.totalorder %s8212_s9, %s8212_s9 }
  0x33   : > { %p8215_p13 = pnand %p8213_p12, %p9323_p7  ;;  %p8222_p6 = por %p8221_p4, %p8220_p2 }
  0x35   : > { %p8216_p0 = pneg %p8215_p13 }
  0x37   : > { %p8223_p8 = pnand %p8222_p6, %p8216_p0 }
  0x39   : > { %8226 = shalt.err (!%p8223_p8)
}
  0x3a   : > { %s12268_s11 = smov 128   ;;  %s12270_s13 = smov 8  }
  0x3b   : > { %6762 = dma.hbm_to_vmem [thread:$0]  (!%p9307_p5), %s12378_s3, 4096, %s9301_s25, [#allocation10], %s12268_s11, %s12268_s11, %s12270_s13  }
  0x3c   : > { %s12380_s5 = sld [smem:[#allocation125_spill]] }
  0x42   : > { %s8227_s9 = scalar_lea.hbm %s12380_s5, 4096 }
  0x43   : > { %p8228_p9 = scmp.ne.s32.totalorder %s12380_s5, %s8227_s9  ;;  %p8234_p12 = scmp.lt.u32.totalorder %s8227_s9, %s12380_s5 }
  0x45   : > { %p8230_p10 = pnand %p8228_p9, %p9323_p7 }
  0x47   : > { %p8231_p11 = pneg %p8230_p10 }
  0x49   : > { %p8236_p13 = pnand %p8234_p12, %p8231_p11 }
  0x4b   : > { %8239 = shalt.err (!%p8236_p13)
}
  0x4c   : > { %s8240_s25 = scalar_lea.vmem %s9311_s28, 4096  ;;  %p8248_p6 = scmp.lt.s32.totalorder %s9311_s28, %s9311_s28 }
  0x4d   : > { %p8241_p0 = scmp.ne.s32.totalorder %s9311_s28, %s8240_s25  ;;  %p8249_p8 = scmp.lt.s32.totalorder %s8240_s25, %s8240_s25 }
  0x4f   : > { %p8243_p2 = pnand %p8241_p0, %p9323_p7  ;;  %p8250_p9 = por %p8249_p8, %p8248_p6 }
  0x51   : > { %p8244_p4 = pneg %p8243_p2 }
  0x53   : > { %p8251_p10 = pnand %p8250_p9, %p8244_p4 }
  0x55   : > { %8254 = shalt.err (!%p8251_p10)
}
  0x56   : > { %6768 = dma.hbm_to_vmem [thread:$0]  (!%p9307_p5), %s12380_s5, 4096, %s9311_s28, [#allocation13], %s12268_s11, %s12268_s11, %s12270_s13  }
  0x57   : > { %s8255_s17 = scalar_lea.hbm %s12255_s10, 16384 }
  0x58   : > { %p8256_p11 = scmp.ne.s32.totalorder %s12255_s10, %s8255_s17  ;;  %p8262_p0 = scmp.lt.u32.totalorder %s8255_s17, %s12255_s10 }
  0x5a   : > { %p8258_p12 = pnand %p8256_p11, %p9323_p7 }
  0x5c   : > { %p8259_p13 = pneg %p8258_p12 }
  0x5e   : > { %p8264_p2 = pnand %p8262_p0, %p8259_p13 }
  0x60   : > { %8267 = shalt.err (!%p8264_p2)
}
  0x61   : > { %s8268_s25 = scalar_lea.vmem %s459_s14, 16384  ;;  %p8276_p9 = scmp.lt.s32.totalorder %s459_s14, %s459_s14 }
  0x62   : > { %p8269_p4 = scmp.ne.s32.totalorder %s459_s14, %s8268_s25  ;;  %p8277_p10 = scmp.lt.s32.totalorder %s8268_s25, %s8268_s25 }
  0x64   : > { %p8271_p6 = pnand %p8269_p4, %p9323_p7  ;;  %p8278_p3 = por %p8277_p10, %p8276_p9 }
  0x66   : > { %p8272_p8 = pneg %p8271_p6 }
  0x68   : > { %p8279_p1 = pnand %p8278_p3, %p8272_p8 }
  0x6a   : > { %8282 = shalt.err (!%p8279_p1)
}
  0x6b   : > { %s9162_s28 = smov 512   ;;  %s9163_s1 = smov 32  }
  0x6c   : > { %6774 = dma.hbm_to_vmem [thread:$0]  (!%p9307_p5), %s12255_s10, 16384, %s459_s14, [#allocation16], %s9162_s28, %s9162_s28, %s9163_s1  }
  0x6d   : > { %s9164_s16 = smov [#allocation11]   ;;  %s9165_s24 = smov [#allocation14]  }
  0x6e   : > { %s410_s17 = sshll.u32 %s9164_s16, 4  ;;  %s436_s27 = sshll.u32 %s9165_s24, 4  ;;  %s411_s17 = int_to_ptr.vmem [resolvable:$true] %s410_s17  ;;  %s437_s27 = int_to_ptr.vmem [resolvable:$true] %s436_s27 }
  0x6f   : > { %s12381_s4 = sld [smem:[#allocation124_spill]] }
  0x75   : > { %s8283_s25 = scalar_lea.hbm %s12381_s4, 4096 }
  0x76   : > { %p8284_p1 = scmp.ne.s32.totalorder %s12381_s4, %s8283_s25  ;;  %p8290_p12 = scmp.lt.u32.totalorder %s8283_s25, %s12381_s4 }
  0x78   : > { %p8286_p3 = pnand %p8284_p1, %p9323_p7 }
  0x7a   : > { %p8287_p11 = pneg %p8286_p3 }
  0x7c   : > { %p8292_p13 = pnand %p8290_p12, %p8287_p11 }
  0x7e   : > { %8295 = shalt.err (!%p8292_p13)
}
  0x7f   : > { %s8296_s14 = scalar_lea.vmem %s411_s17, 4096  ;;  %p8304_p6 = scmp.lt.s32.totalorder %s411_s17, %s411_s17 }
  0x80   : > { %p8297_p0 = scmp.ne.s32.totalorder %s411_s17, %s8296_s14  ;;  %p8305_p8 = scmp.lt.s32.totalorder %s8296_s14, %s8296_s14 }
  0x82   : > { %p8299_p2 = pnand %p8297_p0, %p9323_p7  ;;  %p8306_p9 = por %p8305_p8, %p8304_p6 }
  0x84   : > { %p8300_p4 = pneg %p8299_p2 }
  0x86   : > { %p8307_p10 = pnand %p8306_p9, %p8300_p4 }
  0x88   : > { %8310 = shalt.err (!%p8307_p10)
}
  0x89   : > { %s12382_s11 = smov 8   ;;  %s12383_s13 = smov 128  }
  0x8a   : > { %6765 = dma.hbm_to_vmem [thread:$0]  (!%p9307_p5), %s12381_s4, 4096, %s411_s17, [#allocation10], %s12383_s13, %s12383_s13, %s12382_s11  }
  0x8b   : > { %s12384_s6 = sld [smem:[#allocation126_spill]] }
  0x91   : > { %s8311_s2 = scalar_lea.hbm %s12384_s6, 4096 }
  0x92   : > { %p8312_p1 = scmp.ne.s32.totalorder %s12384_s6, %s8311_s2  ;;  %p8318_p12 = scmp.lt.u32.totalorder %s8311_s2, %s12384_s6 }
  0x94   : > { %p8314_p3 = pnand %p8312_p1, %p9323_p7 }
  0x96   : > { %p8315_p11 = pneg %p8314_p3 }
  0x98   : > { %p8320_p13 = pnand %p8318_p12, %p8315_p11 }
  0x9a   : > { %8323 = shalt.err (!%p8320_p13)
}
  0x9b   : > { %s8324_s9 = scalar_lea.vmem %s437_s27, 4096  ;;  %p8332_p6 = scmp.lt.s32.totalorder %s437_s27, %s437_s27 }
  0x9c   : > { %p8325_p0 = scmp.ne.s32.totalorder %s437_s27, %s8324_s9  ;;  %p8333_p8 = scmp.lt.s32.totalorder %s8324_s9, %s8324_s9 }
  0x9e   : > { %p8327_p2 = pnand %p8325_p0, %p9323_p7  ;;  %p8334_p9 = por %p8333_p8, %p8332_p6 }
  0xa0   : > { %p8328_p4 = pneg %p8327_p2 }
  0xa2   : > { %p8335_p10 = pnand %p8334_p9, %p8328_p4 }
  0xa4   : > { %8338 = shalt.err (!%p8335_p10)
}
  0xa5   : > { %6771 = dma.hbm_to_vmem [thread:$0]  (!%p9307_p5), %s12384_s6, 4096, %s437_s27, [#allocation13], %s12383_s13, %s12383_s13, %s12382_s11  }
  0xa6   : > { %s9166_s14 = smov [#allocation17]   ;;  %s8339_s1 = scalar_lea.hbm %s12257_s12, 16384 }
  0xa7   : > { %s474_s3 = sshll.u32 %s9166_s14, 4  ;;  %p8340_p1 = scmp.ne.s32.totalorder %s12257_s12, %s8339_s1  ;;  %s475_s3 = int_to_ptr.vmem [resolvable:$true] %s474_s3 }
  0xa8   : > { %p8346_p12 = scmp.lt.u32.totalorder %s8339_s1, %s12257_s12 }
  0xa9   : > { %p8342_p3 = pnand %p8340_p1, %p9323_p7 }
  0xab   : > { %p8343_p11 = pneg %p8342_p3 }
  0xad   : > { %p8348_p13 = pnand %p8346_p12, %p8343_p11 }
  0xaf   : > { %8351 = shalt.err (!%p8348_p13)
}
  0xb0   : > { %s8352_s27 = scalar_lea.vmem %s475_s3, 16384  ;;  %p8360_p6 = scmp.lt.s32.totalorder %s475_s3, %s475_s3 }
  0xb1   : > { %p8353_p0 = scmp.ne.s32.totalorder %s475_s3, %s8352_s27  ;;  %p8361_p8 = scmp.lt.s32.totalorder %s8352_s27, %s8352_s27 }
  0xb3   : > { %p8355_p2 = pnand %p8353_p0, %p9323_p7  ;;  %p8362_p9 = por %p8361_p8, %p8360_p6 }
  0xb5   : > { %p8356_p4 = pneg %p8355_p2 }
  0xb7   : > { %p8363_p10 = pnand %p8362_p9, %p8356_p4 }
  0xb9   : > { %8366 = shalt.err (!%p8363_p10)
}
  0xba   : > { %6777 = dma.hbm_to_vmem [thread:$0]  (!%p9307_p5), %s12257_s12, 16384, %s475_s3, [#allocation16], %s12383_s13, %s12383_s13, %s12382_s11  }
  0xbb   : > { %s6065_s8 = sadd.s32 4294967294, %s8831_s20   ;;  %s42_s26 = sadd.s32 1, %s8823_s18 }
  0xbc   : > { %p43_p7 = scmp.ge.s32.totalorder %s42_s26, 2  ;;  %s45_s17 = sadd.s32 1, %s8827_s19 }
  0xbd   : > { %s54_s25 = sadd.s32 1, %s8811_s15  ;;  %p61_p1 = scmp.ne.s32.totalorder %s8811_s15, %s8807_s30 }
  0xbe   : > { %s12769_s26 = smov (%p43_p7, %s42_s26), 0  ;;  %s12771_s17 = smov (!%p43_p7, %s45_s17), %s8827_s19 }
  0xbf   : > { %s50_s14 = ssub.s32 %s8823_s18, %s12769_s26  ;;  %p62_p3 = scmp.eq.s32.totalorder %s8831_s20, 0 }
  0xc0   : > { %p47_p11 = scmp.ge.s32.totalorder %s12771_s17, 2  ;;  %p67_p5 = scmp.ne.s32.totalorder %s8807_s30, %s8803_s29 }
  0xc1   : > { %p9469_p12 = por %p62_p3, %p61_p1  ;;  %s12386_s13 = sadd.s32 4294967295, %s8831_s20  }
  0xc2   : > { %p366_p13 = scmp.eq.s32.totalorder %s12386_s13, 3  ;;  %s12773_s17 = smov (%p47_p11, %s12771_s17), 0 }
  0xc3   : > { %p12387_p0 = scmp.ne.s32.totalorder %s12375_s22, 0  ;;  %s49_s28 = ssub.s32 %s8827_s19, %s12773_s17 }
  0xc4   : > { %p9483_p4 = por %p366_p13, %p61_p1  ;;  %p372_p6 = scmp.eq.s32.totalorder %s6065_s8, 3 }
  0xc5   : > { %p9479_p2 = por %p12387_p0, %p67_p5  ;;  %s51_s1 = sor.u32 %s50_s14, %s49_s28 }
  0xc6   : > { %s12389_s5 = scalar_select %p9483_p4, 1, 0 }
  0xc7   : > { %p6792_p8 = scmp.lt.s32.totalorder %s8831_s20, 4  ;;  %p52_p9 = scmp.eq.s32.totalorder %s51_s1, 0 }
  0xc8   : > { %p9490_p10 = por %p372_p6, %p67_p5  ;;  %s491_s7 = sand.u32 1, %s8811_s15  }
  0xc9   : > { %s6505_s16 = sshll.u32 %s8823_s18, 4  ;;  %s6074_s27 = sshll.u32 %s491_s7, 7 }
  0xca   : > { %s12390_s2 = scalar_select %p9490_p10, 1, 0 }
  0xcb   : > { %s9497_s24 = scalar_select %p52_p9, %s8811_s15, %s54_s25  }
  0xcc   : > { %s6077_s21 = sshll.u32 %s8827_s19, 5  ;;  %s495_s13 = scalar_lea.vmem [#allocation6], %s6074_s27 }
  0xcd   : > { %s502_s9 = sadd.s32 %s6505_s16, %s6077_s21  ;;  %s505_s4 = sshll.u32 %s495_s13, 4  ;;  %s9500_s4 = int_to_ptr.vmem [resolvable:$true] %s505_s4 }
  0xce   : > { %s6078_s6 = sshll.u32 %s502_s9, 7  ;;  %p9511_p7 = pnand %p6792_p8, %p9469_p12 }
  0xcf   : > { %s9505_s28 = scalar_lea.hbm %s12245_s0, %s6078_s6  ;;  %s9515_s1 = scalar_lea.sflag [#allocation7], %s491_s7 }
  0xd0   : > { %s8367_s16 = scalar_lea.hbm %s9505_s28, 2048  ;;  %p8369_p3 = pneg %p9511_p7 }
  0xd1   : > { %p8368_p1 = scmp.ne.s32.totalorder %s9505_s28, %s8367_s16  ;;  %s8372_s27 = scalar_lea.hbm %s12245_s0, 8192 }
  0xd2   : > { %p8373_p12 = scmp.lt.u32.totalorder %s9505_s28, %s12245_s0  ;;  %p8374_p13 = scmp.lt.u32.totalorder %s8372_s27, %s8367_s16 }
  0xd3   : > { %p8370_p11 = pnand %p8369_p3, %p8368_p1  ;;  %p8376_p6 = scmp.lt.u32.totalorder %s8367_s16, %s9505_s28 }
  0xd4   : > { %p8375_p0 = por %p8374_p13, %p8373_p12 }
  0xd5   : > { %p8371_p5 = pneg %p8370_p11 }
  0xd6   : > { %p8377_p8 = por %p8376_p6, %p8375_p0 }
  0xd8   : > { %p8378_p9 = pnand %p8377_p8, %p8371_p5 }
  0xda   : > { %8381 = shalt.err (!%p8378_p9)
}
  0xdb   : > { %s8382_s7 = scalar_lea.vmem %s9500_s4, 2048  ;;  %s9167_s13 = smov [#allocation6]  }
  0xdc   : > { %p8383_p1 = scmp.ne.s32.totalorder %s9500_s4, %s8382_s7  ;;  %s8387_s8 = sshll.u32 %s9167_s13, 4  ;;  %s8388_s8 = int_to_ptr.vmem [resolvable:$false] %s8387_s8 }
  0xdd   : > { %s8389_s14 = scalar_lea.vmem %s8388_s8, 4096  ;;  %p8390_p4 = scmp.lt.s32.totalorder %s9500_s4, %s8388_s8 }
  0xde   : > { %p8385_p11 = pnand %p8383_p1, %p8369_p3  ;;  %p8391_p12 = scmp.lt.s32.totalorder %s8389_s14, %s8382_s7 }
  0xe0   : > { %p8386_p10 = pneg %p8385_p11  ;;  %p8392_p13 = por %p8391_p12, %p8390_p4 }
  0xe2   : > { %p8393_p0 = pnand %p8392_p13, %p8386_p10 }
  0xe4   : > { %8396 = shalt.err (!%p8393_p0)
}
  0xe5   : > { %s9168_s16 = smov 256   ;;  %s9169_s6 = smov 16  }
  0xe6   : > { %6781 = dma.hbm_to_vmem [thread:$0]  (!%p9511_p7), %s9505_s28, 2048, %s9500_s4, %s9515_s1, %s9168_s16, %s9168_s16, %s9169_s6  }
  0xe7   : > { %p12392_p3 = scmp.ne.s32.totalorder %s12376_s23, 0 }
  0xe9   : > { %517 = sbr.rel (%p12392_p3) target bundleno = 2859 (0xb2b), region = 76 }
  0xf0   : > { %s9546_s11 = sand.u32 1, %s8807_s30  }
  0xf1   : > { %s6080_s27 = sshll.u32 %s9546_s11, 7  ;;  %s520_s21 = scalar_lea.sflag [#allocation7], %s9546_s11 }
  0xf2   : > { %s9552_s9 = scalar_lea.vmem [#allocation6], %s6080_s27 }
  0xf3   : > { %8782 = dma.done.wait (%p9479_p2), %s520_s21, 2048  }
  0xf4   : > { %8784 = vsyncadd (%p9479_p2), %s520_s21, 4294965248  ;;  %p12393_p4 = scmp.ne.s32.totalorder %s12375_s22, 0 }
  0xf6   : > { %8786 = dma.done.wait (%p12393_p4), [#allocation10], 8192  }
  0xf7   : > { %8788 = vsyncadd (%p12393_p4), [#allocation10], 4294959104 }
  0xf8   : > { %8790 = dma.done.wait (%p12393_p4), [#allocation13], 8192  }
  0xf9   : > { %8792 = vsyncadd (%p12393_p4), [#allocation13], 4294959104 }
  0xfa   : > { %8794 = dma.done.wait (%p12393_p4), [#allocation16], 32768  }
  0xfb   : > { %8796 = vsyncadd (%p12393_p4), [#allocation16], 4294934528  ;;  %v9571_v0 = vld [vmem:[%s9552_s9] sm:$0xff]  ;;  %v9574_v1 = vld [vmem:[%s9552_s9 + $0x8] sm:$0xff]  ;;  %s12421_s23 = sld [smem:[#allocation121_spill]]  ;;  %s12422_s25 = sld [smem:[#allocation122_spill]] }
  0xfc   : > { %12394 = vst [vmem:[#allocation26_spill] sm:$0xff] %v9571_v0  ;;  %12395 = vst [vmem:[#allocation27_spill] sm:$0xff] %v9574_v1  ;;  %v9577_v2 = vld [vmem:[%s9552_s9 + $0x20] sm:$0xff]  ;;  %v613_v3 = vadd.f32 %v9574_v1, %v9571_v0  ;;  %v9582_v4 = vld [vmem:[%s9552_s9 + $0x28] sm:$0xff]  ;;  %s12423_s1 = sld [smem:[#allocation24_spill]]  ;;  %s9915_s21 = scalar_lea.vmem [#allocation18], %s6080_s27 }
  0xfd   : > { %12396 = vst [vmem:[#allocation28_spill] sm:$0xff] %v9577_v2  ;;  %12397 = vst [vmem:[#allocation29_spill] sm:$0xff] %v9582_v4  ;;  %v9585_v5 = vld [vmem:[%s9552_s9 + $0x10] sm:$0xff]  ;;  %v9588_v6 = vld [vmem:[%s9552_s9 + $0x18] sm:$0xff]  ;;  %v619_v7 = vadd.f32 %v9582_v4, %v9577_v2 }
  0xfe   : > { %12398 = vst [vmem:[#allocation30_spill] sm:$0xff] %v9585_v5  ;;  %12399 = vst [vmem:[#allocation31_spill] sm:$0xff] %v9588_v6  ;;  %v9593_v8 = vld [vmem:[%s9552_s9 + $0x30] sm:$0xff]  ;;  %v9596_v9 = vld [vmem:[%s9552_s9 + $0x38] sm:$0xff]  ;;  %614 = vadd.xlane.f32.xlu0 %v613_v3  ;;  %v616_v10 = vadd.f32 %v9588_v6, %v9585_v5 }
  0xff   : > { %12400 = vst [vmem:[#allocation32_spill] sm:$0xff] %v9593_v8  ;;  %12401 = vst [vmem:[#allocation33_spill] sm:$0xff] %v9596_v9  ;;  %620 = vadd.xlane.f32.xlu1 %v619_v7  ;;  %v622_v11 = vadd.f32 %v9596_v9, %v9593_v8  ;;  %v9603_v12 = vld [vmem:[%s9552_s9 + $0x40] sm:$0xff]  ;;  %v9606_v13 = vld [vmem:[%s9552_s9 + $0x48] sm:$0xff] }
 0x100   : > { %12402 = vst [vmem:[#allocation34_spill] sm:$0xff] %v9603_v12  ;;  %12403 = vst [vmem:[#allocation35_spill] sm:$0xff] %v9606_v13  ;;  %v9609_v14 = vld [vmem:[%s9552_s9 + $0x50] sm:$0xff]  ;;  %v9612_v15 = vld [vmem:[%s9552_s9 + $0x58] sm:$0xff]  ;;  %v625_v18 = vadd.f32 %v9606_v13, %v9603_v12 }
 0x101   : > { %12404 = vst [vmem:[#allocation36_spill] sm:$0xff] %v9609_v14  ;;  %12405 = vst [vmem:[#allocation37_spill] sm:$0xff] %v9612_v15  ;;  %v9615_v16 = vld [vmem:[%s9552_s9 + $0x60] sm:$0xff]  ;;  %v9618_v17 = vld [vmem:[%s9552_s9 + $0x68] sm:$0xff]  ;;  %v628_v21 = vadd.f32 %v9612_v15, %v9609_v14 }
 0x102   : > { %12406 = vst [vmem:[#allocation38_spill] sm:$0xff] %v9615_v16  ;;  %12407 = vst [vmem:[#allocation39_spill] sm:$0xff] %v9618_v17  ;;  %617 = vadd.xlane.f32.xlu0 %v616_v10  ;;  %v9623_v19 = vld [vmem:[%s9552_s9 + $0x70] sm:$0xff]  ;;  %v9626_v20 = vld [vmem:[%s9552_s9 + $0x78] sm:$0xff]  ;;  %v631_v22 = vadd.f32 %v9618_v17, %v9615_v16  ;;  %s1695_s7 = sadd.s32 1, %s12423_s1  ;;  %s6184_s13 = sshll.u32 %s12423_s1, 6 }
 0x103   : > { %12408 = vst [vmem:[#allocation40_spill] sm:$0xff] %v9623_v19  ;;  %12409 = vst [vmem:[#allocation41_spill] sm:$0xff] %v9626_v20  ;;  %623 = vadd.xlane.f32.xlu1 %v622_v11  ;;  %v634_v23 = vadd.f32 %v9626_v20, %v9623_v19  ;;  %v7526_v24 = vld [vmem:[#allocation9 + $0x4] ss:$8 sps:$4 sm:$0xff]   ;;  %v7530_v26 = vld [vmem:[#allocation9] ss:$8 sps:$4 sm:$0xff]  }
 0x104   : > { %v7528_v25 = vld [vmem:[#allocation11 + $0x4] ss:$8 sps:$4 sm:$0xff]   ;;  %v7531_v27 = vld [vmem:[#allocation11] ss:$8 sps:$4 sm:$0xff]   ;;  %v7532_v28 = vld [vmem:[#allocation9 + $0x14] ss:$8 sps:$4 sm:$0xff]   ;;  %996 = vmatprep.subr.bf16.mxu0 %v7526_v24 }
 0x105   : > { %1277 = vmatprep.subr.bf16.mxu1 %v7528_v25  ;;  %v7534_v29 = vld [vmem:[#allocation11 + $0x14] ss:$8 sps:$4 sm:$0xff]   ;;  %997 = vmatpush1.bf16.msra.mxu0 %v7530_v26  ;;  %v7536_v30 = vld [vmem:[#allocation9 + $0x10] ss:$8 sps:$4 sm:$0xff]   ;;  %v7538_v32 = vld [vmem:[#allocation9 + $0x24] ss:$8 sps:$4 sm:$0xff]  }
 0x106   : > { %626 = vadd.xlane.f32.xlu0 %v625_v18  ;;  %1278 = vmatpush1.bf16.msra.mxu1 %v7531_v27  ;;  %v7537_v31 = vld [vmem:[#allocation11 + $0x10] ss:$8 sps:$4 sm:$0xff]   ;;  %v7540_v33 = vld [vmem:[#allocation11 + $0x24] ss:$8 sps:$4 sm:$0xff]   ;;  %v7542_v34 = vld [vmem:[#allocation9 + $0x20] ss:$8 sps:$4 sm:$0xff]  }
 0x107   : > { %629 = vadd.xlane.f32.xlu1 %v628_v21  ;;  %998 = vmatprep.subr.bf16.mxu0 %v7532_v28  ;;  %v7543_v35 = vld [vmem:[#allocation11 + $0x20] ss:$8 sps:$4 sm:$0xff]   ;;  %v7544_v36 = vld [vmem:[#allocation9 + $0x34] ss:$8 sps:$4 sm:$0xff]   ;;  %v7548_v38 = vld [vmem:[#allocation9 + $0x30] ss:$8 sps:$4 sm:$0xff]  }
 0x108   : > { %1279 = vmatprep.subr.bf16.mxu1 %v7534_v29  ;;  %v7546_v37 = vld [vmem:[#allocation11 + $0x34] ss:$8 sps:$4 sm:$0xff]   ;;  %v7549_v39 = vld [vmem:[#allocation11 + $0x30] ss:$8 sps:$4 sm:$0xff]   ;;  %v7550_v40 = vld [vmem:[#allocation9 + $0x44] ss:$8 sps:$4 sm:$0xff]  }
 0x109   : > { %999 = vmatpush1.bf16.msra.mxu0 %v7536_v30  ;;  %v7552_v41 = vld [vmem:[#allocation11 + $0x44] ss:$8 sps:$4 sm:$0xff]   ;;  %v7554_v42 = vld [vmem:[#allocation9 + $0x40] ss:$8 sps:$4 sm:$0xff]   ;;  %v7556_v44 = vld [vmem:[#allocation9 + $0x54] ss:$8 sps:$4 sm:$0xff]  }
 0x10a   : > { %632 = vadd.xlane.f32.xlu0 %v631_v22  ;;  %1280 = vmatpush1.bf16.msra.mxu1 %v7537_v31  ;;  %v7555_v43 = vld [vmem:[#allocation11 + $0x40] ss:$8 sps:$4 sm:$0xff]   ;;  %v7558_v45 = vld [vmem:[#allocation11 + $0x54] ss:$8 sps:$4 sm:$0xff]   ;;  %v7560_v46 = vld [vmem:[#allocation9 + $0x50] ss:$8 sps:$4 sm:$0xff]  }
 0x10b   : > { %635 = vadd.xlane.f32.xlu1 %v634_v23  ;;  %1000 = vmatprep.subr.bf16.mxu0 %v7538_v32  ;;  %v7561_v47 = vld [vmem:[#allocation11 + $0x50] ss:$8 sps:$4 sm:$0xff]   ;;  %v7562_v48 = vld [vmem:[#allocation9 + $0x64] ss:$8 sps:$4 sm:$0xff]   ;;  %v7566_v50 = vld [vmem:[#allocation9 + $0x60] ss:$8 sps:$4 sm:$0xff]  }
 0x10c   : > { %1281 = vmatprep.subr.bf16.mxu1 %v7540_v33  ;;  %v7564_v49 = vld [vmem:[#allocation11 + $0x64] ss:$8 sps:$4 sm:$0xff]   ;;  %v7567_v51 = vld [vmem:[#allocation11 + $0x60] ss:$8 sps:$4 sm:$0xff]   ;;  %v7568_v52 = vld [vmem:[#allocation9 + $0x74] ss:$8 sps:$4 sm:$0xff]  }
 0x10d   : > { %1001 = vmatpush1.bf16.msra.mxu0 %v7542_v34  ;;  %v7570_v53 = vld [vmem:[#allocation11 + $0x74] ss:$8 sps:$4 sm:$0xff]   ;;  %v7572_v54 = vld [vmem:[#allocation9 + $0x70] ss:$8 sps:$4 sm:$0xff]   ;;  %v7574_v56 = vld [vmem:[#allocation9 + $0x84] ss:$8 sps:$4 sm:$0xff]  }
 0x10e   : > { %1282 = vmatpush1.bf16.msra.mxu1 %v7543_v35  ;;  %1002 = vmatprep.subr.bf16.mxu0 %v7544_v36  ;;  %v7573_v55 = vld [vmem:[#allocation11 + $0x70] ss:$8 sps:$4 sm:$0xff]   ;;  %v7576_v57 = vld [vmem:[#allocation11 + $0x84] ss:$8 sps:$4 sm:$0xff]   ;;  %v7578_v58 = vld [vmem:[#allocation9 + $0x80] ss:$8 sps:$4 sm:$0xff]  }
 0x10f   : > { %1283 = vmatprep.subr.bf16.mxu1 %v7546_v37  ;;  %v7579_v59 = vld [vmem:[#allocation11 + $0x80] ss:$8 sps:$4 sm:$0xff]   ;;  %v7580_v60 = vld [vmem:[#allocation9 + $0x94] ss:$8 sps:$4 sm:$0xff]   ;;  %s9848_s8 = sshra.s32 %s6184_s13, 4  ;;  %p9919_p2 = scmp.le.s32.totalorder %s1695_s7, 0 }
 0x110   : > { %v7582_v61 = vld [vmem:[#allocation11 + $0x94] ss:$8 sps:$4 sm:$0xff]   ;;  %s6185_s14 = sshll.u32 %s9848_s8, 3 }
 0x111   : > { %1003 = vmatpush1.bf16.msra.mxu0 %v7548_v38  ;;  %s9863_s16 = scalar_lea.vmem [#allocation2], %s6185_s14  ;;  %s1641_s6 = scalar_lea.vmem [#allocation3], %s6185_s14 }
 0x112   : > { %1284 = vmatpush1.bf16.msra.mxu1 %v7549_v39  ;;  %1004 = vmatprep.subr.bf16.mxu0 %v7550_v40 }
 0x113   : > { %1285 = vmatprep.subr.bf16.mxu1 %v7552_v41 }
 0x115   : > { %1005 = vmatpush1.bf16.msra.mxu0 %v7554_v42 }
 0x116   : > { %1286 = vmatpush1.bf16.msra.mxu1 %v7555_v43  ;;  %1006 = vmatprep.subr.bf16.mxu0 %v7556_v44 }
 0x117   : > { %1287 = vmatprep.subr.bf16.mxu1 %v7558_v45 }
 0x119   : > { %1007 = vmatpush1.bf16.msra.mxu0 %v7560_v46 }
 0x11a   : > { %1288 = vmatpush1.bf16.msra.mxu1 %v7561_v47  ;;  %1008 = vmatprep.subr.bf16.mxu0 %v7562_v48 }
 0x11b   : > { %1289 = vmatprep.subr.bf16.mxu1 %v7564_v49 }
 0x11d   : > { %1009 = vmatpush1.bf16.msra.mxu0 %v7566_v50 }
 0x11e   : > { %1290 = vmatpush1.bf16.msra.mxu1 %v7567_v51  ;;  %1010 = vmatprep.subr.bf16.mxu0 %v7568_v52 }
 0x11f   : > { %1291 = vmatprep.subr.bf16.mxu1 %v7570_v53 }
 0x121   : > { %1011 = vmatpush1.bf16.msra.mxu0 %v7572_v54 }
 0x122   : > { %1292 = vmatpush1.bf16.msra.mxu1 %v7573_v55  ;;  %1012 = vmatprep.subr.bf16.mxu0 %v7574_v56 }
 0x123   : > { %1293 = vmatprep.subr.bf16.mxu1 %v7576_v57 }
 0x125   : > { %1013 = vmatpush1.bf16.msra.mxu0 %v7578_v58 }
 0x126   : > { %1294 = vmatpush1.bf16.msra.mxu1 %v7579_v59  ;;  %1014 = vmatprep.subr.bf16.mxu0 %v7580_v60 }
 0x127   : > { %1295 = vmatprep.subr.bf16.mxu1 %v7582_v61 }
 0x18b   : > { %v615_v62 = vpop.xlane.xlu0 %614 }
 0x18c   : > { %v638_v63 = vmul.f32 0.00390625, %v615_v62  ;;  %v621_v3 = vpop.xlane.xlu1 %620 }
 0x18d   : > { %v640_v7 = vmul.f32 0.00390625, %v621_v3 }
 0x18e   : > { %v9635_v10 = vsub.f32 %v9571_v0, %v638_v63  ;;  %v9638_v11 = vsub.f32 %v9574_v1, %v638_v63 }
 0x18f   : > { %v9641_v18 = vsub.f32 %v9577_v2, %v640_v7  ;;  %v9644_v21 = vsub.f32 %v9582_v4, %v640_v7  ;;  %v618_v22 = vpop.xlane.xlu0 %617  ;;  %v9985_v4 = vmov 0.0  }
 0x190   : > { %v639_v23 = vmul.f32 0.00390625, %v618_v22  ;;  %v624_v24 = vpop.xlane.xlu1 %623  ;;  %v662_v25 = vmul.f32 %v9635_v10, %v9635_v10  ;;  %v663_v26 = vmul.f32 %v9638_v11, %v9638_v11 }
 0x191   : > { %v641_v27 = vmul.f32 0.00390625, %v624_v24  ;;  %v666_v28 = vmul.f32 %v9641_v18, %v9641_v18  ;;  %v667_v29 = vmul.f32 %v9644_v21, %v9644_v21 }
 0x192   : > { %v9655_v30 = vsub.f32 %v9585_v5, %v639_v23  ;;  %v9658_v31 = vsub.f32 %v9588_v6, %v639_v23  ;;  %v678_v32 = vadd.f32 %v663_v26, %v662_v25  ;;  %v7584_v26 = vld [vmem:[#allocation9 + $0x90] ss:$8 sps:$4 sm:$0xff]  }
 0x193   : > { %v9661_v33 = vsub.f32 %v9593_v8, %v641_v27  ;;  %v9664_v34 = vsub.f32 %v9596_v9, %v641_v27  ;;  %v627_v35 = vpop.xlane.xlu0 %626  ;;  %v684_v38 = vadd.f32 %v667_v29, %v666_v28  ;;  %v7585_v27 = vld [vmem:[#allocation11 + $0x90] ss:$8 sps:$4 sm:$0xff]   ;;  %1015 = vmatpush1.bf16.msra.mxu0 %v7584_v26  ;;  %v7586_v28 = vld [vmem:[#allocation9 + $0xa4] ss:$8 sps:$4 sm:$0xff]   ;;  %v9981_v9 = vmov 0.0  }
 0x194   : > { %v642_v36 = vmul.f32 0.00390625, %v627_v35  ;;  %679 = vadd.xlane.f32.xlu0 %v678_v32  ;;  %v630_v37 = vpop.xlane.xlu1 %629  ;;  %v664_v39 = vmul.f32 %v9655_v30, %v9655_v30  ;;  %v665_v40 = vmul.f32 %v9658_v31, %v9658_v31  ;;  %1296 = vmatpush1.bf16.msra.mxu1 %v7585_v27  ;;  %v7588_v29 = vld [vmem:[#allocation11 + $0xa4] ss:$8 sps:$4 sm:$0xff]   ;;  %v7590_v32 = vld [vmem:[#allocation9 + $0xa0] ss:$8 sps:$4 sm:$0xff]   ;;  %v9983_v8 = vmov 0.0  }
 0x195   : > { %v643_v41 = vmul.f32 0.00390625, %v630_v37  ;;  %v668_v42 = vmul.f32 %v9661_v33, %v9661_v33  ;;  %v669_v43 = vmul.f32 %v9664_v34, %v9664_v34  ;;  %1016 = vmatprep.subr.bf16.mxu0 %v7586_v28  ;;  %1297 = vmatprep.subr.bf16.mxu1 %v7588_v29  ;;  %v7591_v35 = vld [vmem:[#allocation11 + $0xa0] ss:$8 sps:$4 sm:$0xff]   ;;  %v7594_v37 = vld [vmem:[#allocation11 + $0xb4] ss:$8 sps:$4 sm:$0xff]  }
 0x196   : > { %v9675_v44 = vsub.f32 %v9603_v12, %v642_v36  ;;  %v9678_v45 = vsub.f32 %v9606_v13, %v642_v36  ;;  %v681_v46 = vadd.f32 %v665_v40, %v664_v39  ;;  %v7592_v36 = vld [vmem:[#allocation9 + $0xb4] ss:$8 sps:$4 sm:$0xff]   ;;  %v7597_v39 = vld [vmem:[#allocation11 + $0xb0] ss:$8 sps:$4 sm:$0xff]   ;;  %v7598_v40 = vld [vmem:[#allocation9 + $0xc4] ss:$8 sps:$4 sm:$0xff]  }
 0x197   : > { %v9681_v47 = vsub.f32 %v9609_v14, %v643_v41  ;;  %v9684_v48 = vsub.f32 %v9612_v15, %v643_v41  ;;  %v633_v49 = vpop.xlane.xlu0 %632  ;;  %v687_v52 = vadd.f32 %v669_v43, %v668_v42  ;;  %1017 = vmatpush1.bf16.msra.mxu0 %v7590_v32  ;;  %v7600_v41 = vld [vmem:[#allocation11 + $0xc4] ss:$8 sps:$4 sm:$0xff]   ;;  %v7602_v42 = vld [vmem:[#allocation9 + $0xc0] ss:$8 sps:$4 sm:$0xff]   ;;  %v9973_v15 = vmov 0.0  }
 0x198   : > { %v644_v50 = vmul.f32 0.00390625, %v633_v49  ;;  %685 = vadd.xlane.f32.xlu0 %v684_v38  ;;  %682 = vadd.xlane.f32.xlu1 %v681_v46  ;;  %v636_v51 = vpop.xlane.xlu1 %635  ;;  %v670_v53 = vmul.f32 %v9675_v44, %v9675_v44  ;;  %v671_v54 = vmul.f32 %v9678_v45, %v9678_v45  ;;  %v7596_v38 = vld [vmem:[#allocation9 + $0xb0] ss:$8 sps:$4 sm:$0xff]   ;;  %v7603_v43 = vld [vmem:[#allocation11 + $0xc0] ss:$8 sps:$4 sm:$0xff]   ;;  %v9975_v14 = vmov 0.0  }
 0x199   : > { %v645_v55 = vmul.f32 0.00390625, %v636_v51  ;;  %v672_v56 = vmul.f32 %v9681_v47, %v9681_v47  ;;  %v673_v57 = vmul.f32 %v9684_v48, %v9684_v48  ;;  %1298 = vmatpush1.bf16.msra.mxu1 %v7591_v35  ;;  %1018 = vmatprep.subr.bf16.mxu0 %v7592_v36  ;;  %v7604_v46 = vld [vmem:[#allocation9 + $0xd4] ss:$8 sps:$4 sm:$0xff]   ;;  %v7609_v51 = vld [vmem:[#allocation11 + $0xd0] ss:$8 sps:$4 sm:$0xff]   ;;  %v9977_v13 = vmov 0.0  }
 0x19a   : > { %v9695_v58 = vsub.f32 %v9615_v16, %v644_v50  ;;  %v9698_v59 = vsub.f32 %v9618_v17, %v644_v50  ;;  %v690_v60 = vadd.f32 %v671_v54, %v670_v53  ;;  %1299 = vmatprep.subr.bf16.mxu1 %v7594_v37  ;;  %v7606_v49 = vld [vmem:[#allocation11 + $0xd4] ss:$8 sps:$4 sm:$0xff]   ;;  %v7608_v50 = vld [vmem:[#allocation9 + $0xd0] ss:$8 sps:$4 sm:$0xff]   ;;  %v7612_v53 = vld [vmem:[#allocation11 + $0xe4] ss:$8 sps:$4 sm:$0xff]  }
 0x19b   : > { %v9701_v61 = vsub.f32 %v9623_v19, %v645_v55  ;;  %v9704_v62 = vsub.f32 %v9626_v20, %v645_v55  ;;  %v693_v63 = vadd.f32 %v673_v57, %v672_v56  ;;  %1019 = vmatpush1.bf16.msra.mxu0 %v7596_v38  ;;  %v7614_v54 = vld [vmem:[#allocation9 + $0xe0] ss:$8 sps:$4 sm:$0xff]   ;;  %v7616_v56 = vld [vmem:[#allocation9 + $0xf4] ss:$8 sps:$4 sm:$0xff]   ;;  %v9965_v20 = vmov 0.0  }
 0x19c   : > { %688 = vadd.xlane.f32.xlu1 %v687_v52  ;;  %691 = vadd.xlane.f32.xlu0 %v690_v60  ;;  %v674_v3 = vmul.f32 %v9695_v58, %v9695_v58  ;;  %v675_v7 = vmul.f32 %v9698_v59, %v9698_v59  ;;  %v7610_v52 = vld [vmem:[#allocation9 + $0xe4] ss:$8 sps:$4 sm:$0xff]   ;;  %v7615_v55 = vld [vmem:[#allocation11 + $0xe0] ss:$8 sps:$4 sm:$0xff]   ;;  %v7618_v57 = vld [vmem:[#allocation11 + $0xf4] ss:$8 sps:$4 sm:$0xff]  }
 0x19d   : > { %v676_v22 = vmul.f32 %v9701_v61, %v9701_v61  ;;  %v677_v23 = vmul.f32 %v9704_v62, %v9704_v62  ;;  %1300 = vmatpush1.bf16.msra.mxu1 %v7597_v39  ;;  %1020 = vmatprep.subr.bf16.mxu0 %v7598_v40  ;;  %v7620_v60 = vld [vmem:[#allocation9 + $0xf0] ss:$8 sps:$4 sm:$0xff]   ;;  %v9967_v19 = vmov 0.0   ;;  %v9969_v17 = vmov 0.0  }
 0x19e   : > { %v696_v24 = vadd.f32 %v675_v7, %v674_v3  ;;  %1301 = vmatprep.subr.bf16.mxu1 %v7600_v41  ;;  %v743_v3 = vlaneseq  ;;  %v9971_v16 = vmov 0.0   ;;  %v9979_v12 = vmov 0.0  }
 0x19f   : > { %v699_v25 = vadd.f32 %v677_v23, %v676_v22  ;;  %1021 = vmatpush1.bf16.msra.mxu0 %v7602_v42  ;;  %v7624_v22 = vld [vmem:[#allocation12 + $0x4] ss:$8 sps:$4 sm:$0xff]  }
 0x1a0   : > { %694 = vadd.xlane.f32.xlu1 %v693_v63  ;;  %697 = vadd.xlane.f32.xlu0 %v696_v24  ;;  %v7621_v63 = vld [vmem:[#allocation11 + $0xf0] ss:$8 sps:$4 sm:$0xff]   ;;  %v9714_v7 = vshrl.u32 %v743_v3, 7  ;;  %v9737_v32 = vand.u32 127, %v743_v3 }
 0x1a1   : > { %1302 = vmatpush1.bf16.msra.mxu1 %v7603_v43  ;;  %1022 = vmatprep.subr.bf16.mxu0 %v7604_v46 }
 0x1a2   : > { %1303 = vmatprep.subr.bf16.mxu1 %v7606_v49  ;;  %12410 = vst [vmem:[#allocation42_spill] sm:$0xff] %v9714_v7  ;;  %v9717_v23 = vadd.s32 8, %v9714_v7  ;;  %v9720_v24 = vadd.s32 16, %v9714_v7  ;;  %v9726_v26 = vadd.s32 32, %v9714_v7  ;;  %v9729_v27 = vadd.s32 40, %v9714_v7  ;;  %12418 = vst [vmem:[#allocation50_spill] sm:$0xff] %v9737_v32 }
 0x1a3   : > { %1023 = vmatpush1.bf16.msra.mxu0 %v7608_v50  ;;  %v9732_v28 = vadd.s32 48, %v9714_v7  ;;  %v9735_v29 = vadd.s32 56, %v9714_v7 }
 0x1a4   : > { %700 = vadd.xlane.f32.xlu1 %v699_v25  ;;  %1024 = vmatprep.subr.bf16.mxu0 %v7610_v52  ;;  %12411 = vst [vmem:[#allocation43_spill] sm:$0xff] %v9717_v23  ;;  %12412 = vst [vmem:[#allocation44_spill] sm:$0xff] %v9720_v24  ;;  %v9723_v25 = vadd.s32 24, %v9714_v7 }
 0x1a5   : > { %1304 = vmatpush1.bf16.msra.mxu1 %v7609_v51  ;;  %12414 = vst [vmem:[#allocation46_spill] sm:$0xff] %v9726_v26  ;;  %12415 = vst [vmem:[#allocation47_spill] sm:$0xff] %v9729_v27 }
 0x1a6   : > { %1305 = vmatprep.subr.bf16.mxu1 %v7612_v53  ;;  %12413 = vst [vmem:[#allocation45_spill] sm:$0xff] %v9723_v25  ;;  %12416 = vst [vmem:[#allocation48_spill] sm:$0xff] %v9732_v28 }
 0x1a7   : > { %1025 = vmatpush1.bf16.msra.mxu0 %v7614_v54  ;;  %12417 = vst [vmem:[#allocation49_spill] sm:$0xff] %v9735_v29  ;;  %v9740_v54 = vsub.s32 1, %v9714_v7 }
 0x1a8   : > { %1026 = vmatprep.subr.bf16.mxu0 %v7616_v56 }
 0x1a9   : > { %1306 = vmatpush1.bf16.msra.mxu1 %v7615_v55  ;;  %12419 = vst [vmem:[#allocation51_spill] sm:$0xff] %v9740_v54  ;;  %v9743_v55 = vsub.s32 0, %v9714_v7 }
 0x1aa   : > { %1307 = vmatprep.subr.bf16.mxu1 %v7618_v57 }
 0x1ab   : > { %1027 = vmatpush1.bf16.msra.mxu0 %v7620_v60  ;;  %12420 = vst [vmem:[#allocation52_spill] sm:$0xff] %v9743_v55  ;;  %v611_v60 = vld [vmem:[%s12421_s23] sm:$0x3] }
 0x1ac   : > { %1542 = vmatprep.subr.bf16.mxu0 %v7624_v22 }
 0x1ad   : > { %1308 = vmatpush1.bf16.msra.mxu1 %v7621_v63 }
 0x1ae   : > { %6603 = vmatprep.subr.bf16.mxu1 %v7624_v22 }
 0x221   : > { %v680_v35 = vpop.xlane.xlu0 %679 }
 0x222   : > { %v702_v36 = vmul.f32 0.00390625, %v680_v35 }
 0x224   : > { %v710_v37 = vadd.f32 1e-05, %v702_v36  ;;  %v612_v36 = vld [vmem:[%s12422_s25] sm:$0x3] }
 0x225   : > { %v683_v38 = vpop.xlane.xlu1 %682  ;;  %v686_v39 = vpop.xlane.xlu0 %685 }
 0x226   : > { %7670 = vrsqrt.f32 %v710_v37  ;;  %v703_v40 = vmul.f32 0.00390625, %v683_v38  ;;  %v704_v41 = vmul.f32 0.00390625, %v686_v39  ;;  %v9752_v37 = vrot.slane %v611_v60, %v9740_v54 }
 0x227   : > { %v9755_v38 = vrot.slane %v611_v60, %v9743_v55 }
 0x228   : > { %v711_v42 = vadd.f32 1e-05, %v703_v40  ;;  %v712_v43 = vadd.f32 1e-05, %v704_v41 }
 0x229   : > { %v689_v46 = vpop.xlane.xlu1 %688  ;;  %v692_v49 = vpop.xlane.xlu0 %691 }
 0x22a   : > { %7672 = vrsqrt.f32 %v711_v42  ;;  %v705_v50 = vmul.f32 0.00390625, %v689_v46  ;;  %v706_v51 = vmul.f32 0.00390625, %v692_v49  ;;  %v9760_v46 = vrot.slane %v612_v36, %v9740_v54 }
 0x22b   : > { %7674 = vrsqrt.f32 %v712_v43 }
 0x22c   : > { %v713_v52 = vadd.f32 1e-05, %v705_v50  ;;  %v714_v53 = vadd.f32 1e-05, %v706_v51 }
 0x22d   : > { %v695_v56 = vpop.xlane.xlu1 %694  ;;  %v698_v57 = vpop.xlane.xlu0 %697 }
 0x22e   : > { %7676 = vrsqrt.f32 %v713_v52  ;;  %v707_v63 = vmul.f32 0.00390625, %v695_v56  ;;  %v708_v3 = vmul.f32 0.00390625, %v698_v57 }
 0x22f   : > { %7678 = vrsqrt.f32 %v714_v53  ;;  %v9765_v53 = vrot.slane %v612_v36, %v9743_v55 }
 0x230   : > { %v7671_v22 = vpop.eup %7670  ;;  %v715_v35 = vadd.f32 1e-05, %v707_v63  ;;  %v716_v43 = vadd.f32 1e-05, %v708_v3 }
 0x231   : > { %v701_v39 = vpop.xlane.xlu1 %700  ;;  %v727_v40 = vmul.f32 %v7671_v22, %v9638_v11  ;;  %v726_v41 = vmul.f32 %v7671_v22, %v9635_v10 }
 0x232   : > { %7680 = vrsqrt.f32 %v715_v35  ;;  %v709_v42 = vmul.f32 0.00390625, %v701_v39 }
 0x233   : > { %v754_v51 = vmul.f32 %v9752_v37, %v727_v40  ;;  %v753_v52 = vmul.f32 %v9755_v38, %v726_v41 }
 0x234   : > { %v7673_v49 = vpop.eup %7672  ;;  %v717_v50 = vadd.f32 1e-05, %v709_v42 }
 0x235   : > { %v7675_v56 = vpop.eup %7674  ;;  %v729_v11 = vmul.f32 %v7673_v49, %v9658_v31  ;;  %v728_v10 = vmul.f32 %v7673_v49, %v9655_v30  ;;  %v781_v22 = vadd.f32 %v9760_v46, %v754_v51  ;;  %v780_v35 = vadd.f32 %v9765_v53, %v753_v52 }
 0x236   : > { %7682 = vrsqrt.f32 %v717_v50  ;;  %v731_v57 = vmul.f32 %v7675_v56, %v9644_v21  ;;  %v730_v41 = vmul.f32 %v7675_v56, %v9641_v18 }
 0x237   : > { %7684 = vrsqrt.f32 %v716_v43  ;;  %v756_v60 = vmul.f32 %v9752_v37, %v729_v11  ;;  %v755_v63 = vmul.f32 %v9755_v38, %v728_v10  ;;  %v7622_v43 = vld [vmem:[#allocation12] ss:$8 sps:$4 sm:$0xff]   ;;  %v7627_v11 = vld [vmem:[#allocation12 + $0x14] ss:$8 sps:$4 sm:$0xff]  }
 0x238   : > { %v7677_v3 = vpop.eup %7676  ;;  %v758_v36 = vmul.f32 %v9752_v37, %v731_v57  ;;  %v7625_v57 = vld [vmem:[#allocation12 + $0x10] ss:$8 sps:$4 sm:$0xff]  }
 0x239   : > { %v7679_v39 = vpop.eup %7678  ;;  %v783_v31 = vadd.f32 %v9760_v46, %v756_v60  ;;  %v782_v30 = vadd.f32 %v9765_v53, %v755_v63  ;;  %v733_v40 = vmul.f32 %v7677_v3, %v9664_v34  ;;  %v732_v21 = vmul.f32 %v7677_v3, %v9661_v33 }
 0x23a   : > { %v735_v51 = vmul.f32 %v7679_v39, %v9678_v45  ;;  %v785_v33 = vadd.f32 %v9760_v46, %v758_v36  ;;  %v757_v45 = vmul.f32 %v9755_v38, %v730_v41  ;;  %v7628_v41 = vld [vmem:[#allocation12 + $0x20] ss:$8 sps:$4 sm:$0xff]  }
 0x23b   : > { %v9780_v42 = vpack.c.bf16 %v783_v31, %v781_v22  ;;  %v9782_v49 = vpack.c.bf16 %v782_v30, %v780_v35  ;;  %v760_v50 = vmul.f32 %v9752_v37, %v733_v40  ;;  %v759_v10 = vmul.f32 %v9755_v38, %v732_v21  ;;  %v7630_v22 = vld [vmem:[#allocation12 + $0x24] ss:$8 sps:$4 sm:$0xff]  }
 0x23c   : > { %v7681_v52 = vpop.eup %7680  ;;  %v762_v60 = vmul.f32 %v9752_v37, %v735_v51  ;;  %v784_v31 = vadd.f32 %v9765_v53, %v757_v45  ;;  %v734_v40 = vmul.f32 %v7679_v39, %v9675_v44 }
 0x23d   : > { %1028 = vmatprep.mubr.bf16.mxu0 %v9780_v42  ;;  %1309 = vmatprep.mubr.bf16.mxu1 %v9780_v42  ;;  %v787_v18 = vadd.f32 %v9760_v46, %v760_v50  ;;  %v737_v34 = vmul.f32 %v7681_v52, %v9684_v48  ;;  %v786_v48 = vadd.f32 %v9765_v53, %v759_v10  ;;  %v7636_v10 = vld [vmem:[#allocation12 + $0x44] ss:$8 sps:$4 sm:$0xff]  }
 0x23e   : > { %1029 = vmatmul.mubr.bf16.vlgmr.msra.gmra.mrb[0].mxu0 %v9782_v49  ;;  %1310 = vmatmul.mubr.bf16.vlgmr.msra.gmra.mrb[0].mxu1 %v9782_v49  ;;  %v736_v35 = vmul.f32 %v7681_v52, %v9681_v47  ;;  %v7633_v52 = vld [vmem:[#allocation12 + $0x34] ss:$8 sps:$4 sm:$0xff]  }
 0x23f   : > { %1543 = vmatpush1.bf16.msra.mxu0 %v7622_v43  ;;  %6619 = vmatpush1.bf16.msra.mxu1 %v7622_v43  ;;  %v9795_v56 = vpack.c.bf16 %v787_v18, %v785_v33  ;;  %v764_v63 = vmul.f32 %v9752_v37, %v737_v34  ;;  %v789_v43 = vadd.f32 %v9760_v46, %v762_v60  ;;  %v7634_v60 = vld [vmem:[#allocation12 + $0x40] ss:$8 sps:$4 sm:$0xff]  }
 0x240   : > { %v7683_v3 = vpop.eup %7682  ;;  %1544 = vmatprep.subr.bf16.mxu0 %v7627_v11  ;;  %6604 = vmatprep.subr.bf16.mxu1 %v7627_v11  ;;  %v9808_v47 = vpack.c.bf16 %v786_v48, %v784_v31  ;;  %v763_v50 = vmul.f32 %v9755_v38, %v736_v35  ;;  %v7631_v11 = vld [vmem:[#allocation12 + $0x30] ss:$8 sps:$4 sm:$0xff]   ;;  %v7642_v35 = vld [vmem:[#allocation12 + $0x64] ss:$8 sps:$4 sm:$0xff]   ;;  %v7640_v31 = vld [vmem:[#allocation12 + $0x60] ss:$8 sps:$4 sm:$0xff]  }
 0x241   : > { %v7685_v36 = vpop.eup %7684  ;;  %1038 = vmatprep.mubr.bf16.mxu0 %v9795_v56  ;;  %1319 = vmatprep.mubr.bf16.mxu1 %v9795_v56  ;;  %v791_v30 = vadd.f32 %v9760_v46, %v764_v63  ;;  %v741_v21 = vmul.f32 %v7683_v3, %v9704_v62  ;;  %v761_v62 = vmul.f32 %v9755_v38, %v734_v40  ;;  %v7637_v48 = vld [vmem:[#allocation12 + $0x50] ss:$8 sps:$4 sm:$0xff]  }
 0x242   : > { %v739_v51 = vmul.f32 %v7685_v36, %v9698_v59  ;;  %v790_v33 = vadd.f32 %v9765_v53, %v763_v50  ;;  %v740_v18 = vmul.f32 %v7683_v3, %v9701_v61  ;;  %v7639_v61 = vld [vmem:[#allocation12 + $0x54] ss:$8 sps:$4 sm:$0xff]   ;;  %v7643_v40 = vld [vmem:[#allocation12 + $0x70] ss:$8 sps:$4 sm:$0xff]   ;;  %v7654_v50 = vld [vmem:[#allocation12 + $0xa4] ss:$8 sps:$4 sm:$0xff]  }
 0x243   : > { %1545 = vmatpush1.bf16.msra.mxu0 %v7625_v57  ;;  %6620 = vmatpush1.bf16.msra.mxu1 %v7625_v57  ;;  %v801_v44 = vpack.c.bf16 %v791_v30, %v789_v43  ;;  %v768_v39 = vmul.f32 %v9752_v37, %v741_v21  ;;  %v788_v34 = vadd.f32 %v9765_v53, %v761_v62  ;;  %v7645_v30 = vld [vmem:[#allocation12 + $0x74] ss:$8 sps:$4 sm:$0xff]   ;;  %v7648_v21 = vld [vmem:[#allocation12 + $0x84] ss:$8 sps:$4 sm:$0xff]   ;;  %v7649_v43 = vld [vmem:[#allocation12 + $0x90] ss:$8 sps:$4 sm:$0xff]  }
 0x244   : > { %1546 = vmatprep.subr.bf16.mxu0 %v7630_v22  ;;  %6605 = vmatprep.subr.bf16.mxu1 %v7630_v22  ;;  %v766_v59 = vmul.f32 %v9752_v37, %v739_v51  ;;  %v738_v57 = vmul.f32 %v7685_v36, %v9695_v58  ;;  %v767_v37 = vmul.f32 %v9755_v38, %v740_v18  ;;  %v7652_v51 = vld [vmem:[#allocation12 + $0xa0] ss:$8 sps:$4 sm:$0xff]   ;;  %v7667_v18 = vld [vmem:[#allocation12 + $0xf0] ss:$8 sps:$4 sm:$0xff]  }
 0x245   : > { %v795_v45 = vadd.f32 %v9760_v46, %v768_v39  ;;  %v9822_v63 = vpack.c.bf16 %v790_v33, %v788_v34  ;;  %v7658_v62 = vld [vmem:[#allocation12 + $0xc0] ss:$8 sps:$4 sm:$0xff]   ;;  %v7663_v39 = vld [vmem:[#allocation12 + $0xd4] ss:$8 sps:$4 sm:$0xff]  }
 0x246   : > { %1039 = vmatmul.mubr.bf16.gmra.mrb[4].mxu0 %v9808_v47  ;;  %1320 = vmatmul.mubr.bf16.gmra.mrb[4].mxu1 %v9808_v47  ;;  %v793_v22 = vadd.f32 %v9760_v46, %v766_v59  ;;  %v765_v58 = vmul.f32 %v9755_v38, %v738_v57  ;;  %v794_v46 = vadd.f32 %v9765_v53, %v767_v37  ;;  %v7664_v33 = vld [vmem:[#allocation12 + $0xe0] ss:$8 sps:$4 sm:$0xff]   ;;  %v7669_v59 = vld [vmem:[#allocation12 + $0xf4] ss:$8 sps:$4 sm:$0xff]  }
 0x247   : > { %1547 = vmatpush1.bf16.msra.mxu0 %v7628_v41  ;;  %6621 = vmatpush1.bf16.msra.mxu1 %v7628_v41  ;;  %v7651_v41 = vld [vmem:[#allocation12 + $0x94] ss:$8 sps:$4 sm:$0xff]  }
 0x248   : > { %1048 = vmatprep.mubr.bf16.mxu0 %v801_v44  ;;  %1329 = vmatprep.mubr.bf16.mxu1 %v801_v44  ;;  %v9828_v3 = vpack.c.bf16 %v795_v45, %v793_v22  ;;  %v792_v36 = vadd.f32 %v9765_v53, %v765_v58  ;;  %v7646_v53 = vld [vmem:[#allocation12 + $0x80] ss:$8 sps:$4 sm:$0xff]  }
 0x249   : > { %1548 = vmatprep.subr.bf16.mxu0 %v7633_v52  ;;  %6606 = vmatprep.subr.bf16.mxu1 %v7633_v52  ;;  %v7655_v52 = vld [vmem:[#allocation12 + $0xb0] ss:$8 sps:$4 sm:$0xff]  }
 0x24a   : > { %v9835_v38 = vpack.c.bf16 %v794_v46, %v792_v36  ;;  %v9961_v46 = vmov 0.0  }
 0x24b   : > { %1549 = vmatpush1.bf16.msra.mxu0 %v7631_v11  ;;  %6622 = vmatpush1.bf16.msra.mxu1 %v7631_v11  ;;  %v7661_v11 = vld [vmem:[#allocation12 + $0xd0] ss:$8 sps:$4 sm:$0xff]  }
 0x24c   : > { %1550 = vmatprep.subr.bf16.mxu0 %v7636_v10  ;;  %6607 = vmatprep.subr.bf16.mxu1 %v7636_v10  ;;  %v7666_v10 = vld [vmem:[#allocation12 + $0xe4] ss:$8 sps:$4 sm:$0xff]  }
 0x24e   : > { %1049 = vmatmul.mubr.bf16.gmra.mrb[8].mxu0 %v9822_v63  ;;  %1330 = vmatmul.mubr.bf16.gmra.mrb[8].mxu1 %v9822_v63 }
 0x24f   : > { %1551 = vmatpush1.bf16.msra.mxu0 %v7634_v60  ;;  %6623 = vmatpush1.bf16.msra.mxu1 %v7634_v60 }
 0x250   : > { %1058 = vmatprep.mubr.bf16.mxu0 %v9828_v3  ;;  %1339 = vmatprep.mubr.bf16.mxu1 %v9828_v3 }
 0x251   : > { %1552 = vmatprep.subr.bf16.mxu0 %v7639_v61  ;;  %6608 = vmatprep.subr.bf16.mxu1 %v7639_v61 }
 0x253   : > { %1553 = vmatpush1.bf16.msra.mxu0 %v7637_v48  ;;  %6624 = vmatpush1.bf16.msra.mxu1 %v7637_v48 }
 0x254   : > { %1554 = vmatprep.subr.bf16.mxu0 %v7642_v35  ;;  %6609 = vmatprep.subr.bf16.mxu1 %v7642_v35  ;;  %v9963_v35 = vmov 0.0  }
 0x256   : > { %1059 = vmatmul.mubr.bf16.gmra.mrb[12].mxu0 %v9835_v38  ;;  %1340 = vmatmul.mubr.bf16.gmra.mrb[12].mxu1 %v9835_v38 }
 0x257   : > { %1555 = vmatpush1.bf16.msra.mxu0 %v7640_v31  ;;  %6625 = vmatpush1.bf16.msra.mxu1 %v7640_v31 }
 0x258   : > { %1574 = vmatprep.mubr.bf16.mxu0 %v9780_v42  ;;  %1594 = vmatprep.mubr.bf16.mxu1 %v801_v44  ;;  %v7657_v42 = vld [vmem:[#allocation12 + $0xb4] ss:$8 sps:$4 sm:$0xff]   ;;  %v7660_v44 = vld [vmem:[#allocation12 + $0xc4] ss:$8 sps:$4 sm:$0xff]  }
 0x259   : > { %1556 = vmatprep.subr.bf16.mxu0 %v7645_v30  ;;  %6610 = vmatprep.subr.bf16.mxu1 %v7645_v30 }
 0x25b   : > { %1557 = vmatpush1.bf16.msra.mxu0 %v7643_v40  ;;  %6626 = vmatpush1.bf16.msra.mxu1 %v7643_v40 }
 0x25c   : > { %1558 = vmatprep.subr.bf16.mxu0 %v7648_v21  ;;  %6611 = vmatprep.subr.bf16.mxu1 %v7648_v21 }
 0x25f   : > { %1559 = vmatpush1.bf16.msra.mxu0 %v7646_v53  ;;  %6627 = vmatpush1.bf16.msra.mxu1 %v7646_v53 }
 0x260   : > { %1560 = vmatprep.subr.bf16.mxu0 %v7651_v41  ;;  %6612 = vmatprep.subr.bf16.mxu1 %v7651_v41 }
 0x263   : > { %1561 = vmatpush1.bf16.msra.mxu0 %v7649_v43  ;;  %6628 = vmatpush1.bf16.msra.mxu1 %v7649_v43 }
 0x264   : > { %1562 = vmatprep.subr.bf16.mxu0 %v7654_v50  ;;  %6613 = vmatprep.subr.bf16.mxu1 %v7654_v50 }
 0x267   : > { %1563 = vmatpush1.bf16.msra.mxu0 %v7652_v51  ;;  %6629 = vmatpush1.bf16.msra.mxu1 %v7652_v51 }
 0x268   : > { %1564 = vmatprep.subr.bf16.mxu0 %v7657_v42  ;;  %6614 = vmatprep.subr.bf16.mxu1 %v7657_v42 }
 0x26b   : > { %1565 = vmatpush1.bf16.msra.mxu0 %v7655_v52  ;;  %6630 = vmatpush1.bf16.msra.mxu1 %v7655_v52 }
 0x26c   : > { %1566 = vmatprep.subr.bf16.mxu0 %v7660_v44  ;;  %6615 = vmatprep.subr.bf16.mxu1 %v7660_v44 }
 0x26f   : > { %1567 = vmatpush1.bf16.msra.mxu0 %v7658_v62  ;;  %6631 = vmatpush1.bf16.msra.mxu1 %v7658_v62 }
 0x270   : > { %1568 = vmatprep.subr.bf16.mxu0 %v7663_v39  ;;  %6616 = vmatprep.subr.bf16.mxu1 %v7663_v39 }
 0x273   : > { %1569 = vmatpush1.bf16.msra.mxu0 %v7661_v11  ;;  %6632 = vmatpush1.bf16.msra.mxu1 %v7661_v11 }
 0x274   : > { %1570 = vmatprep.subr.bf16.mxu0 %v7666_v10  ;;  %6617 = vmatprep.subr.bf16.mxu1 %v7666_v10 }
 0x277   : > { %1571 = vmatpush1.bf16.msra.mxu0 %v7664_v33  ;;  %6633 = vmatpush1.bf16.msra.mxu1 %v7664_v33 }
 0x278   : > { %1572 = vmatprep.subr.bf16.mxu0 %v7669_v59  ;;  %6618 = vmatprep.subr.bf16.mxu1 %v7669_v59 }
 0x27b   : > { %1573 = vmatpush1.bf16.msra.mxu0 %v7667_v18  ;;  %6634 = vmatpush1.bf16.msra.mxu1 %v7667_v18 }
 0x27e   : > { %1575 = vmatmul.mubr.bf16.vlgmr.msra.gmra.mrb[16].mxu0 %v9782_v49  ;;  %1595 = vmatmul.mubr.bf16.vlgmr.msra.gmra.mrb[16].mxu1 %v9822_v63 }
 0x27f   : > { %1584 = vmatprep.mubr.bf16.mxu0 %v9795_v56  ;;  %1604 = vmatprep.mubr.bf16.mxu1 %v9828_v3 }
 0x286   : > { %1585 = vmatmul.mubr.bf16.gmra.mrb[20].mxu0 %v9808_v47  ;;  %1605 = vmatmul.mubr.bf16.gmra.mrb[20].mxu1 %v9835_v38 }
 0x311   : > { %v1030_v34 = vpop.f32.mrb[0].mxu0  ;;  %v1311_v45 = vpop.f32.mrb[0].mxu1 }
 0x312   : > { %v1032_v49 = vpop.f32.mrb[1].mxu0  ;;  %v1313_v57 = vpop.f32.mrb[1].mxu1  ;;  %v9851_v56 = vmul.f32 0.088388346, %v1030_v34 }
 0x313   : > { %v1034_v60 = vpop.f32.mrb[2].mxu0  ;;  %v1315_v63 = vpop.f32.mrb[2].mxu1  ;;  %v9855_v3 = vmul.f32 0.088388346, %v1032_v49 }
 0x314   : > { %12424 = vst [vmem:[#allocation53_spill] sm:$0xff] %v9851_v56  ;;  %v9853_v22 = vmul.f32 0.088388346, %v1034_v60  ;;  %v1624_v47 = vpack.c.bf16 %v1315_v63, %v1311_v45  ;;  %v1036_v37 = vpop.f32.mrb[3].mxu0  ;;  %v1317_v61 = vpop.f32.mrb[3].mxu1 }
 0x315   : > { %12426 = vst [vmem:[#allocation55_spill] sm:$0xff] %v9855_v3  ;;  %v9857_v58 = vmul.f32 0.088388346, %v1036_v37  ;;  %v1655_v48 = vpack.c.bf16 %v1317_v61, %v1313_v57 }
 0x316   : > { %12425 = vst [vmem:[#allocation54_spill] sm:$0xff] %v9853_v22  ;;  %1632 = vst [vmem:[%s9863_s16] sm:$0xff] %v1624_v47 }
 0x317   : > { %12427 = vst [vmem:[#allocation56_spill] sm:$0xff] %v9857_v58  ;;  %6188 = vst [vmem:[%s9863_s16 + $0x40] sm:$0xff] %v1655_v48 }
 0x319   : > { %v1040_v36 = vpop.f32.mrb[4].mxu0  ;;  %v1321_v31 = vpop.f32.mrb[4].mxu1 }
 0x31a   : > { %v1042_v38 = vpop.f32.mrb[5].mxu0  ;;  %v1323_v30 = vpop.f32.mrb[5].mxu1  ;;  %v9869_v53 = vmul.f32 0.088388346, %v1040_v36 }
 0x31b   : > { %v1044_v40 = vpop.f32.mrb[6].mxu0  ;;  %v1325_v21 = vpop.f32.mrb[6].mxu1  ;;  %v9873_v42 = vmul.f32 0.088388346, %v1042_v38 }
 0x31c   : > { %12428 = vst [vmem:[#allocation57_spill] sm:$0xff] %v9869_v53  ;;  %v9871_v41 = vmul.f32 0.088388346, %v1044_v40  ;;  %v1625_v43 = vpack.c.bf16 %v1325_v21, %v1321_v31  ;;  %v1046_v50 = vpop.f32.mrb[7].mxu0  ;;  %v1327_v51 = vpop.f32.mrb[7].mxu1 }
 0x31d   : > { %12430 = vst [vmem:[#allocation59_spill] sm:$0xff] %v9873_v42  ;;  %v9875_v52 = vmul.f32 0.088388346, %v1046_v50  ;;  %v1656_v44 = vpack.c.bf16 %v1327_v51, %v1323_v30 }
 0x31e   : > { %12429 = vst [vmem:[#allocation58_spill] sm:$0xff] %v9871_v41  ;;  %1633 = vst [vmem:[%s9863_s16 + $0x8] sm:$0xff] %v1625_v43 }
 0x31f   : > { %12431 = vst [vmem:[#allocation60_spill] sm:$0xff] %v9875_v52  ;;  %6189 = vst [vmem:[%s9863_s16 + $0x48] sm:$0xff] %v1656_v44 }
 0x321   : > { %v1050_v11 = vpop.f32.mrb[8].mxu0  ;;  %v1331_v10 = vpop.f32.mrb[8].mxu1 }
 0x322   : > { %v1052_v33 = vpop.f32.mrb[9].mxu0  ;;  %v1333_v59 = vpop.f32.mrb[9].mxu1  ;;  %v9883_v45 = vmul.f32 0.088388346, %v1050_v11 }
 0x323   : > { %v1054_v18 = vpop.f32.mrb[10].mxu0  ;;  %v1335_v34 = vpop.f32.mrb[10].mxu1  ;;  %v9887_v47 = vmul.f32 0.088388346, %v1052_v33 }
 0x324   : > { %12432 = vst [vmem:[#allocation61_spill] sm:$0xff] %v9883_v45  ;;  %v9885_v49 = vmul.f32 0.088388346, %v1054_v18  ;;  %v1626_v57 = vpack.c.bf16 %v1335_v34, %v1331_v10  ;;  %v1056_v60 = vpop.f32.mrb[11].mxu0  ;;  %v1337_v63 = vpop.f32.mrb[11].mxu1 }
 0x325   : > { %12434 = vst [vmem:[#allocation63_spill] sm:$0xff] %v9887_v47  ;;  %v9889_v37 = vmul.f32 0.088388346, %v1056_v60  ;;  %v1657_v61 = vpack.c.bf16 %v1337_v63, %v1333_v59 }
 0x326   : > { %12433 = vst [vmem:[#allocation62_spill] sm:$0xff] %v9885_v49  ;;  %1634 = vst [vmem:[%s9863_s16 + $0x10] sm:$0xff] %v1626_v57 }
 0x327   : > { %12435 = vst [vmem:[#allocation64_spill] sm:$0xff] %v9889_v37  ;;  %6190 = vst [vmem:[%s9863_s16 + $0x50] sm:$0xff] %v1657_v61 }
 0x329   : > { %v1060_v31 = vpop.f32.mrb[12].mxu0  ;;  %v1341_v38 = vpop.f32.mrb[12].mxu1 }
 0x32a   : > { %v1062_v30 = vpop.f32.mrb[13].mxu0  ;;  %v1343_v40 = vpop.f32.mrb[13].mxu1  ;;  %v9897_v50 = vmul.f32 0.088388346, %v1060_v31 }
 0x32b   : > { %v1064_v21 = vpop.f32.mrb[14].mxu0  ;;  %v1345_v43 = vpop.f32.mrb[14].mxu1  ;;  %v9901_v33 = vmul.f32 0.088388346, %v1062_v30 }
 0x32c   : > { %12436 = vst [vmem:[#allocation65_spill] sm:$0xff] %v9897_v50  ;;  %v9899_v51 = vmul.f32 0.088388346, %v1064_v21  ;;  %v1627_v44 = vpack.c.bf16 %v1345_v43, %v1341_v38  ;;  %v1066_v11 = vpop.f32.mrb[15].mxu0  ;;  %v1347_v10 = vpop.f32.mrb[15].mxu1 }
 0x32d   : > { %12438 = vst [vmem:[#allocation67_spill] sm:$0xff] %v9901_v33  ;;  %v9903_v59 = vmul.f32 0.088388346, %v1066_v11  ;;  %v1658_v18 = vpack.c.bf16 %v1347_v10, %v1343_v40 }
 0x32e   : > { %12437 = vst [vmem:[#allocation66_spill] sm:$0xff] %v9899_v51  ;;  %1635 = vst [vmem:[%s9863_s16 + $0x18] sm:$0xff] %v1627_v44 }
 0x32f   : > { %12439 = vst [vmem:[#allocation68_spill] sm:$0xff] %v9903_v59  ;;  %6191 = vst [vmem:[%s9863_s16 + $0x58] sm:$0xff] %v1658_v18 }
 0x351   : > { %v1576_v60 = vpop.f32.mrb[16].mxu0  ;;  %v1596_v63 = vpop.f32.mrb[16].mxu1 }
 0x352   : > { %v1578_v61 = vpop.f32.mrb[17].mxu0  ;;  %v1598_v31 = vpop.f32.mrb[17].mxu1 }
 0x353   : > { %v1580_v38 = vpop.f32.mrb[18].mxu0  ;;  %v1600_v21 = vpop.f32.mrb[18].mxu1 }
 0x354   : > { %v1636_v30 = vpack.c.bf16 %v1580_v38, %v1576_v60  ;;  %v1638_v43 = vpack.c.bf16 %v1600_v21, %v1596_v63  ;;  %v1582_v11 = vpop.f32.mrb[19].mxu0  ;;  %v1602_v36 = vpop.f32.mrb[19].mxu1 }
 0x355   : > { %v1666_v40 = vpack.c.bf16 %v1582_v11, %v1578_v61  ;;  %v1668_v10 = vpack.c.bf16 %v1602_v36, %v1598_v31  ;;  %v9923_v36 = vmov 0.0   ;;  %v9935_v31 = vmov 0.0  }
 0x356   : > { %1642 = vst [vmem:[%s1641_s6] sm:$0xff] %v1636_v30  ;;  %1644 = vst [vmem:[%s1641_s6 + $0x10] sm:$0xff] %v1638_v43  ;;  %v9937_v30 = vmov 0.0   ;;  %v9939_v43 = vmov 0.0   ;;  %v9941_v11 = vmov 0.0  }
 0x357   : > { %6193 = vst [vmem:[%s1641_s6 + $0x40] sm:$0xff] %v1666_v40  ;;  %6195 = vst [vmem:[%s1641_s6 + $0x50] sm:$0xff] %v1668_v10  ;;  %v9943_v40 = vmov 0.0   ;;  %v9945_v10 = vmov 0.0  }
 0x359   : > { %v1586_v44 = vpop.f32.mrb[20].mxu0  ;;  %v1606_v18 = vpop.f32.mrb[20].mxu1  ;;  %5876 = sbr.rel (%p9919_p2) target bundleno = 1544 (0x608), region = 153 }
 0x35a   : > { %v1588_v57 = vpop.f32.mrb[21].mxu0  ;;  %v1608_v34 = vpop.f32.mrb[21].mxu1 }
 0x35b   : > { %v1590_v48 = vpop.f32.mrb[22].mxu0  ;;  %v1610_v39 = vpop.f32.mrb[22].mxu1 }
 0x35c   : > { %v1637_v62 = vpack.c.bf16 %v1590_v48, %v1586_v44  ;;  %v1639_v60 = vpack.c.bf16 %v1610_v39, %v1606_v18  ;;  %v1592_v63 = vpop.f32.mrb[23].mxu0  ;;  %v1612_v38 = vpop.f32.mrb[23].mxu1  ;;  %v9925_v39 = vmov 0.0   ;;  %v9927_v48 = vmov 0.0  }
 0x35d   : > { %v1667_v21 = vpack.c.bf16 %v1592_v63, %v1588_v57  ;;  %v1669_v61 = vpack.c.bf16 %v1612_v38, %v1608_v34  ;;  %v9929_v34 = vmov 0.0   ;;  %v9933_v57 = vmov 0.0  }
 0x35e   : > { %1643 = vst [vmem:[%s1641_s6 + $0x8] sm:$0xff] %v1637_v62  ;;  %1645 = vst [vmem:[%s1641_s6 + $0x18] sm:$0xff] %v1639_v60  ;;  %v9931_v62 = vmov 0.0   ;;  %v9947_v44 = vmov 0.0   ;;  %v9949_v18 = vmov 0.0   ;;  %v9951_v60 = vmov 0.0  }
 0x35f   : > { %6194 = vst [vmem:[%s1641_s6 + $0x48] sm:$0xff] %v1667_v21  ;;  %6196 = vst [vmem:[%s1641_s6 + $0x58] sm:$0xff] %v1669_v61  ;;  %v9953_v63 = vmov 0.0   ;;  %v9955_v38 = vmov 0.0   ;;  %v9957_v21 = vmov 0.0   ;;  %v9959_v61 = vmov 0.0  }
 0x360   : > { %v9989_v2 = vmov 0.0   ;;  %v9991_v6 = vmov 0.0   ;;  %v9993_v5 = vmov 0.0   ;;  %v9995_v1 = vmov 0.0   ;;  %s10085_s27 = smov 0  }
 0x361   : > { %v9997_v0 = vmov 0.0   ;;  %v9999_v54 = vmov 0.0   ;;  %v10001_v55 = vmov 0.0   ;;  %v10003_v27 = vmov 0.0  }
 0x362   : > { %v10005_v29 = vmov 0.0   ;;  %v10007_v26 = vmov 0.0   ;;  %v10009_v4 = vmov 0.0   ;;  %v10011_v8 = vmov 0.0  }
 0x363   : > { %12441 = vst [vmem:[#allocation69_spill] sm:$0xff] %v10005_v29  ;;  %v10013_v9 = vmov 0.0   ;;  %v10015_v12 = vmov 0.0   ;;  %v10017_v13 = vmov 0.0   ;;  %v10019_v14 = vmov 0.0  }
 0x364   : > { %v10021_v15 = vmov 0.0   ;;  %v10023_v16 = vmov 0.0   ;;  %v10025_v17 = vmov 0.0   ;;  %v10027_v19 = vmov 0.0  }
 0x365   : > { %v10029_v20 = vmov 0.0   ;;  %v10031_v35 = vmov 0.0   ;;  %v10033_v46 = vmov 0.0   ;;  %v10035_v36 = vmov 0.0  }
 0x366   : > { %v10037_v39 = vmov 0.0   ;;  %v10039_v48 = vmov 0.0   ;;  %v10041_v34 = vmov 0.0   ;;  %v10043_v62 = vmov 0.0  }
 0x367   : > { %v10045_v57 = vmov 0.0   ;;  %v10047_v31 = vmov 0.0   ;;  %v10049_v30 = vmov 0.0   ;;  %v10051_v43 = vmov 0.0  }
 0x368   : > { %v10053_v11 = vmov -1e+30   ;;  %v10055_v40 = vmov -1e+30   ;;  %v10057_v10 = vmov -1e+30  }
 0x369   : > { %v10059_v44 = vmov -1e+30   ;;  %v10061_v18 = vmov -1e+30   ;;  %v10063_v60 = vmov -1e+30  }
 0x36a   : > { %v10065_v63 = vmov -1e+30   ;;  %v10067_v38 = vmov -1e+30   ;;  %v10069_v21 = vmov -1e+30  }
 0x36b   : > { %v10071_v61 = vmov -1e+30   ;;  %v10073_v28 = vmov -1e+30   ;;  %v10075_v23 = vmov -1e+30  }
 0x36c   : > { %v10077_v25 = vmov -1e+30   ;;  %v10079_v7 = vmov -1e+30   ;;  %v10081_v24 = vmov -1e+30  }
 0x36d   : > { %v10083_v32 = vmov -1e+30  }
 0x36e LB: >> { %12443 = vst [vmem:[#allocation70_spill] sm:$0xff] %v8835_v2  ;;  %12444 = vst [vmem:[#allocation71_spill] sm:$0xff] %v8839_v6  ;;  %v12451_v29 = vld [vmem:[#allocation69_spill] sm:$0xff]  ;;  %v12463_v22 = vld [vmem:[#allocation54_spill] sm:$0xff]  ;;  %s6198_s4 = sshll.u32 %s9027_s27, 6  ;;  %s12469_s28 = sld [smem:[#allocation24_spill]]  ;;  %s9027_s27 = sphi %s10085_s27, %s12644_s27   ;;  %v9023_v32 = vphi %v10083_v32, %v12643_v32   ;;  %v9019_v24 = vphi %v10081_v24, %v12642_v24   ;;  %v9015_v7 = vphi %v10079_v7, %v12641_v7   ;;  %v9011_v25 = vphi %v10077_v25, %v12640_v25   ;;  %v9007_v23 = vphi %v10075_v23, %v12639_v23   ;;  %v9003_v28 = vphi %v10073_v28, %v12638_v28   ;;  %v8999_v61 = vphi %v10071_v61, %v12637_v61   ;;  %v8995_v21 = vphi %v10069_v21, %v12636_v21   ;;  %v8991_v38 = vphi %v10067_v38, %v12635_v38   ;;  %v8987_v63 = vphi %v10065_v63, %v12634_v63   ;;  %v8983_v60 = vphi %v10063_v60, %v12633_v60   ;;  %v8979_v18 = vphi %v10061_v18, %v12632_v18   ;;  %v8975_v44 = vphi %v10059_v44, %v12631_v44   ;;  %v8971_v10 = vphi %v10057_v10, %v12630_v10   ;;  %v8967_v40 = vphi %v10055_v40, %v12629_v40   ;;  %v8963_v11 = vphi %v10053_v11, %v12628_v11   ;;  %v8959_v43 = vphi %v10051_v43, %v12627_v43   ;;  %v8955_v30 = vphi %v10049_v30, %v12626_v30   ;;  %v8951_v31 = vphi %v10047_v31, %v12625_v31   ;;  %v8947_v57 = vphi %v10045_v57, %v12624_v57   ;;  %v8943_v62 = vphi %v10043_v62, %v12623_v62   ;;  %v8939_v34 = vphi %v10041_v34, %v12622_v34   ;;  %v8935_v48 = vphi %v10039_v48, %v12621_v48   ;;  %v8931_v39 = vphi %v10037_v39, %v12620_v39   ;;  %v8927_v36 = vphi %v10035_v36, %v12619_v36   ;;  %v8923_v46 = vphi %v10033_v46, %v12618_v46   ;;  %v8919_v35 = vphi %v10031_v35, %v12617_v35   ;;  %v8915_v20 = vphi %v10029_v20, %v12616_v20   ;;  %v8911_v19 = vphi %v10027_v19, %v12615_v19   ;;  %v8907_v17 = vphi %v10025_v17, %v12614_v17   ;;  %v8903_v16 = vphi %v10023_v16, %v12613_v16   ;;  %v8899_v15 = vphi %v10021_v15, %v12612_v15   ;;  %v8895_v14 = vphi %v10019_v14, %v12611_v14   ;;  %v8891_v13 = vphi %v10017_v13, %v12610_v13   ;;  %v8887_v12 = vphi %v10015_v12, %v12609_v12   ;;  %v8883_v9 = vphi %v10013_v9, %v12608_v9   ;;  %v8879_v8 = vphi %v10011_v8, %v12607_v8   ;;  %v8875_v4 = vphi %v10009_v4, %v12606_v4   ;;  %v8871_v26 = vphi %v10007_v26, %v12605_v26   ;;  %v8863_v27 = vphi %v10003_v27, %v12603_v27   ;;  %v8859_v55 = vphi %v10001_v55, %v12602_v55   ;;  %v8855_v54 = vphi %v9999_v54, %v12601_v54   ;;  %v8851_v0 = vphi %v9997_v0, %v12600_v0   ;;  %v8847_v1 = vphi %v9995_v1, %v12599_v1   ;;  %v8843_v5 = vphi %v9993_v5, %v12598_v5   ;;  %v8839_v6 = vphi %v9991_v6, %v12597_v6   ;;  %v8835_v2 = vphi %v9989_v2, %v12596_v2  }
 0x36f   : >> { %12445 = vst [vmem:[#allocation72_spill] sm:$0xff] %v8843_v5  ;;  %12446 = vst [vmem:[#allocation73_spill] sm:$0xff] %v8847_v1  ;;  %v12464_v56 = vld [vmem:[#allocation53_spill] sm:$0xff]  ;;  %v12466_v58 = vld [vmem:[#allocation56_spill] sm:$0xff]  ;;  %s10241_s22 = sshra.s32 %s6198_s4, 4  ;;  %vm1947_vm3 = vcmask 523264  }
 0x370   : >> { %12447 = vst [vmem:[#allocation74_spill] sm:$0xff] %v8851_v0  ;;  %12448 = vst [vmem:[#allocation75_spill] sm:$0xff] %v8855_v54  ;;  %v12465_v5 = vpack.c.bf16 %v12463_v22, %v12464_v56  ;;  %v12467_v3 = vld [vmem:[#allocation55_spill] sm:$0xff]  ;;  %s6199_s23 = sshll.u32 %s10241_s22, 3  ;;  %v12470_v41 = vld [vmem:[#allocation58_spill] sm:$0xff]  ;;  %s1699_s8 = sadd.s32 1, %s9027_s27  }
 0x371   : >> { %12449 = vst [vmem:[#allocation76_spill] sm:$0xff] %v8859_v55  ;;  %12450 = vst [vmem:[#allocation77_spill] sm:$0xff] %v8863_v27  ;;  %v12468_v2 = vpack.c.bf16 %v12466_v58, %v12467_v3  ;;  %s1754_s3 = scalar_lea.vmem [#allocation2], %s6199_s23  ;;  %v12471_v53 = vld [vmem:[#allocation57_spill] sm:$0xff]  ;;  %v12473_v52 = vld [vmem:[#allocation60_spill] sm:$0xff]  ;;  %s1764_s13 = scalar_lea.vmem [#allocation3], %s6199_s23 }
 0x372   : >> { %12452 = vst [vmem:[#allocation69_spill] sm:$0xff] %v12451_v29  ;;  %12453 = vst [vmem:[#allocation78_spill] sm:$0xff] %v8871_v26  ;;  %6547 = vmatprep.mubr.bf16.mxu0 %v12465_v5  ;;  %v1755_v1 = vld [vmem:[%s1754_s3] sm:$0xff]  ;;  %v1760_v22 = vld [vmem:[%s1754_s3 + $0x48] sm:$0xff]  ;;  %p10670_p10 = scmp.ge.s32.totalorder %s1699_s8, %s1695_s7 }
 0x373   : >> { %12454 = vst [vmem:[#allocation79_spill] sm:$0xff] %v8875_v4  ;;  %12455 = vst [vmem:[#allocation80_spill] sm:$0xff] %v8879_v8  ;;  %6563 = vmatprep.mubr.bf16.mxu1 %v12468_v2  ;;  %v1759_v6 = vld [vmem:[%s1754_s3 + $0x40] sm:$0xff]  ;;  %v1756_v4 = vld [vmem:[%s1754_s3 + $0x8] sm:$0xff]  ;;  %6539 = vmatprep.subr.bf16.mxu0 %v1755_v1 }
 0x374   : >> { %12456 = vst [vmem:[#allocation81_spill] sm:$0xff] %v8883_v9  ;;  %12457 = vst [vmem:[#allocation82_spill] sm:$0xff] %v8887_v12  ;;  %6555 = vmatprep.subr.bf16.mxu1 %v1759_v6  ;;  %6540 = vmatpush3.bf16.xpose.msra.mxu0 %v1755_v1  ;;  %v1757_v5 = vld [vmem:[%s1754_s3 + $0x10] sm:$0xff]  ;;  %v1758_v3 = vld [vmem:[%s1754_s3 + $0x18] sm:$0xff]  ;;  %v12472_v1 = vpack.c.bf16 %v12470_v41, %v12471_v53  ;;  %s1903_s25 = ssub.s32 %s9027_s27, %s12469_s28  ;;  %s12644_s27 = smov %s1699_s8 }
 0x375   : >> { %12458 = vst [vmem:[#allocation83_spill] sm:$0xff] %v8891_v13  ;;  %12459 = vst [vmem:[#allocation84_spill] sm:$0xff] %v8895_v14  ;;  %6556 = vmatpush3.bf16.xpose.msra.mxu1 %v1759_v6  ;;  %6541 = vmatprep.subr.bf16.mxu0 %v1756_v4  ;;  %v1761_v2 = vld [vmem:[%s1754_s3 + $0x50] sm:$0xff]  ;;  %v1762_v56 = vld [vmem:[%s1754_s3 + $0x58] sm:$0xff]  ;;  %s6201_s1 = sshll.u32 %s1903_s25, 6 }
 0x376   : >> { %12460 = vst [vmem:[#allocation85_spill] sm:$0xff] %v8899_v15  ;;  %12461 = vst [vmem:[#allocation86_spill] sm:$0xff] %v8903_v16  ;;  %6557 = vmatprep.subr.bf16.mxu1 %v1760_v22  ;;  %v12474_v42 = vld [vmem:[#allocation59_spill] sm:$0xff]  ;;  %v12476_v49 = vld [vmem:[#allocation62_spill] sm:$0xff] }
 0x377   : >> { %12462 = vst [vmem:[#allocation87_spill] sm:$0xff] %v8907_v17  ;;  %v12475_v6 = vpack.c.bf16 %v12473_v52, %v12474_v42  ;;  %v12477_v45 = vld [vmem:[#allocation61_spill] sm:$0xff]  ;;  %v12479_v37 = vld [vmem:[#allocation64_spill] sm:$0xff]  ;;  %v12480_v47 = vld [vmem:[#allocation63_spill] sm:$0xff] }
 0x378   : >> { %v12482_v51 = vld [vmem:[#allocation66_spill] sm:$0xff]  ;;  %v12483_v50 = vld [vmem:[#allocation65_spill] sm:$0xff]  ;;  %v12485_v59 = vld [vmem:[#allocation68_spill] sm:$0xff] }
 0x379   : >> { %v12486_v33 = vld [vmem:[#allocation67_spill] sm:$0xff] }
 0x37c   : >> { %6542 = vmatpush3.bf16.xpose.msra.mxu0 %v1756_v4  ;;  %v12481_v4 = vpack.c.bf16 %v12479_v37, %v12480_v47 }
 0x37d   : >> { %6558 = vmatpush3.bf16.xpose.msra.mxu1 %v1760_v22  ;;  %6543 = vmatprep.subr.bf16.mxu0 %v1757_v5  ;;  %v12478_v22 = vpack.c.bf16 %v12476_v49, %v12477_v45  ;;  %v12492_v45 = vld [vmem:[#allocation43_spill] sm:$0xff] }
 0x37e   : >> { %6559 = vmatprep.subr.bf16.mxu1 %v1761_v2 }
 0x384   : >> { %6544 = vmatpush3.bf16.xpose.msra.mxu0 %v1757_v5  ;;  %v1905_v5 = vstv %s6201_s1 }
 0x385   : >> { %6560 = vmatpush3.bf16.xpose.msra.mxu1 %v1761_v2  ;;  %6545 = vmatprep.subr.bf16.mxu0 %v1758_v3  ;;  %v12488_v2 = vld [vmem:[#allocation50_spill] sm:$0xff] }
 0x386   : >> { %6561 = vmatprep.subr.bf16.mxu1 %v1762_v56 }
 0x38c   : >> { %6546 = vmatpush3.bf16.xpose.msra.mxu0 %v1758_v3  ;;  %v12484_v3 = vpack.c.bf16 %v12482_v51, %v12483_v50 }
 0x38d   : >> { %6562 = vmatpush3.bf16.xpose.msra.mxu1 %v1762_v56  ;;  %v12487_v56 = vpack.c.bf16 %v12485_v59, %v12486_v33 }
 0x393   : >> { %6548 = vmatmul.mubr.bf16.vlgmr.msra.gmra.mrb[0].mxu0 %v12472_v1  ;;  %v1906_v1 = vadd.s32 %v1905_v5, %v12488_v2 }
 0x394   : >> { %6564 = vmatmul.mubr.bf16.vlgmr.msra.gmra.mrb[0].mxu1 %v12475_v6  ;;  %6551 = vmatprep.mubr.bf16.mxu0 %v12478_v22  ;;  %v12489_v6 = vld [vmem:[#allocation44_spill] sm:$0xff]  ;;  %v12490_v22 = vld [vmem:[#allocation42_spill] sm:$0xff] }
 0x395   : >> { %6567 = vmatprep.mubr.bf16.mxu1 %v12481_v4  ;;  %vm1909_vm0 = vcmp.gt.s32.totalorder %v1906_v1, %v12489_v6  ;;  %vm1907_vm1 = vcmp.gt.s32.totalorder %v1906_v1, %v12490_v22  ;;  %v12491_v4 = vld [vmem:[#allocation45_spill] sm:$0xff]  ;;  %vm1908_vm4 = vcmp.gt.s32.totalorder %v1906_v1, %v12492_v45 }
 0x396   : >> { %vm1910_vm2 = vcmp.gt.s32.totalorder %v1906_v1, %v12491_v4 }
 0x39b   : >> { %6552 = vmatmul.mubr.bf16.gmra.mrb[4].mxu0 %v12484_v3 }
 0x39c   : >> { %6568 = vmatmul.mubr.bf16.gmra.mrb[4].mxu1 %v12487_v56 }
 0x466   : >> { %v6549_v41 = vpop.f32.mrb[0].mxu0 }
 0x467   : >> { %v6565_v37 = vpop.f32.mrb[0].mxu1  ;;  %v10270_v42 = vsel %vm1909_vm0, -1e+30, %v6549_v41  ;;  %v1807_v33 = vpop.f32.mrb[1].mxu0 }
 0x468   : >> { %v10272_v3 = vsel %vm1909_vm0, -1e+30, %v6565_v37  ;;  %v1872_v56 = vpop.f32.mrb[1].mxu1  ;;  %v10275_v47 = vsel %vm1907_vm1, -1e+30, %v1807_v33  ;;  %v6550_v2 = vpop.f32.mrb[2].mxu0 }
 0x469   : >> { %v10277_v5 = vsel %vm1907_vm1, -1e+30, %v1872_v56  ;;  %v6566_v6 = vpop.f32.mrb[2].mxu1  ;;  %v10279_v22 = vsel %vm1910_vm2, -1e+30, %v6550_v2  ;;  %v1954_v41 = vsel %vm1947_vm3, %v10270_v42, -inf }
 0x46a   : >> { %v10281_v49 = vsel %vm1910_vm2, -1e+30, %v6566_v6  ;;  %v1875_v4 = vpop.f32.mrb[3].mxu1  ;;  %1955 = vmax.xlane.f32.xlu0 %v1954_v41  ;;  %v1810_v50 = vpop.f32.mrb[3].mxu0  ;;  %v1972_v45 = vsel %vm1947_vm3, %v10277_v5, -inf  ;;  %v12493_v56 = vld [vmem:[#allocation48_spill] sm:$0xff] }
 0x46b   : >> { %v10285_v37 = vsel %vm1908_vm4, -1e+30, %v1875_v4  ;;  %v10289_v33 = vsel %vm1908_vm4, -1e+30, %v1810_v50  ;;  %1973 = vmax.xlane.f32.xlu1 %v1972_v45  ;;  %vm1913_vm5 = vcmp.gt.s32.totalorder %v1906_v1, %v12493_v56  ;;  %v1978_v2 = vsel %vm1947_vm3, %v10272_v3, -inf  ;;  %v12494_v6 = vld [vmem:[#allocation46_spill] sm:$0xff] }
 0x46c   : >> { %vm1911_vm6 = vcmp.gt.s32.totalorder %v1906_v1, %v12494_v6  ;;  %v1957_v4 = vsel %vm1947_vm3, %v10279_v22, -inf  ;;  %v12495_v41 = vld [vmem:[#allocation49_spill] sm:$0xff]  ;;  %v12496_v45 = vld [vmem:[#allocation47_spill] sm:$0xff]  ;;  %v1948_v29 = vsel %vm1947_vm3, %v10275_v47, -inf  ;;  %v1975_v55 = vsel %vm1947_vm3, %v10285_v37, -inf }
 0x46d   : >> { %vm1914_vm7 = vcmp.gt.s32.totalorder %v1906_v1, %v12495_v41  ;;  %vm1912_vm8 = vcmp.gt.s32.totalorder %v1906_v1, %v12496_v45  ;;  %v1772_v41 = vld [vmem:[%s1764_s13 + $0x58] sm:$0xff] }
 0x46e   : >> { %1979 = vmax.xlane.f32.xlu0 %v1978_v2  ;;  %v6553_v51 = vpop.f32.mrb[4].mxu0 }
 0x46f   : >> { %v6569_v52 = vpop.f32.mrb[4].mxu1  ;;  %1958 = vmax.xlane.f32.xlu1 %v1957_v4  ;;  %v10298_v53 = vsel %vm1913_vm5, -1e+30, %v6553_v51  ;;  %v1823_v50 = vpop.f32.mrb[5].mxu0 }
 0x470   : >> { %v10301_v56 = vsel %vm1913_vm5, -1e+30, %v6569_v52  ;;  %v1888_v58 = vpop.f32.mrb[5].mxu1  ;;  %v10303_v59 = vsel %vm1911_vm6, -1e+30, %v1823_v50  ;;  %v6554_v6 = vpop.f32.mrb[6].mxu0 }
 0x471   : >> { %12497 = vst [vmem:[#allocation88_spill] sm:$0xff] %v10301_v56  ;;  %v10305_v2 = vsel %vm1911_vm6, -1e+30, %v1888_v58  ;;  %v10311_v8 = vsel %vm1914_vm7, -1e+30, %v6554_v6  ;;  %v1826_v51 = vpop.f32.mrb[7].mxu0 }
 0x472   : >> { %v6570_v4 = vpop.f32.mrb[6].mxu1  ;;  %1949 = vmax.xlane.f32.xlu0 %v1948_v29  ;;  %v1981_v52 = vsel %vm1947_vm3, %v10281_v49, -inf  ;;  %v10317_v50 = vsel %vm1912_vm8, -1e+30, %v1826_v51  ;;  %v1951_v29 = vsel %vm1947_vm3, %v10289_v33, -inf  ;;  %v1966_v51 = vsel %vm1947_vm3, %v10298_v53, -inf }
 0x473   : >> { %v10321_v58 = vsel %vm1914_vm7, -1e+30, %v6570_v4  ;;  %v1891_v26 = vpop.f32.mrb[7].mxu1  ;;  %1982 = vmax.xlane.f32.xlu1 %v1981_v52  ;;  %v1969_v4 = vsel %vm1947_vm3, %v10311_v8, -inf  ;;  %v1963_v1 = vsel %vm1947_vm3, %v10317_v50, -inf }
 0x474   : >> { %12498 = vst [vmem:[#allocation89_spill] sm:$0xff] %v10321_v58  ;;  %v10325_v6 = vsel %vm1912_vm8, -1e+30, %v1891_v26  ;;  %v1960_v26 = vsel %vm1947_vm3, %v10303_v59, -inf }
 0x475   : >> { %v1987_v52 = vsel %vm1947_vm3, %v10325_v6, -inf }
 0x476   : >> { %1952 = vmax.xlane.f32.xlu0 %v1951_v29  ;;  %v1990_v29 = vsel %vm1947_vm3, %v10301_v56, -inf }
 0x477   : >> { %1976 = vmax.xlane.f32.xlu1 %v1975_v55  ;;  %v1984_v55 = vsel %vm1947_vm3, %v10305_v2, -inf }
 0x47a   : >> { %1967 = vmax.xlane.f32.xlu0 %v1966_v51  ;;  %v1993_v51 = vsel %vm1947_vm3, %v10321_v58, -inf }
 0x47b   : >> { %1970 = vmax.xlane.f32.xlu1 %v1969_v4  ;;  %v1765_v4 = vld [vmem:[%s1764_s13] sm:$0xff] }
 0x47c   : >> { %6571 = vmatprep.subr.bf16.mxu0 %v1765_v4 }
 0x47d   : >> { %6572 = vmatpush3.bf16.msra.mxu0 %v1765_v4 }
 0x47e   : >> { %1961 = vmax.xlane.f32.xlu0 %v1960_v26  ;;  %v1769_v26 = vld [vmem:[%s1764_s13 + $0x40] sm:$0xff] }
 0x47f   : >> { %1964 = vmax.xlane.f32.xlu1 %v1963_v1  ;;  %6587 = vmatprep.subr.bf16.mxu1 %v1769_v26  ;;  %v1766_v1 = vld [vmem:[%s1764_s13 + $0x8] sm:$0xff] }
 0x480   : >> { %6588 = vmatpush3.bf16.msra.mxu1 %v1769_v26  ;;  %6573 = vmatprep.subr.bf16.mxu0 %v1766_v1 }
 0x481   : >> { %6574 = vmatpush3.bf16.msra.mxu0 %v1766_v1 }
 0x482   : >> { %1985 = vmax.xlane.f32.xlu0 %v1984_v55  ;;  %v1770_v55 = vld [vmem:[%s1764_s13 + $0x48] sm:$0xff] }
 0x483   : >> { %1988 = vmax.xlane.f32.xlu1 %v1987_v52  ;;  %6589 = vmatprep.subr.bf16.mxu1 %v1770_v55  ;;  %v1767_v52 = vld [vmem:[%s1764_s13 + $0x10] sm:$0xff] }
 0x484   : >> { %6590 = vmatpush3.bf16.msra.mxu1 %v1770_v55  ;;  %6575 = vmatprep.subr.bf16.mxu0 %v1767_v52 }
 0x485   : >> { %6576 = vmatpush3.bf16.msra.mxu0 %v1767_v52 }
 0x486   : >> { %1991 = vmax.xlane.f32.xlu0 %v1990_v29  ;;  %v1771_v29 = vld [vmem:[%s1764_s13 + $0x50] sm:$0xff] }
 0x487   : >> { %1994 = vmax.xlane.f32.xlu1 %v1993_v51  ;;  %6591 = vmatprep.subr.bf16.mxu1 %v1771_v29  ;;  %v1768_v51 = vld [vmem:[%s1764_s13 + $0x18] sm:$0xff] }
 0x488   : >> { %6592 = vmatpush3.bf16.msra.mxu1 %v1771_v29  ;;  %6577 = vmatprep.subr.bf16.mxu0 %v1768_v51 }
 0x489   : >> { %6578 = vmatpush3.bf16.msra.mxu0 %v1768_v51  ;;  %6593 = vmatprep.subr.bf16.mxu1 %v1772_v41 }
 0x48c   : >> { %6594 = vmatpush3.bf16.msra.mxu1 %v1772_v41 }
 0x4f7   : >> { %v1956_v4 = vpop.xlane.xlu0 %1955 }
 0x4f8   : >> { %v10350_v26 = vmax.f32 %v9015_v7, %v1956_v4   ;;  %v1974_v0 = vpop.xlane.xlu1 %1973 }
 0x4f9   : >> { %v10353_v1 = vmax.f32 %v8991_v38, %v1974_v0  }
 0x4fa   : >> { %12499 = vst [vmem:[#allocation90_spill] sm:$0xff] %v10350_v26  ;;  %v12500_v45 = vmov %v10350_v26 }
 0x4fb   : >> { %12501 = vst [vmem:[#allocation91_spill] sm:$0xff] %v10353_v1  ;;  %v12502_v58 = vmov %v10353_v1  ;;  %v2062_v52 = vsub.f32 %v10270_v42, %v12500_v45  ;;  %v1980_v51 = vpop.xlane.xlu0 %1979 }
 0x4fc   : >> { %v10362_v41 = vmax.f32 %v8983_v60, %v1980_v51   ;;  %v1959_v4 = vpop.xlane.xlu1 %1958  ;;  %v2068_v51 = vsub.f32 %v10277_v5, %v12502_v58 }
 0x4fd   : >> { %v2080_v13 = vmul.f32 1.442695, %v2062_v52  ;;  %v10365_v26 = vmax.f32 %v9011_v25, %v1959_v4  }
 0x4fe   : >> { %12503 = vst [vmem:[#allocation92_spill] sm:$0xff] %v10362_v41  ;;  %v2070_v1 = vsub.f32 %v10272_v3, %v10362_v41 }
 0x4ff   : >> { %12504 = vst [vmem:[#allocation93_spill] sm:$0xff] %v10365_v26  ;;  %v12505_v56 = vmov %v10365_v26  ;;  %7686 = vpow2.f32 %v2080_v13  ;;  %v1950_v29 = vpop.xlane.xlu0 %1949 }
 0x500   : >> { %v2063_v52 = vsub.f32 %v10279_v22, %v12505_v56  ;;  %v2096_v55 = vmul.f32 1.442695, %v2070_v1  ;;  %v10378_v4 = vmax.f32 %v9023_v32, %v1950_v29   ;;  %v1983_v26 = vpop.xlane.xlu1 %1982  ;;  %v2092_v1 = vmul.f32 1.442695, %v2068_v51 }
 0x501   : >> { %v10381_v27 = vmax.f32 %v8979_v18, %v1983_v26  }
 0x502   : >> { %12506 = vst [vmem:[#allocation94_spill] sm:$0xff] %v10378_v4  ;;  %v12507_v45 = vmov %v10378_v4  ;;  %v2082_v0 = vmul.f32 1.442695, %v2063_v52  ;;  %7688 = vpow2.f32 %v2096_v55 }
 0x503   : >> { %12508 = vst [vmem:[#allocation95_spill] sm:$0xff] %v10381_v27  ;;  %v12509_v3 = vmov %v10381_v27  ;;  %v2060_v42 = vsub.f32 %v10275_v47, %v12507_v45  ;;  %v1953_v29 = vpop.xlane.xlu0 %1952 }
 0x504   : >> { %v2071_v5 = vsub.f32 %v10281_v49, %v12509_v3  ;;  %v10392_v52 = vmax.f32 %v9019_v24, %v1953_v29   ;;  %v1977_v27 = vpop.xlane.xlu1 %1976  ;;  %7690 = vpow2.f32 %v2082_v0 }
 0x505   : >> { %v2076_v4 = vmul.f32 1.442695, %v2060_v42  ;;  %v10395_v13 = vmax.f32 %v8987_v63, %v1977_v27  }
 0x506   : >> { %12510 = vst [vmem:[#allocation96_spill] sm:$0xff] %v10392_v52  ;;  %v2098_v26 = vmul.f32 1.442695, %v2071_v5  ;;  %v2061_v55 = vsub.f32 %v10289_v33, %v10392_v52 }
 0x507   : >> { %12511 = vst [vmem:[#allocation97_spill] sm:$0xff] %v10395_v13  ;;  %v12512_v58 = vmov %v10395_v13  ;;  %7692 = vpow2.f32 %v2076_v4  ;;  %v1968_v51 = vpop.xlane.xlu0 %1967 }
 0x508   : >> { %v2069_v42 = vsub.f32 %v10285_v37, %v12512_v58  ;;  %7694 = vpow2.f32 %v2092_v1  ;;  %v2078_v0 = vmul.f32 1.442695, %v2061_v55  ;;  %v10406_v5 = vmax.f32 %v8999_v61, %v1968_v51   ;;  %v1971_v13 = vpop.xlane.xlu1 %1970 }
 0x509   : >> { %v10408_v29 = vpop.eup %7686  ;;  %7696 = vpow2.f32 %v2098_v26  ;;  %v10411_v33 = vmax.f32 %v8995_v21, %v1971_v13  }
 0x50a   : >> { %12513 = vst [vmem:[#allocation98_spill] sm:$0xff] %v10406_v5  ;;  %v12514_v22 = vmov %v10406_v5  ;;  %v2094_v27 = vmul.f32 1.442695, %v2069_v42  ;;  %v2130_v1 = vsel %vm1947_vm3, %v10408_v29, 0.0  ;;  %7698 = vpow2.f32 %v2078_v0 }
 0x50b   : >> { %12515 = vst [vmem:[#allocation99_spill] sm:$0xff] %v10411_v33  ;;  %v2066_v37 = vsub.f32 %v10298_v53, %v12514_v22  ;;  %2131 = vadd.xlane.f32.xlu0 %v2130_v1  ;;  %v1962_v51 = vpop.xlane.xlu0 %1961  ;;  %v2067_v42 = vsub.f32 %v10311_v8, %v10411_v33 }
 0x50c   : >> { %v10424_v5 = vmax.f32 %v9007_v23, %v1962_v51   ;;  %v1965_v13 = vpop.xlane.xlu1 %1964  ;;  %v10426_v4 = vpop.eup %7688  ;;  %7700 = vpow2.f32 %v2094_v27 }
 0x50d   : >> { %v2088_v26 = vmul.f32 1.442695, %v2066_v37  ;;  %v10429_v53 = vmax.f32 %v9003_v28, %v1965_v13   ;;  %v2154_v37 = vsel %vm1947_vm3, %v10426_v4, 0.0  ;;  %v2090_v13 = vmul.f32 1.442695, %v2067_v42 }
 0x50e   : >> { %12516 = vst [vmem:[#allocation100_spill] sm:$0xff] %v10424_v5  ;;  %v12517_v49 = vmov %v10424_v5  ;;  %v7691_v8 = vpop.eup %7690 }
 0x50f   : >> { %12518 = vst [vmem:[#allocation101_spill] sm:$0xff] %v10429_v53  ;;  %v2064_v1 = vsub.f32 %v10303_v59, %v12517_v49  ;;  %7702 = vpow2.f32 %v2088_v26  ;;  %v2065_v27 = vsub.f32 %v10317_v50, %v10429_v53  ;;  %2155 = vadd.xlane.f32.xlu0 %v2154_v37  ;;  %v1986_v5 = vpop.xlane.xlu0 %1985  ;;  %v2133_v14 = vsel %vm1947_vm3, %v7691_v8, 0.0 }
 0x510   : >> { %v1989_v47 = vpop.xlane.xlu1 %1988  ;;  %v10442_v59 = vmax.f32 %v8975_v44, %v1986_v5   ;;  %2134 = vadd.xlane.f32.xlu1 %v2133_v14  ;;  %v2205_v14 = vpack.c.bf16 %v7691_v8, %v10408_v29  ;;  %v12527_v8 = vld [vmem:[#allocation89_spill] sm:$0xff] }
 0x511   : >> { %v2084_v55 = vmul.f32 1.442695, %v2064_v1  ;;  %v7693_v0 = vpop.eup %7692  ;;  %v2086_v9 = vmul.f32 1.442695, %v2065_v27  ;;  %v10446_v26 = vmax.f32 %v8971_v10, %v1989_v47  }
 0x512   : >> { %12519 = vst [vmem:[#allocation102_spill] sm:$0xff] %v10442_v59  ;;  %v7695_v54 = vpop.eup %7694  ;;  %v2124_v51 = vsel %vm1947_vm3, %v7693_v0, 0.0  ;;  %v2072_v42 = vsub.f32 %v10305_v2, %v10442_v59 }
 0x513   : >> { %12520 = vst [vmem:[#allocation103_spill] sm:$0xff] %v10446_v26  ;;  %v12521_v33 = vmov %v10446_v26  ;;  %v7697_v12 = vpop.eup %7696  ;;  %7704 = vpow2.f32 %v2084_v55  ;;  %2125 = vadd.xlane.f32.xlu0 %v2124_v51  ;;  %v1992_v1 = vpop.xlane.xlu0 %1991  ;;  %v2148_v15 = vsel %vm1947_vm3, %v7695_v54, 0.0 }
 0x514   : >> { %7706 = vpow2.f32 %v2090_v13  ;;  %v2073_v47 = vsub.f32 %v10325_v6, %v12521_v33  ;;  %v1995_v27 = vpop.xlane.xlu1 %1994  ;;  %v7699_v5 = vpop.eup %7698  ;;  %v2100_v55 = vmul.f32 1.442695, %v2072_v42  ;;  %v10458_v26 = vmax.f32 %v8967_v40, %v1992_v1  }
 0x515   : >> { %7708 = vpow2.f32 %v2086_v9  ;;  %v2157_v51 = vsel %vm1947_vm3, %v7697_v12, 0.0  ;;  %v10464_v13 = vmax.f32 %v8963_v11, %v1995_v27   ;;  %v12526_v9 = vld [vmem:[#allocation88_spill] sm:$0xff]  ;;  %v2204_v1 = vpack.c.bf16 %v7699_v5, %v7693_v0 }
 0x516   : >> { %12522 = vst [vmem:[#allocation104_spill] sm:$0xff] %v10458_v26  ;;  %v12523_v50 = vmov %v10458_v26  ;;  %v2102_v2 = vmul.f32 1.442695, %v2073_v47  ;;  %v7701_v17 = vpop.eup %7700  ;;  %2158 = vadd.xlane.f32.xlu1 %v2157_v51  ;;  %7710 = vpow2.f32 %v2100_v55  ;;  %v2127_v27 = vsel %vm1947_vm3, %v7699_v5, 0.0 }
 0x517   : >> { %12524 = vst [vmem:[#allocation105_spill] sm:$0xff] %v10464_v13  ;;  %v12525_v37 = vmov %v10464_v13  ;;  %v2074_v42 = vsub.f32 %v12526_v9, %v12523_v50  ;;  %2149 = vadd.xlane.f32.xlu0 %v2148_v15  ;;  %6579 = vmatprep.mubr.msk.bf16.mxu0 %vm1947_vm3, %v2204_v1  ;;  %v2208_v6 = vpack.c.bf16 %v7701_v17, %v7695_v54  ;;  %v2151_v54 = vsel %vm1947_vm3, %v7701_v17, 0.0 }
 0x518   : >> { %v2075_v47 = vsub.f32 %v12527_v8, %v12525_v37  ;;  %v2209_v16 = vpack.c.bf16 %v7697_v12, %v10426_v4  ;;  %7712 = vpow2.f32 %v2102_v2  ;;  %6580 = vmatmul.mubr.msk.bf16.vlgmr.msra.gmra.mrb[8].mxu0 %vm1947_vm3, %v2205_v14 }
 0x519   : >> { %v7703_v26 = vpop.eup %7702  ;;  %v2104_v13 = vmul.f32 1.442695, %v2074_v42  ;;  %6595 = vmatprep.mubr.msk.bf16.mxu1 %vm1947_vm3, %v2208_v6 }
 0x51a   : >> { %v2106_v51 = vmul.f32 1.442695, %v2075_v47  ;;  %v2142_v15 = vsel %vm1947_vm3, %v7703_v26, 0.0  ;;  %2128 = vadd.xlane.f32.xlu1 %v2127_v27  ;;  %6596 = vmatmul.mubr.msk.bf16.vlgmr.msra.gmra.mrb[8].mxu1 %vm1947_vm3, %v2209_v16 }
 0x51b   : >> { %7714 = vpow2.f32 %v2104_v13  ;;  %2143 = vadd.xlane.f32.xlu0 %v2142_v15 }
 0x51c   : >> { %7716 = vpow2.f32 %v2106_v51  ;;  %v12528_v51 = vld [vmem:[#allocation90_spill] sm:$0xff] }
 0x51d   : >> { %v7705_v0 = vpop.eup %7704  ;;  %v12529_v15 = vsub.f32 %v9015_v7, %v12528_v51  ;;  %v12535_v7 = vsub.f32 %v8979_v18, %v12509_v3  ;;  %v12539_v18 = vsub.f32 %v8987_v63, %v12512_v58 }
 0x51e   : >> { %v7707_v5 = vpop.eup %7706  ;;  %v2136_v12 = vsel %vm1947_vm3, %v7705_v0, 0.0  ;;  %2152 = vadd.xlane.f32.xlu1 %v2151_v54 }
 0x51f   : >> { %v7709_v4 = vpop.eup %7708  ;;  %2137 = vadd.xlane.f32.xlu0 %v2136_v12  ;;  %v2207_v14 = vpack.c.bf16 %v7707_v5, %v7703_v26  ;;  %v2145_v9 = vsel %vm1947_vm3, %v7707_v5, 0.0  ;;  %v12530_v5 = vsub.f32 %v8983_v60, %v10362_v41  ;;  %v12531_v12 = vsub.f32 %v9011_v25, %v12505_v56 }
 0x520   : >> { %v2206_v55 = vpack.c.bf16 %v7709_v4, %v7705_v0  ;;  %v7711_v2 = vpop.eup %7710  ;;  %v2139_v1 = vsel %vm1947_vm3, %v7709_v4, 0.0  ;;  %v2032_v0 = vmul.f32 1.442695, %v12529_v15  ;;  %v2050_v60 = vmul.f32 1.442695, %v12535_v7 }
 0x521   : >> { %v2160_v16 = vsel %vm1947_vm3, %v7711_v2, 0.0  ;;  %v2048_v54 = vmul.f32 1.442695, %v12530_v5  ;;  %v2034_v4 = vmul.f32 1.442695, %v12531_v12  ;;  %v12536_v25 = vsub.f32 %v9019_v24, %v10392_v52 }
 0x522   : >> { %6583 = vmatprep.mubr.msk.bf16.mxu0 %vm1947_vm3, %v2206_v55  ;;  %2146 = vadd.xlane.f32.xlu1 %v2145_v9  ;;  %v7713_v6 = vpop.eup %7712  ;;  %7718 = vpow2.f32 %v2032_v0  ;;  %v12532_v55 = vsub.f32 %v9023_v32, %v12507_v45  ;;  %v12537_v32 = vsub.f32 %v8999_v61, %v12514_v22  ;;  %v12540_v24 = vsub.f32 %v9007_v23, %v12517_v49 }
 0x523   : >> { %6584 = vmatmul.mubr.msk.bf16.gmra.mrb[12].mxu0 %vm1947_vm3, %v2207_v14  ;;  %2161 = vadd.xlane.f32.xlu0 %v2160_v16  ;;  %v2210_v17 = vpack.c.bf16 %v7713_v6, %v7711_v2  ;;  %v2163_v26 = vsel %vm1947_vm3, %v7713_v6, 0.0  ;;  %7720 = vpow2.f32 %v2048_v54  ;;  %v12533_v2 = vld [vmem:[#allocation91_spill] sm:$0xff]  ;;  %v12545_v23 = vsub.f32 %v8975_v44, %v10442_v59 }
 0x524   : >> { %v2028_v14 = vmul.f32 1.442695, %v12532_v55  ;;  %v12534_v9 = vsub.f32 %v8991_v38, %v12533_v2  ;;  %7722 = vpow2.f32 %v2034_v4  ;;  %v2036_v61 = vmul.f32 1.442695, %v12540_v24 }
 0x525   : >> { %v7715_v42 = vpop.eup %7714  ;;  %6599 = vmatprep.mubr.msk.bf16.mxu1 %vm1947_vm3, %v2210_v17  ;;  %v2030_v17 = vmul.f32 1.442695, %v12536_v25  ;;  %v2052_v12 = vmul.f32 1.442695, %v12545_v23 }
 0x526   : >> { %2140 = vadd.xlane.f32.xlu1 %v2139_v1  ;;  %v2166_v8 = vsel %vm1947_vm3, %v7715_v42, 0.0  ;;  %v7717_v47 = vpop.eup %7716  ;;  %v2044_v16 = vmul.f32 1.442695, %v12534_v9  ;;  %7724 = vpow2.f32 %v2028_v14  ;;  %v2040_v1 = vmul.f32 1.442695, %v12537_v32 }
 0x527   : >> { %2167 = vadd.xlane.f32.xlu0 %v2166_v8  ;;  %v2211_v27 = vpack.c.bf16 %v7717_v47, %v7715_v42  ;;  %v2169_v13 = vsel %vm1947_vm3, %v7717_v47, 0.0  ;;  %v12549_v9 = vsub.f32 %v8967_v40, %v12523_v50 }
 0x528   : >> { %7726 = vpow2.f32 %v2044_v16 }
 0x529   : >> { %6600 = vmatmul.mubr.msk.bf16.gmra.mrb[12].mxu1 %vm1947_vm3, %v2211_v27  ;;  %7728 = vpow2.f32 %v2050_v60  ;;  %v2046_v27 = vmul.f32 1.442695, %v12539_v18  ;;  %v2056_v16 = vmul.f32 1.442695, %v12549_v9 }
 0x52a   : >> { %2164 = vadd.xlane.f32.xlu1 %v2163_v26  ;;  %7730 = vpow2.f32 %v2030_v17 }
 0x52b   : >> { %7732 = vpow2.f32 %v2040_v1 }
 0x52c   : >> { %v10511_v6 = vpop.eup %7718  ;;  %7734 = vpow2.f32 %v2046_v27 }
 0x52d   : >> { %v2110_v38 = vmul.f32 %v8951_v31, %v10511_v6  ;;  %v10521_v8 = vpop.eup %7720  ;;  %7736 = vpow2.f32 %v2036_v61 }
 0x52e   : >> { %2170 = vadd.xlane.f32.xlu1 %v2169_v13  ;;  %v10528_v26 = vpop.eup %7722  ;;  %v2118_v13 = vmul.f32 %v8919_v35, %v10521_v8 }
 0x52f   : >> { %v2111_v4 = vmul.f32 %v8947_v57, %v10528_v26 }
 0x530   : >> { %v10535_v15 = vpop.eup %7724 }
 0x531   : >> { %v2108_v55 = vmul.f32 %v8959_v43, %v10535_v15 }
 0x532   : >> { %v10542_v54 = vpop.eup %7726 }
 0x533   : >> { %v10551_v14 = vpop.eup %7728  ;;  %v2116_v25 = vmul.f32 %v8927_v36, %v10542_v54 }
 0x534   : >> { %v2119_v60 = vmul.f32 %v8915_v20, %v10551_v14  ;;  %v7731_v17 = vpop.eup %7730 }
 0x535   : >> { %v2109_v1 = vmul.f32 %v8955_v30, %v7731_v17 }
 0x598   : >> { %v2132_v47 = vpop.xlane.xlu0 %2131 }
 0x599   : >> { %v10523_v31 = vadd.f32 %v2132_v47, %v2110_v38  }
 0x59b   : >> { %12538 = vst [vmem:[#allocation106_spill] sm:$0xff] %v10523_v31  ;;  %v12542_v31 = vld [vmem:[#allocation99_spill] sm:$0xff] }
 0x59c   : >> { %v2156_v0 = vpop.xlane.xlu0 %2155  ;;  %v12543_v7 = vmov %v12542_v31  ;;  %v12544_v63 = vsub.f32 %v8995_v21, %v12542_v31  ;;  %v12548_v21 = vsub.f32 %v9003_v28, %v10429_v53  ;;  %v12552_v28 = vsub.f32 %v8971_v10, %v12521_v33 }
 0x59d   : >> { %v10537_v35 = vadd.f32 %v2156_v0, %v2118_v13  }
 0x59e   : >> { %v2042_v5 = vmul.f32 1.442695, %v12544_v63  ;;  %v2038_v44 = vmul.f32 1.442695, %v12548_v21  ;;  %v2054_v40 = vmul.f32 1.442695, %v12552_v28 }
 0x59f   : >> { %12541 = vst [vmem:[#allocation107_spill] sm:$0xff] %v10537_v35  ;;  %v2135_v35 = vpop.xlane.xlu1 %2134 }
 0x5a0   : >> { %v2126_v2 = vpop.xlane.xlu0 %2125  ;;  %v10553_v57 = vadd.f32 %v2135_v35, %v2111_v4   ;;  %7738 = vpow2.f32 %v2042_v5 }
 0x5a1   : >> { %v10555_v43 = vadd.f32 %v2126_v2, %v2108_v55   ;;  %7740 = vpow2.f32 %v2052_v12  ;;  %v12560_v2 = vld [vmem:[#allocation86_spill] sm:$0xff] }
 0x5a2   : >> { %12546 = vst [vmem:[#allocation108_spill] sm:$0xff] %v10553_v57  ;;  %7742 = vpow2.f32 %v2038_v44  ;;  %v12563_v44 = vld [vmem:[#allocation87_spill] sm:$0xff] }
 0x5a3   : >> { %12547 = vst [vmem:[#allocation109_spill] sm:$0xff] %v10555_v43  ;;  %v2159_v57 = vpop.xlane.xlu1 %2158  ;;  %v10567_v43 = vpop.eup %7732  ;;  %7744 = vpow2.f32 %v2056_v16 }
 0x5a4   : >> { %v2150_v32 = vpop.xlane.xlu0 %2149  ;;  %v10569_v20 = vadd.f32 %v2159_v57, %v2119_v60   ;;  %v7735_v38 = vpop.eup %7734  ;;  %v2114_v27 = vmul.f32 %v8935_v48, %v10567_v43  ;;  %7746 = vpow2.f32 %v2054_v40  ;;  %v12567_v40 = vld [vmem:[#allocation82_spill] sm:$0xff] }
 0x5a5   : >> { %v10571_v36 = vadd.f32 %v2150_v32, %v2116_v25   ;;  %v10579_v24 = vpop.eup %7736  ;;  %v2117_v10 = vmul.f32 %v8923_v46, %v7735_v38 }
 0x5a6   : >> { %12550 = vst [vmem:[#allocation110_spill] sm:$0xff] %v10569_v20  ;;  %v2112_v31 = vmul.f32 %v8943_v62, %v10579_v24 }
 0x5a7   : >> { %12551 = vst [vmem:[#allocation111_spill] sm:$0xff] %v10571_v36  ;;  %v2129_v18 = vpop.xlane.xlu1 %2128  ;;  %v12554_v36 = vsub.f32 %v8963_v11, %v12525_v37 }
 0x5a8   : >> { %v10581_v30 = vadd.f32 %v2129_v18, %v2109_v1   ;;  %v2144_v20 = vpop.xlane.xlu0 %2143  ;;  %v2190_v1 = vmul.f32 %v12567_v40, %v10511_v6 }
 0x5a9   : >> { %v2058_v61 = vmul.f32 1.442695, %v12554_v36  ;;  %v10586_v48 = vadd.f32 %v2144_v20, %v2114_v27   ;;  %v12570_v36 = vld [vmem:[#allocation75_spill] sm:$0xff] }
 0x5aa   : >> { %12553 = vst [vmem:[#allocation112_spill] sm:$0xff] %v10581_v30  ;;  %v7739_v13 = vpop.eup %7738 }
 0x5ab   : >> { %12555 = vst [vmem:[#allocation113_spill] sm:$0xff] %v10586_v48  ;;  %v2153_v0 = vpop.xlane.xlu1 %2152  ;;  %v10591_v63 = vpop.eup %7740  ;;  %7748 = vpow2.f32 %v2058_v61  ;;  %v2115_v11 = vmul.f32 %v8931_v39, %v7739_v13  ;;  %v2198_v61 = vmul.f32 %v12570_v36, %v10521_v8  ;;  %v12577_v8 = vld [vmem:[#allocation74_spill] sm:$0xff] }
 0x5ac   : >> { %v10593_v46 = vadd.f32 %v2153_v0, %v2117_v10   ;;  %v2138_v30 = vpop.xlane.xlu0 %2137  ;;  %v7743_v5 = vpop.eup %7742  ;;  %v2120_v48 = vmul.f32 %v8911_v19, %v10591_v63  ;;  %v12571_v10 = vld [vmem:[#allocation81_spill] sm:$0xff] }
 0x5ad   : >> { %v10595_v62 = vadd.f32 %v2138_v30, %v2112_v31   ;;  %v7745_v12 = vpop.eup %7744  ;;  %v2113_v55 = vmul.f32 %v8939_v34, %v7743_v5  ;;  %v2191_v0 = vmul.f32 %v12571_v10, %v10528_v26 }
 0x5ae   : >> { %12556 = vst [vmem:[#allocation114_spill] sm:$0xff] %v10593_v46  ;;  %v7747_v46 = vpop.eup %7746  ;;  %v2122_v21 = vmul.f32 %v12560_v2, %v7745_v12 }
 0x5af   : >> { %12557 = vst [vmem:[#allocation115_spill] sm:$0xff] %v10595_v62  ;;  %v2147_v23 = vpop.xlane.xlu1 %2146  ;;  %v2121_v9 = vmul.f32 %v12563_v44, %v7747_v46 }
 0x5b0   : >> { %v10600_v39 = vadd.f32 %v2147_v23, %v2115_v11   ;;  %v2162_v4 = vpop.xlane.xlu0 %2161  ;;  %v12573_v23 = vld [vmem:[#allocation77_spill] sm:$0xff] }
 0x5b1   : >> { %v10602_v19 = vadd.f32 %v2162_v4, %v2120_v48   ;;  %v2196_v6 = vmul.f32 %v12573_v23, %v10542_v54  ;;  %v12574_v48 = vld [vmem:[#allocation83_spill] sm:$0xff]  ;;  %v12639_v23 = vld [vmem:[#allocation100_spill] sm:$0xff] }
 0x5b2   : >> { %12558 = vst [vmem:[#allocation116_spill] sm:$0xff] %v10600_v39  ;;  %v12565_v39 = vld [vmem:[#allocation85_spill] sm:$0xff]  ;;  %v2189_v4 = vmul.f32 %v12574_v48, %v7731_v17  ;;  %v12621_v48 = vld [vmem:[#allocation113_spill] sm:$0xff] }
 0x5b3   : >> { %12559 = vst [vmem:[#allocation117_spill] sm:$0xff] %v10602_v19  ;;  %v2141_v35 = vpop.xlane.xlu1 %2140 }
 0x5b4   : >> { %v10606_v34 = vadd.f32 %v2141_v35, %v2113_v55   ;;  %v2168_v62 = vpop.xlane.xlu0 %2167  ;;  %v2199_v35 = vmul.f32 %v12577_v8, %v10551_v14 }
 0x5b5   : >> { %v10608_v16 = vadd.f32 %v2168_v62, %v2122_v21   ;;  %v7749_v60 = vpop.eup %7748  ;;  %v12580_v21 = vld [vmem:[#allocation76_spill] sm:$0xff] }
 0x5b6   : >> { %12561 = vst [vmem:[#allocation118_spill] sm:$0xff] %v10606_v34  ;;  %v2123_v32 = vmul.f32 %v12565_v39, %v7749_v60  ;;  %v12568_v34 = vld [vmem:[#allocation84_spill] sm:$0xff]  ;;  %v2197_v62 = vmul.f32 %v12580_v21, %v7735_v38  ;;  %v12586_v39 = vld [vmem:[#allocation69_spill] sm:$0xff]  ;;  %v12636_v21 = vmov %v12543_v7 }
 0x5b7   : >> { %12562 = vst [vmem:[#allocation119_spill] sm:$0xff] %v10608_v16  ;;  %v2165_v25 = vpop.xlane.xlu1 %2164  ;;  %v2188_v27 = vmul.f32 %v12568_v34, %v10535_v15  ;;  %v12641_v7 = vld [vmem:[#allocation90_spill] sm:$0xff] }
 0x5b8   : >> { %v10611_v57 = vadd.f32 %v2165_v25, %v2121_v9   ;;  %v12584_v25 = vld [vmem:[#allocation80_spill] sm:$0xff] }
 0x5ba   : >> { %12564 = vst [vmem:[#allocation120_spill] sm:$0xff] %v10611_v57  ;;  %v2192_v57 = vmul.f32 %v12584_v25, %v10579_v24  ;;  %v12592_v24 = vld [vmem:[#allocation73_spill] sm:$0xff]  ;;  %v12640_v25 = vld [vmem:[#allocation93_spill] sm:$0xff] }
 0x5bb   : >> { %v2171_v19 = vpop.xlane.xlu1 %2170 }
 0x5bc   : >> { %v10614_v28 = vadd.f32 %v2171_v19, %v2123_v32   ;;  %v2195_v32 = vmul.f32 %v12586_v39, %v7739_v13  ;;  %v12588_v19 = vld [vmem:[#allocation79_spill] sm:$0xff]  ;;  %v12620_v39 = vld [vmem:[#allocation116_spill] sm:$0xff] }
 0x5be   : >> { %v12566_v50 = vmov %v10614_v28  ;;  %v2193_v28 = vmul.f32 %v12588_v19, %v7743_v5  ;;  %v12615_v19 = vld [vmem:[#allocation117_spill] sm:$0xff]  ;;  %v12662_v21 = vld [vmem:[#allocation119_spill] sm:$0xff] (%p10670_p10) }
 0x5bf   : > { %v12667_v19 = vld [vmem:[#allocation114_spill] sm:$0xff] (%p10670_p10) }
 0x5eb   : >> { %v6581_v18 = vpop.f32.mrb[8].mxu0 }
 0x5ec   : >> { %v10620_v20 = vadd.f32 %v6581_v18, %v2190_v1   ;;  %v2258_v16 = vpop.f32.mrb[9].mxu0  ;;  %v12591_v1 = vld [vmem:[#allocation71_spill] sm:$0xff] }
 0x5ed   : >> { %v10626_v31 = vadd.f32 %v2258_v16, %v2188_v27   ;;  %v6597_v30 = vpop.f32.mrb[8].mxu1  ;;  %v6582_v11 = vpop.f32.mrb[10].mxu0  ;;  %v2202_v18 = vmul.f32 %v12591_v1, %v7745_v12  ;;  %v12593_v16 = vld [vmem:[#allocation70_spill] sm:$0xff] }
 0x5ee   : >> { %v12569_v37 = vmov %v10620_v20  ;;  %v10631_v54 = vadd.f32 %v6597_v30, %v2198_v61   ;;  %v10633_v9 = vadd.f32 %v6582_v11, %v2191_v0   ;;  %v2335_v15 = vpop.f32.mrb[9].mxu1  ;;  %v2261_v55 = vpop.f32.mrb[11].mxu0  ;;  %v2203_v13 = vmul.f32 %v12593_v16, %v7749_v60  ;;  %v12594_v61 = vld [vmem:[#allocation72_spill] sm:$0xff]  ;;  %v12626_v30 = vld [vmem:[#allocation112_spill] sm:$0xff]  ;;  %v12628_v11 = vld [vmem:[#allocation105_spill] sm:$0xff] }
 0x5ef   : >> { %v12572_v52 = vmov %v10626_v31  ;;  %v10637_v27 = vadd.f32 %v2335_v15, %v2196_v6   ;;  %v10639_v26 = vadd.f32 %v2261_v55, %v2189_v4   ;;  %v6598_v2 = vpop.f32.mrb[10].mxu1  ;;  %v2201_v10 = vmul.f32 %v12594_v61, %v7747_v46  ;;  %v12613_v16 = vld [vmem:[#allocation119_spill] sm:$0xff]  ;;  %v12618_v46 = vld [vmem:[#allocation114_spill] sm:$0xff]  ;;  %v12633_v60 = vld [vmem:[#allocation92_spill] sm:$0xff] }
 0x5f0   : >> { %v12575_v49 = vmov %v10631_v54  ;;  %v12576_v29 = vmov %v10633_v9  ;;  %v10642_v0 = vadd.f32 %v6598_v2, %v2199_v35   ;;  %v2338_v44 = vpop.f32.mrb[11].mxu1  ;;  %v12583_v54 = vld [vmem:[#allocation78_spill] sm:$0xff]  ;;  %v12609_v12 = vmov %v12569_v37  ;;  %v12617_v35 = vld [vmem:[#allocation107_spill] sm:$0xff]  ;;  %v12625_v31 = vld [vmem:[#allocation106_spill] sm:$0xff] }
 0x5f1   : >> { %v12578_v45 = vmov %v10637_v27  ;;  %v12579_v42 = vmov %v10639_v26  ;;  %v10644_v55 = vadd.f32 %v2338_v44, %v2197_v62   ;;  %v2194_v17 = vmul.f32 %v12583_v54, %v10567_v43  ;;  %v12623_v62 = vld [vmem:[#allocation115_spill] sm:$0xff]  ;;  %v12631_v44 = vld [vmem:[#allocation102_spill] sm:$0xff]  ;;  %v12664_v46 = vld [vmem:[#allocation117_spill] sm:$0xff] (%p10670_p10) }
 0x5f2   : >> { %v12581_v3 = vmov %v10642_v0  ;;  %v2200_v27 = vmul.f32 %v12592_v24, %v10591_v63  ;;  %v12601_v54 = vmov %v12575_v49  ;;  %v12612_v15 = vmov %v12566_v50  ;;  %v12634_v63 = vld [vmem:[#allocation97_spill] sm:$0xff]  ;;  %v12637_v61 = vld [vmem:[#allocation98_spill] sm:$0xff]  ;;  %v12642_v24 = vld [vmem:[#allocation96_spill] sm:$0xff] }
 0x5f3   : >> { %v12582_v53 = vmov %v10644_v55  ;;  %v12600_v0 = vmov %v12581_v3  ;;  %v12649_v62 = vmov (%p10670_p10), %v12581_v3  ;;  %v12652_v30 = vmov (%p10670_p10), %v12578_v45  ;;  %v12663_v61 = vld [vmem:[#allocation120_spill] sm:$0xff] (%p10670_p10)  ;;  %v12665_v35 = vld [vmem:[#allocation110_spill] sm:$0xff] (%p10670_p10)  ;;  %v12670_v15 = vld [vmem:[#allocation113_spill] sm:$0xff] (%p10670_p10) }
 0x5f4   : >> { %v12602_v55 = vmov %v12582_v53  ;;  %v12651_v31 = vmov (%p10670_p10), %v12582_v53  ;;  %v12657_v44 = vmov (%p10670_p10), %v12576_v29  ;;  %v12659_v60 = vmov (%p10670_p10), %v12579_v42  ;;  %v12669_v16 = vld [vmem:[#allocation116_spill] sm:$0xff] (%p10670_p10) }
 0x5f5   : > { %v12660_v63 = vmov (%p10670_p10), %v12572_v52  ;;  %v12673_v12 = vld [vmem:[#allocation108_spill] sm:$0xff] (%p10670_p10) }
 0x5f6   : >> { %v6585_v9 = vpop.f32.mrb[12].mxu0 }
 0x5f7   : >> { %v10650_v26 = vadd.f32 %v6585_v9, %v2194_v17   ;;  %v2274_v14 = vpop.f32.mrb[13].mxu0  ;;  %v12608_v9 = vmov %v12576_v29  ;;  %v12614_v17 = vld [vmem:[#allocation120_spill] sm:$0xff] }
 0x5f8   : >> { %v10653_v8 = vadd.f32 %v2274_v14, %v2192_v57   ;;  %v6586_v38 = vpop.f32.mrb[14].mxu0  ;;  %v12611_v14 = vmov %v12572_v52  ;;  %v12624_v57 = vld [vmem:[#allocation108_spill] sm:$0xff]  ;;  %v12668_v17 = vld [vmem:[#allocation111_spill] sm:$0xff] (%p10670_p10)  ;;  %v12674_v9 = vld [vmem:[#allocation106_spill] sm:$0xff] (%p10670_p10) }
 0x5f9   : >> { %v12585_v58 = vmov %v10650_v26  ;;  %v10656_v43 = vadd.f32 %v6586_v38, %v2195_v32   ;;  %v2277_v40 = vpop.f32.mrb[15].mxu0  ;;  %v12635_v38 = vld [vmem:[#allocation91_spill] sm:$0xff]  ;;  %v12643_v32 = vld [vmem:[#allocation94_spill] sm:$0xff]  ;;  %v12650_v57 = vmov (%p10670_p10), %v12575_v49  ;;  %v12671_v14 = vld [vmem:[#allocation118_spill] sm:$0xff] (%p10670_p10) }
 0x5fa   : >> { %v12587_v56 = vmov %v10653_v8  ;;  %v10658_v4 = vadd.f32 %v2277_v40, %v2193_v28   ;;  %v12605_v26 = vmov %v12585_v58  ;;  %v12629_v40 = vld [vmem:[#allocation104_spill] sm:$0xff]  ;;  %v12638_v28 = vld [vmem:[#allocation101_spill] sm:$0xff]  ;;  %v12654_v11 = vmov (%p10670_p10), %v12585_v58 }
 0x5fb   : >> { %v12589_v22 = vmov %v10656_v43  ;;  %v12607_v8 = vmov %v12587_v56  ;;  %v12627_v43 = vld [vmem:[#allocation109_spill] sm:$0xff]  ;;  %v12661_v38 = vmov (%p10670_p10), %v12566_v50 }
 0x5fc   : >> { %v12590_v47 = vmov %v10658_v4  ;;  %v6601_v34 = vpop.f32.mrb[12].mxu1  ;;  %12604 = vst [vmem:[#allocation69_spill] sm:$0xff] %v12589_v22  ;;  %v12653_v43 = vmov (%p10670_p10), %v12589_v22  ;;  %v12675_v8 = vld [vmem:[#allocation112_spill] sm:$0xff] (%p10670_p10) }
 0x5fd   : >> { %v2380_v51 = vadd.f32 %v6601_v34, %v2202_v18   ;;  %v2351_v20 = vpop.f32.mrb[13].mxu1  ;;  %v12606_v4 = vmov %v12590_v47  ;;  %v12622_v34 = vld [vmem:[#allocation118_spill] sm:$0xff]  ;;  %v12632_v18 = vld [vmem:[#allocation95_spill] sm:$0xff]  ;;  %v12655_v40 = vmov (%p10670_p10), %v12590_v47 }
 0x5fe   : >> { %v2378_v41 = vadd.f32 %v2351_v20, %v2200_v27   ;;  %v6602_v36 = vpop.f32.mrb[14].mxu1  ;;  %v12603_v27 = vmov %v12578_v45  ;;  %v12616_v20 = vld [vmem:[#allocation110_spill] sm:$0xff]  ;;  %v12658_v18 = vmov (%p10670_p10), %v12569_v37  ;;  %v12676_v4 = vld [vmem:[#allocation109_spill] sm:$0xff] (%p10670_p10) }
 0x5ff   : >> { %v2381_v33 = vadd.f32 %v6602_v36, %v2203_v13   ;;  %v2354_v5 = vpop.f32.mrb[15].mxu1  ;;  %v12597_v6 = vmov %v2380_v51  ;;  %v12610_v13 = vmov %v12579_v42  ;;  %v12619_v36 = vld [vmem:[#allocation111_spill] sm:$0xff]  ;;  %v12646_v39 = vmov (%p10670_p10), %v2380_v51 }
 0x600   : >> { %v2379_v59 = vadd.f32 %v2354_v5, %v2201_v10   ;;  %v12599_v1 = vmov %v2378_v41  ;;  %v12630_v10 = vld [vmem:[#allocation103_spill] sm:$0xff]  ;;  %v12648_v34 = vmov (%p10670_p10), %v2378_v41 }
 0x601   : >> { %v12596_v2 = vmov %v2381_v33  ;;  %1701 = sbr.rel (!%p10670_p10) target bundleno = 878 (0x36e), region = 159  ;;  %v12645_v36 = vmov (%p10670_p10), %v2381_v33  ;;  %v12656_v10 = vmov (%p10670_p10), %v12587_v56  ;;  %v12666_v20 = vld [vmem:[#allocation107_spill] sm:$0xff] (%p10670_p10) }
 0x602   : >> { %v12598_v5 = vmov %v2379_v59  ;;  %v12647_v48 = vmov (%p10670_p10), %v2379_v59  ;;  %v12672_v13 = vld [vmem:[#allocation115_spill] sm:$0xff] (%p10670_p10) }
 0x608 PF: > { %v7750_v45 = vld [vmem:[#allocation14 + $0x4] ss:$8 sps:$4 sm:$0xff]   ;;  %7990 = vrcp.f32 %v9123_v17  ;;  %v7752_v56 = vld [vmem:[#allocation14] ss:$8 sps:$4 sm:$0xff]   ;;  %v7753_v58 = vld [vmem:[#allocation14 + $0x14] ss:$8 sps:$4 sm:$0xff]   ;;  %v9155_v4 = vphi %v9985_v4, %v12676_v4   ;;  %v9151_v8 = vphi %v9983_v8, %v12675_v8   ;;  %v9147_v9 = vphi %v9981_v9, %v12674_v9   ;;  %v9143_v12 = vphi %v9979_v12, %v12673_v12   ;;  %v9139_v13 = vphi %v9977_v13, %v12672_v13   ;;  %v9135_v14 = vphi %v9975_v14, %v12671_v14   ;;  %v9131_v15 = vphi %v9973_v15, %v12670_v15   ;;  %v9127_v16 = vphi %v9971_v16, %v12669_v16   ;;  %v9123_v17 = vphi %v9969_v17, %v12668_v17   ;;  %v9119_v19 = vphi %v9967_v19, %v12667_v19   ;;  %v9115_v20 = vphi %v9965_v20, %v12666_v20   ;;  %v9111_v35 = vphi %v9963_v35, %v12665_v35   ;;  %v9107_v46 = vphi %v9961_v46, %v12664_v46   ;;  %v9103_v61 = vphi %v9959_v61, %v12663_v61   ;;  %v9099_v21 = vphi %v9957_v21, %v12662_v21   ;;  %v9095_v38 = vphi %v9955_v38, %v12661_v38   ;;  %v9091_v63 = vphi %v9953_v63, %v12660_v63   ;;  %v9087_v60 = vphi %v9951_v60, %v12659_v60   ;;  %v9083_v18 = vphi %v9949_v18, %v12658_v18   ;;  %v9079_v44 = vphi %v9947_v44, %v12657_v44   ;;  %v9075_v10 = vphi %v9945_v10, %v12656_v10   ;;  %v9071_v40 = vphi %v9943_v40, %v12655_v40   ;;  %v9067_v11 = vphi %v9941_v11, %v12654_v11   ;;  %v9063_v43 = vphi %v9939_v43, %v12653_v43   ;;  %v9059_v30 = vphi %v9937_v30, %v12652_v30   ;;  %v9055_v31 = vphi %v9935_v31, %v12651_v31   ;;  %v9051_v57 = vphi %v9933_v57, %v12650_v57   ;;  %v9047_v62 = vphi %v9931_v62, %v12649_v62   ;;  %v9043_v34 = vphi %v9929_v34, %v12648_v34   ;;  %v9039_v48 = vphi %v9927_v48, %v12647_v48   ;;  %v9035_v39 = vphi %v9925_v39, %v12646_v39   ;;  %v9031_v36 = vphi %v9923_v36, %v12645_v36  }
 0x609   : > { %7992 = vrcp.f32 %v9119_v19  ;;  %2642 = vmatprep.subr.bf16.mxu0 %v7750_v45  ;;  %v7755_v41 = vld [vmem:[#allocation14 + $0x10] ss:$8 sps:$4 sm:$0xff]   ;;  %v7756_v3 = vld [vmem:[#allocation14 + $0x24] ss:$8 sps:$4 sm:$0xff]   ;;  %v7758_v22 = vld [vmem:[#allocation14 + $0x20] ss:$8 sps:$4 sm:$0xff]  }
 0x60a   : > { %2643 = vmatpush1.bf16.msra.mxu0 %v7752_v56  ;;  %v7759_v52 = vld [vmem:[#allocation14 + $0x34] ss:$8 sps:$4 sm:$0xff]   ;;  %v7761_v53 = vld [vmem:[#allocation14 + $0x30] ss:$8 sps:$4 sm:$0xff]   ;;  %v7762_v50 = vld [vmem:[#allocation14 + $0x44] ss:$8 sps:$4 sm:$0xff]   ;;  %7994 = vrcp.f32 %v9155_v4 }
 0x60b   : > { %2644 = vmatprep.subr.bf16.mxu0 %v7753_v58  ;;  %v7764_v51 = vld [vmem:[#allocation14 + $0x40] ss:$8 sps:$4 sm:$0xff]   ;;  %v7765_v42 = vld [vmem:[#allocation14 + $0x54] ss:$8 sps:$4 sm:$0xff]   ;;  %v7767_v47 = vld [vmem:[#allocation14 + $0x50] ss:$8 sps:$4 sm:$0xff]   ;;  %7996 = vrcp.f32 %v9151_v8 }
 0x60c   : > { %v7768_v7 = vld [vmem:[#allocation14 + $0x64] ss:$8 sps:$4 sm:$0xff]   ;;  %v7770_v0 = vld [vmem:[#allocation14 + $0x60] ss:$8 sps:$4 sm:$0xff]   ;;  %v7771_v23 = vld [vmem:[#allocation14 + $0x74] ss:$8 sps:$4 sm:$0xff]   ;;  %7998 = vrcp.f32 %v9115_v20 }
 0x60d   : > { %v7773_v6 = vld [vmem:[#allocation14 + $0x70] ss:$8 sps:$4 sm:$0xff]   ;;  %v7774_v55 = vld [vmem:[#allocation14 + $0x84] ss:$8 sps:$4 sm:$0xff]   ;;  %v7782_v54 = vld [vmem:[#allocation14 + $0xa0] ss:$8 sps:$4 sm:$0xff]   ;;  %8000 = vrcp.f32 %v9111_v35 }
 0x60e   : > { %2645 = vmatpush1.bf16.msra.mxu0 %v7755_v41  ;;  %v7779_v26 = vld [vmem:[#allocation14 + $0x90] ss:$8 sps:$4 sm:$0xff]   ;;  %v7780_v2 = vld [vmem:[#allocation14 + $0xa4] ss:$8 sps:$4 sm:$0xff]   ;;  %v7783_v17 = vld [vmem:[#allocation14 + $0xb4] ss:$8 sps:$4 sm:$0xff]   ;;  %8002 = vrcp.f32 %v9147_v9 }
 0x60f   : > { %2646 = vmatprep.subr.bf16.mxu0 %v7756_v3  ;;  %v7785_v25 = vld [vmem:[#allocation14 + $0xb0] ss:$8 sps:$4 sm:$0xff]   ;;  %v7786_v32 = vld [vmem:[#allocation14 + $0xc4] ss:$8 sps:$4 sm:$0xff]   ;;  %v7788_v19 = vld [vmem:[#allocation14 + $0xc0] ss:$8 sps:$4 sm:$0xff]   ;;  %8004 = vrcp.f32 %v9143_v12 }
 0x610   : > { %v7789_v28 = vld [vmem:[#allocation14 + $0xd4] ss:$8 sps:$4 sm:$0xff]   ;;  %v7791_v1 = vld [vmem:[#allocation14 + $0xd0] ss:$8 sps:$4 sm:$0xff]   ;;  %v7792_v24 = vld [vmem:[#allocation14 + $0xe4] ss:$8 sps:$4 sm:$0xff]   ;;  %8006 = vrcp.f32 %v9107_v46 }
 0x611   : > { %v7794_v4 = vld [vmem:[#allocation14 + $0xe0] ss:$8 sps:$4 sm:$0xff]   ;;  %v7795_v5 = vld [vmem:[#allocation14 + $0xf4] ss:$8 sps:$4 sm:$0xff]   ;;  %8008 = vrcp.f32 %v9103_v61  ;;  %v7797_v45 = vld [vmem:[#allocation14 + $0xf0] ss:$8 sps:$4 sm:$0xff]  }
 0x612   : > { %v7991_v49 = vpop.eup %7990  ;;  %2647 = vmatpush1.bf16.msra.mxu0 %v7758_v22  ;;  %8010 = vrcp.f32 %v9139_v13  ;;  %s12677_s6 = sld [smem:[#allocation127_spill]]  ;;  %s12712_s4 = sld [smem:[#allocation128_spill]] }
 0x613   : > { %v7993_v33 = vpop.eup %7992  ;;  %v2406_v59 = vmul.f32 %v9059_v30, %v7991_v49  ;;  %2648 = vmatprep.subr.bf16.mxu0 %v7759_v52  ;;  %v7776_v30 = vld [vmem:[#allocation14 + $0x80] ss:$8 sps:$4 sm:$0xff]   ;;  %8012 = vrcp.f32 %v9135_v14  ;;  %s12713_s3 = sld [smem:[#allocation129_spill]]  ;;  %s12715_s1 = sld [smem:[#allocation130_spill]] }
 0x614   : > { %v2407_v37 = vmul.f32 %v9055_v31, %v7993_v33  ;;  %v7777_v31 = vld [vmem:[#allocation14 + $0x94] ss:$8 sps:$4 sm:$0xff]   ;;  %v7995_v27 = vpop.eup %7994  ;;  %8014 = vrcp.f32 %v9099_v21  ;;  %s12736_s16 = sld [smem:[#allocation131_spill]]  ;;  %s12748_s9 = sld [smem:[#allocation25_spill]] }
 0x615   : > { %v7997_v8 = vpop.eup %7996  ;;  %v2398_v56 = vmul.f32 %v9091_v63, %v7995_v27  ;;  %8016 = vrcp.f32 %v9095_v38  ;;  %s5754_s23 = sshll.u32 %s9915_s21, 4  ;;  %s12757_s13 = sld [smem:[#allocation132_spill]]  ;;  %s12182_s23 = int_to_ptr.vmem [resolvable:$true] %s5754_s23 }
 0x616   : > { %v2422_v29 = vpack.c.bf16 %v2407_v37, %v2406_v59  ;;  %2649 = vmatpush1.bf16.msra.mxu0 %v7761_v53  ;;  %v7999_v20 = vpop.eup %7998  ;;  %v2399_v9 = vmul.f32 %v9087_v60, %v7997_v8  ;;  %8018 = vrcp.f32 %v9131_v15  ;;  %v12688_v8 = vld [vmem:[#allocation28_spill] sm:$0xff]  ;;  %s5738_s14 = scalar_lea.sflag [#allocation8], %s9546_s11  ;;  %s8397_s7 = scalar_lea.vmem %s12182_s23, 2048 }
 0x617   : > { %2650 = vmatprep.subr.bf16.mxu0 %v7762_v50  ;;  %v8001_v35 = vpop.eup %8000  ;;  %v2408_v12 = vmul.f32 %v9051_v57, %v7999_v20  ;;  %8020 = vrcp.f32 %v9127_v16  ;;  %p8398_p7 = scmp.ne.s32.totalorder %s12182_s23, %s8397_s7  ;;  %p12758_p5 = scmp.ne.s32.totalorder %s12389_s5, 0 }
 0x618   : > { %2674 = vmatprep.mubr.bf16.mxu0 %v2422_v29  ;;  %v2409_v58 = vmul.f32 %v9047_v62, %v8001_v35  ;;  %v8003_v46 = vpop.eup %8002  ;;  %v2414_v41 = vpack.c.bf16 %v2399_v9, %v2398_v56 }
 0x619   : > { %v8005_v61 = vpop.eup %8004  ;;  %v2400_v57 = vmul.f32 %v9083_v18, %v8003_v46  ;;  %v12694_v46 = vld [vmem:[#allocation33_spill] sm:$0xff]  ;;  %p8399_p6 = pnand %p8398_p7, %p12758_p5 }
 0x61a   : > { %2651 = vmatpush1.bf16.msra.mxu0 %v7764_v51  ;;  %v8007_v63 = vpop.eup %8006  ;;  %v2423_v60 = vpack.c.bf16 %v2409_v58, %v2408_v12  ;;  %v2401_v62 = vmul.f32 %v9079_v44, %v8005_v61  ;;  %v12679_v51 = vld [vmem:[#allocation51_spill] sm:$0xff]  ;;  %v12692_v12 = vld [vmem:[#allocation32_spill] sm:$0xff] }
 0x61b   : > { %2652 = vmatprep.subr.bf16.mxu0 %v7765_v42  ;;  %v8009_v3 = vpop.eup %8008  ;;  %v2410_v13 = vmul.f32 %v9043_v34, %v8007_v63  ;;  %p8400_p8 = pneg %p8399_p6 }
 0x61c   : > { %v2411_v14 = vmul.f32 %v9039_v48, %v8009_v3  ;;  %v8011_v21 = vpop.eup %8010  ;;  %v2415_v22 = vpack.c.bf16 %v2401_v62, %v2400_v57 }
 0x61d   : > { %v8013_v38 = vpop.eup %8012  ;;  %v2402_v18 = vmul.f32 %v9075_v10, %v8011_v21  ;;  %v12678_v10 = vld [vmem:[#allocation52_spill] sm:$0xff] }
 0x61e   : > { %2653 = vmatpush1.bf16.msra.mxu0 %v7767_v47  ;;  %v8015_v52 = vpop.eup %8014  ;;  %v2424_v49 = vpack.c.bf16 %v2411_v14, %v2410_v13  ;;  %v2403_v44 = vmul.f32 %v9071_v40, %v8013_v38  ;;  %v2470_v40 = vld [vmem:[%s12677_s6] sm:$0x3]  ;;  %s12747_s6 = sld [smem:[#allocation24_spill]] }
 0x61f   : > { %2654 = vmatprep.subr.bf16.mxu0 %v7768_v7  ;;  %v8017_v33 = vpop.eup %8016  ;;  %v2412_v34 = vmul.f32 %v9035_v39, %v8015_v52  ;;  %v2475_v39 = vrot.slane %v2470_v40, %v12678_v10  ;;  %v12696_v14 = vld [vmem:[#allocation34_spill] sm:$0xff]  ;;  %v12698_v52 = vld [vmem:[#allocation35_spill] sm:$0xff] }
 0x620   : > { %v2413_v48 = vmul.f32 %v9031_v36, %v8017_v33  ;;  %v8019_v53 = vpop.eup %8018  ;;  %v2416_v15 = vpack.c.bf16 %v2403_v44, %v2402_v18  ;;  %v2479_v36 = vrot.slane %v2470_v40, %v12679_v51  ;;  %v12700_v18 = vld [vmem:[#allocation36_spill] sm:$0xff]  ;;  %v12704_v40 = vld [vmem:[#allocation38_spill] sm:$0xff] }
 0x621   : > { %v8021_v59 = vpop.eup %8020  ;;  %v2404_v16 = vmul.f32 %v9067_v11, %v8019_v53 }
 0x622   : > { %2655 = vmatpush1.bf16.msra.mxu0 %v7770_v0  ;;  %v2425_v50 = vpack.c.bf16 %v2413_v48, %v2412_v34  ;;  %v2405_v37 = vmul.f32 %v9063_v43, %v8021_v59  ;;  %v12702_v34 = vld [vmem:[#allocation37_spill] sm:$0xff] }
 0x623   : > { %2656 = vmatprep.subr.bf16.mxu0 %v7771_v23 }
 0x624   : > { %v2417_v29 = vpack.c.bf16 %v2405_v37, %v2404_v16  ;;  %s6506_s27 = sshll.u32 %s12747_s6, 4 }
 0x626   : > { %2657 = vmatpush1.bf16.msra.mxu0 %v7773_v6  ;;  %v12680_v6 = vld [vmem:[#allocation26_spill] sm:$0xff] }
 0x627   : > { %2658 = vmatprep.subr.bf16.mxu0 %v7774_v55 }
 0x62a   : > { %2659 = vmatpush1.bf16.msra.mxu0 %v7776_v30  ;;  %v12682_v30 = vld [vmem:[#allocation27_spill] sm:$0xff] }
 0x62b   : > { %2660 = vmatprep.subr.bf16.mxu0 %v7777_v31 }
 0x62e   : > { %2661 = vmatpush1.bf16.msra.mxu0 %v7779_v26 }
 0x62f   : > { %2662 = vmatprep.subr.bf16.mxu0 %v7780_v2  ;;  %v12684_v2 = vld [vmem:[#allocation30_spill] sm:$0xff] }
 0x632   : > { %2663 = vmatpush1.bf16.msra.mxu0 %v7782_v54 }
 0x633   : > { %2664 = vmatprep.subr.bf16.mxu0 %v7783_v17  ;;  %v12686_v17 = vld [vmem:[#allocation31_spill] sm:$0xff] }
 0x636   : > { %2665 = vmatpush1.bf16.msra.mxu0 %v7785_v25 }
 0x637   : > { %2666 = vmatprep.subr.bf16.mxu0 %v7786_v32 }
 0x63a   : > { %2667 = vmatpush1.bf16.msra.mxu0 %v7788_v19 }
 0x63b   : > { %2668 = vmatprep.subr.bf16.mxu0 %v7789_v28 }
 0x63e   : > { %2669 = vmatpush1.bf16.msra.mxu0 %v7791_v1 }
 0x63f   : > { %2670 = vmatprep.subr.bf16.mxu0 %v7792_v24 }
 0x642   : > { %2671 = vmatpush1.bf16.msra.mxu0 %v7794_v4 }
 0x643   : > { %2672 = vmatprep.subr.bf16.mxu0 %v7795_v5 }
 0x646   : > { %2673 = vmatpush1.bf16.msra.mxu0 %v7797_v45  ;;  %v12690_v45 = vld [vmem:[#allocation29_spill] sm:$0xff] }
 0x649   : > { %2675 = vmatmul.mubr.bf16.vlgmr.msra.gmra.mrb[0].mxu0 %v2414_v41 }
 0x64a   : > { %2684 = vmatprep.mubr.bf16.mxu0 %v2423_v60 }
 0x651   : > { %2685 = vmatmul.mubr.bf16.gmra.mrb[4].mxu0 %v2415_v22 }
 0x652   : > { %2694 = vmatprep.mubr.bf16.mxu0 %v2424_v49 }
 0x659   : > { %2695 = vmatmul.mubr.bf16.gmra.mrb[8].mxu0 %v2416_v15 }
 0x65a   : > { %2704 = vmatprep.mubr.bf16.mxu0 %v2425_v50 }
 0x661   : > { %2705 = vmatmul.mubr.bf16.gmra.mrb[12].mxu0 %v2417_v29 }
 0x71c   : > { %v2676_v42 = vpop.f32.mrb[0].mxu0 }
 0x71d   : > { %v2677_v47 = vadd.f32 %v2676_v42, %v2475_v39  ;;  %v2678_v7 = vpop.f32.mrb[1].mxu0 }
 0x71e   : > { %v2679_v0 = vadd.f32 %v2678_v7, %v2479_v36  ;;  %v2680_v23 = vpop.f32.mrb[2].mxu0 }
 0x71f   : > { %v11028_v11 = vadd.f32 %v2677_v47, %v12680_v6  ;;  %v2681_v43 = vadd.f32 %v2680_v23, %v2475_v39  ;;  %v2682_v55 = vpop.f32.mrb[3].mxu0 }
 0x720   : > { %v11031_v31 = vadd.f32 %v2679_v0, %v12682_v30  ;;  %v2683_v26 = vadd.f32 %v2682_v55, %v2479_v36  ;;  %v12706_v0 = vld [vmem:[#allocation39_spill] sm:$0xff]  ;;  %v12710_v30 = vld [vmem:[#allocation41_spill] sm:$0xff] }
 0x721   : > { %12681 = vst [vmem:[#allocation43_spill] sm:$0xff] %v11028_v11  ;;  %v11034_v54 = vadd.f32 %v2681_v43, %v12684_v2  ;;  %v12708_v43 = vld [vmem:[#allocation40_spill] sm:$0xff] }
 0x722   : > { %12683 = vst [vmem:[#allocation44_spill] sm:$0xff] %v11031_v31  ;;  %v11037_v25 = vadd.f32 %v2683_v26, %v12686_v17  ;;  %v2733_v32 = vadd.f32 %v11031_v31, %v11028_v11 }
 0x723   : > { %12685 = vst [vmem:[#allocation45_spill] sm:$0xff] %v11034_v54 }
 0x724   : > { %12687 = vst [vmem:[#allocation46_spill] sm:$0xff] %v11037_v25  ;;  %v2686_v19 = vpop.f32.mrb[4].mxu0  ;;  %2734 = vadd.xlane.f32.xlu0 %v2733_v32  ;;  %v2736_v4 = vadd.f32 %v11037_v25, %v11034_v54  ;;  %v2927_v32 = vld [vmem:[#allocation15 + $0x20] sm:$0xff] }
 0x725   : > { %v2687_v28 = vadd.f32 %v2686_v19, %v2475_v39  ;;  %v2688_v1 = vpop.f32.mrb[5].mxu0  ;;  %v2925_v19 = vld [vmem:[#allocation15 + $0x10] sm:$0xff] }
 0x726   : > { %v2689_v24 = vadd.f32 %v2688_v1, %v2479_v36  ;;  %v2690_v27 = vpop.f32.mrb[6].mxu0 }
 0x727   : > { %v11044_v5 = vadd.f32 %v2687_v28, %v12688_v8  ;;  %v2691_v20 = vadd.f32 %v2690_v27, %v2475_v39  ;;  %v2692_v35 = vpop.f32.mrb[7].mxu0  ;;  %v2935_v27 = vld [vmem:[#allocation15 + $0x60] sm:$0xff] }
 0x728   : > { %v11047_v56 = vadd.f32 %v2689_v24, %v12690_v45  ;;  %2737 = vadd.xlane.f32.xlu0 %v2736_v4  ;;  %v2693_v9 = vadd.f32 %v2692_v35, %v2479_v36  ;;  %v2931_v24 = vld [vmem:[#allocation15 + $0x40] sm:$0xff]  ;;  %v2933_v35 = vld [vmem:[#allocation15 + $0x50] sm:$0xff] }
 0x729   : > { %12689 = vst [vmem:[#allocation47_spill] sm:$0xff] %v11044_v5  ;;  %v11050_v58 = vadd.f32 %v2691_v20, %v12692_v12  ;;  %v6251_v20 = vcombine.high %v2931_v24, %v2935_v27  ;;  %v2937_v45 = vld [vmem:[#allocation15 + $0x70] sm:$0xff] }
 0x72a   : > { %12691 = vst [vmem:[#allocation48_spill] sm:$0xff] %v11047_v56  ;;  %v11053_v61 = vadd.f32 %v2693_v9, %v12694_v46  ;;  %v2739_v41 = vadd.f32 %v11047_v56, %v11044_v5  ;;  %v2939_v9 = vld [vmem:[#allocation15 + $0x80] sm:$0xff]  ;;  %v6255_v12 = vcombine.high %v2933_v35, %v2937_v45 }
 0x72b   : > { %12693 = vst [vmem:[#allocation49_spill] sm:$0xff] %v11050_v58  ;;  %v2943_v46 = vld [vmem:[#allocation15 + $0xa0] sm:$0xff] }
 0x72c   : > { %12695 = vst [vmem:[#allocation50_spill] sm:$0xff] %v11053_v61  ;;  %v2696_v63 = vpop.f32.mrb[8].mxu0  ;;  %2740 = vadd.xlane.f32.xlu1 %v2739_v41  ;;  %v2742_v60 = vadd.f32 %v11053_v61, %v11050_v58  ;;  %v2941_v41 = vld [vmem:[#allocation15 + $0x90] sm:$0xff] }
 0x72d   : > { %v2697_v3 = vadd.f32 %v2696_v63, %v2475_v39  ;;  %v2698_v57 = vpop.f32.mrb[9].mxu0  ;;  %v2945_v63 = vld [vmem:[#allocation15 + $0xb0] sm:$0xff] }
 0x72e   : > { %v2699_v62 = vadd.f32 %v2698_v57, %v2479_v36  ;;  %v2700_v13 = vpop.f32.mrb[10].mxu0  ;;  %v6259_v57 = vcombine.high %v2939_v9, %v2943_v46 }
 0x72f   : > { %v11060_v21 = vadd.f32 %v2697_v3, %v12696_v14  ;;  %v2701_v38 = vadd.f32 %v2700_v13, %v2475_v39  ;;  %v2702_v22 = vpop.f32.mrb[11].mxu0  ;;  %v6254_v3 = vcombine.low %v2933_v35, %v2937_v45  ;;  %v2947_v13 = vld [vmem:[#allocation15 + $0xc0] sm:$0xff]  ;;  %v2985_v35 = vld [vmem:[#allocation15 + $0x1f0] sm:$0xff] }
 0x730   : > { %v11063_v49 = vadd.f32 %v2699_v62, %v12698_v52  ;;  %v2703_v33 = vadd.f32 %v2702_v22, %v2479_v36  ;;  %2743 = vadd.xlane.f32.xlu1 %v2742_v60  ;;  %v6250_v60 = vcombine.low %v2931_v24, %v2935_v27  ;;  %v6263_v62 = vcombine.high %v2941_v41, %v2945_v63  ;;  %v2951_v14 = vld [vmem:[#allocation15 + $0xe0] sm:$0xff]  ;;  %v2953_v22 = vld [vmem:[#allocation15 + $0xf0] sm:$0xff] }
 0x731   : > { %12697 = vst [vmem:[#allocation53_spill] sm:$0xff] %v11060_v21  ;;  %v11066_v44 = vadd.f32 %v2701_v38, %v12700_v18  ;;  %v2949_v38 = vld [vmem:[#allocation15 + $0xd0] sm:$0xff]  ;;  %v6258_v52 = vcombine.low %v2939_v9, %v2943_v46  ;;  %v6267_v18 = vcombine.high %v2947_v13, %v2951_v14 }
 0x732   : > { %12699 = vst [vmem:[#allocation54_spill] sm:$0xff] %v11063_v49  ;;  %v11069_v48 = vadd.f32 %v2703_v33, %v12702_v34  ;;  %v2745_v53 = vadd.f32 %v11063_v49, %v11060_v21  ;;  %v6262_v33 = vcombine.low %v2941_v41, %v2945_v63  ;;  %v6271_v34 = vcombine.high %v2949_v38, %v2953_v22  ;;  %v2987_v41 = vld [vmem:[#allocation15 + $0x200] sm:$0xff] }
 0x733   : > { %12701 = vst [vmem:[#allocation55_spill] sm:$0xff] %v11066_v44  ;;  %v2991_v63 = vld [vmem:[#allocation15 + $0x220] sm:$0xff] }
 0x734   : > { %12703 = vst [vmem:[#allocation56_spill] sm:$0xff] %v11069_v48  ;;  %v2706_v15 = vpop.f32.mrb[12].mxu0  ;;  %2746 = vadd.xlane.f32.xlu0 %v2745_v53  ;;  %v2748_v59 = vadd.f32 %v11069_v48, %v11066_v44  ;;  %v2955_v53 = vld [vmem:[#allocation15 + $0x100] sm:$0xff] }
 0x735   : > { %v2707_v50 = vadd.f32 %v2706_v15, %v2475_v39  ;;  %v2708_v16 = vpop.f32.mrb[13].mxu0  ;;  %v2959_v15 = vld [vmem:[#allocation15 + $0x120] sm:$0xff] }
 0x736   : > { %v2709_v37 = vadd.f32 %v2708_v16, %v2479_v36  ;;  %v2710_v29 = vpop.f32.mrb[14].mxu0  ;;  %2749 = vadd.xlane.f32.xlu1 %v2748_v59  ;;  %v2957_v59 = vld [vmem:[#allocation15 + $0x110] sm:$0xff]  ;;  %v6266_v16 = vcombine.low %v2947_v13, %v2951_v14  ;;  %v6307_v13 = vcombine.high %v2987_v41, %v2991_v63 }
 0x737   : > { %v11076_v42 = vadd.f32 %v2707_v50, %v12704_v40  ;;  %v2711_v47 = vadd.f32 %v2710_v29, %v2475_v39  ;;  %v2712_v7 = vpop.f32.mrb[15].mxu0  ;;  %v2923_v39 = vld [vmem:[#allocation15] sm:$0xff]  ;;  %v2961_v50 = vld [vmem:[#allocation15 + $0x130] sm:$0xff]  ;;  %v6275_v29 = vcombine.high %v2955_v53, %v2959_v15 }
 0x738   : > { %v11079_v23 = vadd.f32 %v2709_v37, %v12706_v0  ;;  %v2713_v6 = vadd.f32 %v2712_v7, %v2479_v36  ;;  %v6242_v28 = vcombine.low %v2923_v39, %v2927_v32  ;;  %v6243_v1 = vcombine.high %v2923_v39, %v2927_v32  ;;  %v2929_v36 = vld [vmem:[#allocation15 + $0x30] sm:$0xff]  ;;  %v2967_v7 = vld [vmem:[#allocation15 + $0x160] sm:$0xff] }
 0x739   : > { %12705 = vst [vmem:[#allocation57_spill] sm:$0xff] %v11076_v42  ;;  %v11082_v55 = vadd.f32 %v2711_v47, %v12708_v43  ;;  %v6247_v4 = vcombine.high %v2925_v19, %v2929_v36  ;;  %v6246_v8 = vcombine.low %v2925_v19, %v2929_v36  ;;  %v6270_v37 = vcombine.low %v2949_v38, %v2953_v22  ;;  %v2963_v47 = vld [vmem:[#allocation15 + $0x140] sm:$0xff]  ;;  %v2965_v0 = vld [vmem:[#allocation15 + $0x150] sm:$0xff] }
 0x73a   : > { %12707 = vst [vmem:[#allocation58_spill] sm:$0xff] %v11079_v23  ;;  %v11085_v26 = vadd.f32 %v2713_v6, %v12710_v30  ;;  %v2751_v2 = vadd.f32 %v11079_v23, %v11076_v42  ;;  %3733 = vmatprep.subr.bf16.mxu0 %v6243_v1  ;;  %v6279_v40 = vcombine.high %v2957_v59, %v2961_v50  ;;  %v2969_v6 = vld [vmem:[#allocation15 + $0x170] sm:$0xff]  ;;  %v2971_v39 = vld [vmem:[#allocation15 + $0x180] sm:$0xff] }
 0x73b   : > { %12709 = vst [vmem:[#allocation59_spill] sm:$0xff] %v11082_v55  ;;  %3734 = vmatpush1.bf16.msra.mxu0 %v6242_v28  ;;  %3879 = vmatprep.subr.bf16.mxu1 %v6247_v4  ;;  %v6274_v43 = vcombine.low %v2955_v53, %v2959_v15  ;;  %v6278_v30 = vcombine.low %v2957_v59, %v2961_v50  ;;  %v2975_v32 = vld [vmem:[#allocation15 + $0x1a0] sm:$0xff]  ;;  %v2973_v19 = vld [vmem:[#allocation15 + $0x190] sm:$0xff] }
 0x73c   : > { %12711 = vst [vmem:[#allocation60_spill] sm:$0xff] %v11085_v26  ;;  %2752 = vadd.xlane.f32.xlu0 %v2751_v2  ;;  %v2754_v17 = vadd.f32 %v11085_v26, %v11082_v55  ;;  %3880 = vmatpush1.bf16.msra.mxu1 %v6246_v8  ;;  %v6283_v2 = vcombine.high %v2963_v47, %v2967_v7  ;;  %v2977_v28 = vld [vmem:[#allocation15 + $0x1b0] sm:$0xff]  ;;  %v2979_v4 = vld [vmem:[#allocation15 + $0x1c0] sm:$0xff] }
 0x73d   : > { %3735 = vmatprep.subr.bf16.mxu0 %v6251_v20  ;;  %3881 = vmatprep.subr.bf16.mxu1 %v6255_v12  ;;  %v6282_v1 = vcombine.low %v2963_v47, %v2967_v7  ;;  %v6286_v36 = vcombine.low %v2965_v0, %v2969_v6  ;;  %v6291_v24 = vcombine.high %v2971_v39, %v2975_v32  ;;  %v2983_v8 = vld [vmem:[#allocation15 + $0x1e0] sm:$0xff]  ;;  %v2981_v20 = vld [vmem:[#allocation15 + $0x1d0] sm:$0xff] }
 0x73e   : > { %2755 = vadd.xlane.f32.xlu1 %v2754_v17  ;;  %v6287_v17 = vcombine.high %v2965_v0, %v2969_v6  ;;  %v6295_v27 = vcombine.high %v2973_v19, %v2977_v28  ;;  %v6290_v45 = vcombine.low %v2971_v39, %v2975_v32  ;;  %v6294_v9 = vcombine.low %v2973_v19, %v2977_v28  ;;  %v2995_v38 = vld [vmem:[#allocation15 + $0x240] sm:$0xff] }
 0x73f   : > { %3736 = vmatpush1.bf16.msra.mxu0 %v6250_v60  ;;  %v6299_v12 = vcombine.high %v2979_v4, %v2983_v8  ;;  %v6303_v46 = vcombine.high %v2981_v20, %v2985_v35  ;;  %v2989_v60 = vld [vmem:[#allocation15 + $0x210] sm:$0xff]  ;;  %v2999_v22 = vld [vmem:[#allocation15 + $0x260] sm:$0xff] }
 0x740   : > { %3882 = vmatpush1.bf16.msra.mxu1 %v6254_v3  ;;  %3737 = vmatprep.subr.bf16.mxu0 %v6259_v57  ;;  %v2993_v3 = vld [vmem:[#allocation15 + $0x230] sm:$0xff]  ;;  %v6298_v57 = vcombine.low %v2979_v4, %v2983_v8 }
 0x741   : > { %3883 = vmatprep.subr.bf16.mxu1 %v6263_v62  ;;  %v6302_v62 = vcombine.low %v2981_v20, %v2985_v35  ;;  %v6311_v14 = vcombine.high %v2989_v60, %v2993_v3 }
 0x743   : > { %3738 = vmatpush1.bf16.msra.mxu0 %v6258_v52  ;;  %v6306_v52 = vcombine.low %v2987_v41, %v2991_v63 }
 0x744   : > { %3884 = vmatpush1.bf16.msra.mxu1 %v6262_v33  ;;  %3739 = vmatprep.subr.bf16.mxu0 %v6267_v18  ;;  %v6310_v33 = vcombine.low %v2989_v60, %v2993_v3  ;;  %v6315_v18 = vcombine.high %v2995_v38, %v2999_v22  ;;  %v2997_v60 = vld [vmem:[#allocation15 + $0x250] sm:$0xff] }
 0x745   : > { %3885 = vmatprep.subr.bf16.mxu1 %v6271_v34  ;;  %v6314_v34 = vcombine.low %v2995_v38, %v2999_v22  ;;  %v3001_v3 = vld [vmem:[#allocation15 + $0x270] sm:$0xff] }
 0x746   : > { %v6319_v38 = vcombine.high %v2997_v60, %v3001_v3  ;;  %v6318_v22 = vcombine.low %v2997_v60, %v3001_v3 }
 0x747   : > { %3740 = vmatpush1.bf16.msra.mxu0 %v6266_v16 }
 0x748   : > { %3886 = vmatpush1.bf16.msra.mxu1 %v6270_v37  ;;  %3741 = vmatprep.subr.bf16.mxu0 %v6275_v29 }
 0x749   : > { %3887 = vmatprep.subr.bf16.mxu1 %v6279_v40 }
 0x74b   : > { %3742 = vmatpush1.bf16.msra.mxu0 %v6274_v43 }
 0x74c   : > { %3888 = vmatpush1.bf16.msra.mxu1 %v6278_v30  ;;  %3743 = vmatprep.subr.bf16.mxu0 %v6283_v2 }
 0x74d   : > { %3889 = vmatprep.subr.bf16.mxu1 %v6287_v17 }
 0x74f   : > { %3744 = vmatpush1.bf16.msra.mxu0 %v6282_v1 }
 0x750   : > { %3890 = vmatpush1.bf16.msra.mxu1 %v6286_v36  ;;  %3745 = vmatprep.subr.bf16.mxu0 %v6291_v24 }
 0x751   : > { %3891 = vmatprep.subr.bf16.mxu1 %v6295_v27 }
 0x753   : > { %3746 = vmatpush1.bf16.msra.mxu0 %v6290_v45 }
 0x754   : > { %3892 = vmatpush1.bf16.msra.mxu1 %v6294_v9  ;;  %3747 = vmatprep.subr.bf16.mxu0 %v6299_v12 }
 0x755   : > { %3893 = vmatprep.subr.bf16.mxu1 %v6303_v46 }
 0x757   : > { %3748 = vmatpush1.bf16.msra.mxu0 %v6298_v57 }
 0x758   : > { %3894 = vmatpush1.bf16.msra.mxu1 %v6302_v62  ;;  %3749 = vmatprep.subr.bf16.mxu0 %v6307_v13 }
 0x759   : > { %3895 = vmatprep.subr.bf16.mxu1 %v6311_v14 }
 0x75b   : > { %3750 = vmatpush1.bf16.msra.mxu0 %v6306_v52 }
 0x75c   : > { %3896 = vmatpush1.bf16.msra.mxu1 %v6310_v33  ;;  %3751 = vmatprep.subr.bf16.mxu0 %v6315_v18 }
 0x75d   : > { %3897 = vmatprep.subr.bf16.mxu1 %v6319_v38 }
 0x75f   : > { %3752 = vmatpush1.bf16.msra.mxu0 %v6314_v34  ;;  %v3003_v34 = vld [vmem:[#allocation15 + $0x280] sm:$0xff] }
 0x760   : > { %3898 = vmatpush1.bf16.msra.mxu1 %v6318_v22  ;;  %v3019_v22 = vld [vmem:[#allocation15 + $0x300] sm:$0xff] }
 0x7b1   : > { %v2735_v53 = vpop.xlane.xlu0 %2734 }
 0x7b2   : > { %v2757_v15 = vmul.f32 0.00390625, %v2735_v53  ;;  %v3007_v53 = vld [vmem:[#allocation15 + $0x2a0] sm:$0xff] }
 0x7b4   : > { %v11092_v59 = vsub.f32 %v11028_v11, %v2757_v15  ;;  %v11095_v50 = vsub.f32 %v11031_v31, %v2757_v15 }
 0x7b5   : > { %v2738_v16 = vpop.xlane.xlu0 %2737 }
 0x7b6   : > { %v2758_v37 = vmul.f32 0.00390625, %v2738_v16  ;;  %v2781_v29 = vmul.f32 %v11092_v59, %v11092_v59  ;;  %v2782_v40 = vmul.f32 %v11095_v50, %v11095_v50  ;;  %v6323_v16 = vcombine.high %v3003_v34, %v3007_v53 }
 0x7b8   : > { %v11102_v47 = vsub.f32 %v11034_v54, %v2758_v37  ;;  %v11105_v7 = vsub.f32 %v11037_v25, %v2758_v37  ;;  %v2797_v0 = vadd.f32 %v2782_v40, %v2781_v29  ;;  %v3005_v37 = vld [vmem:[#allocation15 + $0x290] sm:$0xff]  ;;  %3753 = vmatprep.subr.bf16.mxu0 %v6323_v16 }
 0x7b9   : > { %v2741_v6 = vpop.xlane.xlu1 %2740  ;;  %v3009_v29 = vld [vmem:[#allocation15 + $0x2b0] sm:$0xff] }
 0x7ba   : > { %v2759_v43 = vmul.f32 0.00390625, %v2741_v6  ;;  %2798 = vadd.xlane.f32.xlu0 %v2797_v0  ;;  %v2783_v30 = vmul.f32 %v11102_v47, %v11102_v47  ;;  %v2784_v2 = vmul.f32 %v11105_v7, %v11105_v7  ;;  %v6322_v6 = vcombine.low %v3003_v34, %v3007_v53  ;;  %v3025_v34 = vld [vmem:[#allocation15 + $0x330] sm:$0xff] }
 0x7bc   : > { %v11112_v17 = vsub.f32 %v11044_v5, %v2759_v43  ;;  %v11115_v39 = vsub.f32 %v11047_v56, %v2759_v43  ;;  %v2800_v32 = vadd.f32 %v2784_v2, %v2783_v30  ;;  %v6327_v43 = vcombine.high %v3005_v37, %v3009_v29  ;;  %3754 = vmatpush1.bf16.msra.mxu0 %v6322_v6  ;;  %v3029_v6 = vld [vmem:[#allocation15 + $0x350] sm:$0xff] }
 0x7bd   : > { %v2744_v19 = vpop.xlane.xlu1 %2743  ;;  %v6326_v2 = vcombine.low %v3005_v37, %v3009_v29  ;;  %v3027_v29 = vld [vmem:[#allocation15 + $0x340] sm:$0xff] }
 0x7be   : > { %v2760_v28 = vmul.f32 0.00390625, %v2744_v19  ;;  %2801 = vadd.xlane.f32.xlu1 %v2800_v32  ;;  %v2785_v1 = vmul.f32 %v11112_v17, %v11112_v17  ;;  %v2786_v36 = vmul.f32 %v11115_v39, %v11115_v39  ;;  %3899 = vmatprep.subr.bf16.mxu1 %v6327_v43  ;;  %v3033_v43 = vld [vmem:[#allocation15 + $0x370] sm:$0xff] }
 0x7bf   : > { %3900 = vmatpush1.bf16.msra.mxu1 %v6326_v2  ;;  %v6351_v2 = vcombine.high %v3029_v6, %v3033_v43 }
 0x7c0   : > { %v11122_v24 = vsub.f32 %v11050_v58, %v2760_v28  ;;  %v11125_v27 = vsub.f32 %v11053_v61, %v2760_v28  ;;  %v2803_v4 = vadd.f32 %v2786_v36, %v2785_v1  ;;  %v3011_v1 = vld [vmem:[#allocation15 + $0x2c0] sm:$0xff] }
 0x7c1   : > { %v2747_v8 = vpop.xlane.xlu0 %2746  ;;  %v3015_v36 = vld [vmem:[#allocation15 + $0x2e0] sm:$0xff] }
 0x7c2   : > { %v2761_v20 = vmul.f32 0.00390625, %v2747_v8  ;;  %2804 = vadd.xlane.f32.xlu0 %v2803_v4  ;;  %v2787_v35 = vmul.f32 %v11122_v24, %v11122_v24  ;;  %v2788_v45 = vmul.f32 %v11125_v27, %v11125_v27  ;;  %v6331_v4 = vcombine.high %v3011_v1, %v3015_v36  ;;  %v3013_v8 = vld [vmem:[#allocation15 + $0x2d0] sm:$0xff] }
 0x7c3   : > { %v2750_v9 = vpop.xlane.xlu1 %2749 }
 0x7c4   : > { %v11132_v12 = vsub.f32 %v11060_v21, %v2761_v20  ;;  %v11135_v46 = vsub.f32 %v11063_v49, %v2761_v20  ;;  %v2762_v41 = vmul.f32 0.00390625, %v2750_v9  ;;  %v2806_v63 = vadd.f32 %v2788_v45, %v2787_v35  ;;  %v3017_v20 = vld [vmem:[#allocation15 + $0x2f0] sm:$0xff]  ;;  %3755 = vmatprep.subr.bf16.mxu0 %v6331_v4 }
 0x7c5   : > { %v6335_v60 = vcombine.high %v3013_v8, %v3017_v20  ;;  %v6334_v3 = vcombine.low %v3013_v8, %v3017_v20  ;;  %v3037_v8 = vld [vmem:[#allocation15 + $0x390] sm:$0xff] }
 0x7c6   : > { %v11138_v57 = vsub.f32 %v11066_v44, %v2762_v41  ;;  %v11141_v62 = vsub.f32 %v11069_v48, %v2762_v41  ;;  %2807 = vadd.xlane.f32.xlu1 %v2806_v63  ;;  %v2789_v13 = vmul.f32 %v11132_v12, %v11132_v12  ;;  %v2790_v14 = vmul.f32 %v11135_v46, %v11135_v46  ;;  %v3041_v20 = vld [vmem:[#allocation15 + $0x3b0] sm:$0xff] }
 0x7c7   : > { %v6330_v63 = vcombine.low %v3011_v1, %v3015_v36  ;;  %3901 = vmatprep.subr.bf16.mxu1 %v6335_v60  ;;  %v3035_v1 = vld [vmem:[#allocation15 + $0x380] sm:$0xff] }
 0x7c8   : > { %v2809_v52 = vadd.f32 %v2790_v14, %v2789_v13  ;;  %v2791_v33 = vmul.f32 %v11138_v57, %v11138_v57  ;;  %v2792_v18 = vmul.f32 %v11141_v62, %v11141_v62  ;;  %3902 = vmatpush1.bf16.msra.mxu1 %v6334_v3  ;;  %v3039_v36 = vld [vmem:[#allocation15 + $0x3a0] sm:$0xff] }
 0x7c9   : > { %v2753_v15 = vpop.xlane.xlu0 %2752  ;;  %3756 = vmatpush1.bf16.msra.mxu0 %v6330_v63  ;;  %v6355_v4 = vcombine.high %v3035_v1, %v3039_v36  ;;  %v6358_v63 = vcombine.low %v3037_v8, %v3041_v20  ;;  %v3043_v60 = vld [vmem:[#allocation15 + $0x3c0] sm:$0xff] }
 0x7ca   : > { %v2763_v40 = vmul.f32 0.00390625, %v2753_v15  ;;  %2810 = vadd.xlane.f32.xlu0 %v2809_v52  ;;  %v2812_v0 = vadd.f32 %v2792_v18, %v2791_v33  ;;  %v3023_v52 = vld [vmem:[#allocation15 + $0x320] sm:$0xff]  ;;  %v3021_v18 = vld [vmem:[#allocation15 + $0x310] sm:$0xff] }
 0x7cb   : > { %v2756_v30 = vpop.xlane.xlu1 %2755  ;;  %v6339_v33 = vcombine.high %v3019_v22, %v3023_v52  ;;  %v6338_v15 = vcombine.low %v3019_v22, %v3023_v52  ;;  %v6343_v16 = vcombine.high %v3021_v18, %v3025_v34  ;;  %v6342_v37 = vcombine.low %v3021_v18, %v3025_v34  ;;  %v3047_v3 = vld [vmem:[#allocation15 + $0x3e0] sm:$0xff]  ;;  %v11171_v18 = vld [vmem:[#allocation15 + $0x8] sm:$0xff] }
 0x7cc   : > { %v11152_v32 = vsub.f32 %v11076_v42, %v2763_v40  ;;  %v11155_v19 = vsub.f32 %v11079_v23, %v2763_v40  ;;  %v2764_v28 = vmul.f32 0.00390625, %v2756_v30  ;;  %2813 = vadd.xlane.f32.xlu1 %v2812_v0  ;;  %v3031_v40 = vld [vmem:[#allocation15 + $0x360] sm:$0xff]  ;;  %v6362_v22 = vcombine.low %v3043_v60, %v3047_v3  ;;  %v11173_v34 = vld [vmem:[#allocation15 + $0x28] sm:$0xff] }
 0x7cd   : > { %3757 = vmatprep.subr.bf16.mxu0 %v6339_v33  ;;  %3903 = vmatprep.subr.bf16.mxu1 %v6343_v16  ;;  %v6347_v0 = vcombine.high %v3027_v29, %v3031_v40  ;;  %v6346_v30 = vcombine.low %v3027_v29, %v3031_v40 }
 0x7ce   : > { %v11158_v35 = vsub.f32 %v11082_v55, %v2764_v28  ;;  %v11161_v45 = vsub.f32 %v11085_v26, %v2764_v28  ;;  %v2793_v9 = vmul.f32 %v11152_v32, %v11152_v32  ;;  %v2794_v41 = vmul.f32 %v11155_v19, %v11155_v19  ;;  %3758 = vmatpush1.bf16.msra.mxu0 %v6338_v15 }
 0x7cf   : > { %3904 = vmatpush1.bf16.msra.mxu1 %v6342_v37  ;;  %3759 = vmatprep.subr.bf16.mxu0 %v6347_v0  ;;  %v6350_v28 = vcombine.low %v3029_v6, %v3033_v43  ;;  %v6244_v15 = vcombine.low %v11171_v18, %v11173_v34 }
 0x7d0   : > { %v2815_v13 = vadd.f32 %v2794_v41, %v2793_v9  ;;  %v2795_v14 = vmul.f32 %v11158_v35, %v11158_v35  ;;  %v2796_v38 = vmul.f32 %v11161_v45, %v11161_v45  ;;  %3905 = vmatprep.subr.bf16.mxu1 %v6351_v2  ;;  %v6354_v9 = vcombine.low %v3035_v1, %v3039_v36 }
 0x7d1   : > { %v6359_v41 = vcombine.high %v3037_v8, %v3041_v20 }
 0x7d2   : > { %2816 = vadd.xlane.f32.xlu0 %v2815_v13  ;;  %v2818_v53 = vadd.f32 %v2796_v38, %v2795_v14  ;;  %3760 = vmatpush1.bf16.msra.mxu0 %v6346_v30  ;;  %v6363_v13 = vcombine.high %v3043_v60, %v3047_v3  ;;  %v3045_v14 = vld [vmem:[#allocation15 + $0x3d0] sm:$0xff] }
 0x7d3   : > { %3906 = vmatpush1.bf16.msra.mxu1 %v6350_v28  ;;  %3761 = vmatprep.subr.bf16.mxu0 %v6355_v4  ;;  %v3049_v38 = vld [vmem:[#allocation15 + $0x3f0] sm:$0xff]  ;;  %v2731_v28 = vld [vmem:[%s12712_s4] sm:$0x3]  ;;  %s6501_s4 = sshll.u32 %s12748_s9, 5 }
 0x7d4   : > { %2819 = vadd.xlane.f32.xlu1 %v2818_v53  ;;  %3907 = vmatprep.subr.bf16.mxu1 %v6359_v41  ;;  %v6367_v52 = vcombine.high %v3045_v14, %v3049_v38  ;;  %v6366_v33 = vcombine.low %v3045_v14, %v3049_v38  ;;  %v6245_v53 = vcombine.high %v11171_v18, %v11173_v34  ;;  %v2948_v34 = vld [vmem:[#allocation15 + $0xc8] sm:$0xff]  ;;  %s5751_s22 = sadd.s32 %s6506_s27, %s6501_s4 }
 0x7d5   : > { %v11183_v8 = vrot.slane %v2731_v28, %v12678_v10  ;;  %v11189_v41 = vrot.slane %v2731_v28, %v12679_v51 }
 0x7d6   : > { %3762 = vmatpush1.bf16.msra.mxu0 %v6354_v9  ;;  %v2732_v9 = vld [vmem:[%s12713_s3] sm:$0x3]  ;;  %s6502_s3 = sshll.u32 %s5751_s22, 7 }
 0x7d7   : > { %3908 = vmatpush1.bf16.msra.mxu1 %v6358_v63  ;;  %3763 = vmatprep.subr.bf16.mxu0 %v6363_v13  ;;  %v11194_v38 = vrot.slane %v2732_v9, %v12678_v10  ;;  %s12189_s8 = scalar_lea.hbm %s12757_s13, %s6502_s3 }
 0x7d8   : > { %3909 = vmatprep.subr.bf16.mxu1 %v6367_v52 }
 0x7da   : > { %3764 = vmatpush1.bf16.msra.mxu0 %v6362_v22  ;;  %v11197_v22 = vrot.slane %v2732_v9, %v12679_v51 }
 0x7db   : > { %3910 = vmatpush1.bf16.msra.mxu1 %v6366_v33  ;;  %3806 = vmatprep.subr.bf16.mxu0 %v6245_v53 }
 0x847   : > { %v2799_v16 = vpop.xlane.xlu0 %2798 }
 0x848   : > { %v2821_v37 = vmul.f32 0.00390625, %v2799_v16 }
 0x84a   : > { %v2829_v29 = vadd.f32 1e-05, %v2821_v37 }
 0x84b   : > { %v2802_v40 = vpop.xlane.xlu1 %2801 }
 0x84c   : > { %8022 = vrsqrt.f32 %v2829_v29  ;;  %v2822_v0 = vmul.f32 0.00390625, %v2802_v40 }
 0x84e   : > { %v2830_v6 = vadd.f32 1e-05, %v2822_v0 }
 0x84f   : > { %v2805_v43 = vpop.xlane.xlu0 %2804 }
 0x850   : > { %8024 = vrsqrt.f32 %v2830_v6  ;;  %v2823_v30 = vmul.f32 0.00390625, %v2805_v43 }
 0x852   : > { %v2831_v2 = vadd.f32 1e-05, %v2823_v30 }
 0x853   : > { %v2808_v1 = vpop.xlane.xlu1 %2807 }
 0x854   : > { %8026 = vrsqrt.f32 %v2831_v2  ;;  %v2824_v36 = vmul.f32 0.00390625, %v2808_v1 }
 0x856   : > { %v8023_v4 = vpop.eup %8022  ;;  %v2832_v20 = vadd.f32 1e-05, %v2824_v36  ;;  %v2932_v36 = vld [vmem:[#allocation15 + $0x48] sm:$0xff] }
 0x857   : > { %v2845_v63 = vmul.f32 %v8023_v4, %v11092_v59  ;;  %v2846_v60 = vmul.f32 %v8023_v4, %v11095_v50  ;;  %v2811_v3 = vpop.xlane.xlu0 %2810  ;;  %v2936_v4 = vld [vmem:[#allocation15 + $0x68] sm:$0xff] }
 0x858   : > { %8028 = vrsqrt.f32 %v2832_v20  ;;  %v2825_v13 = vmul.f32 0.00390625, %v2811_v3 }
 0x859   : > { %v2814_v14 = vpop.xlane.xlu1 %2813  ;;  %v2872_v33 = vmul.f32 %v11183_v8, %v2845_v63  ;;  %v2873_v37 = vmul.f32 %v11189_v41, %v2846_v60 }
 0x85a   : > { %v8025_v52 = vpop.eup %8024  ;;  %v2833_v53 = vadd.f32 1e-05, %v2825_v13  ;;  %v2826_v16 = vmul.f32 0.00390625, %v2814_v14 }
 0x85b   : > { %v2847_v59 = vmul.f32 %v8025_v52, %v11102_v47  ;;  %v2848_v50 = vmul.f32 %v8025_v52, %v11105_v7  ;;  %v2900_v43 = vadd.f32 %v11197_v22, %v2873_v37  ;;  %v2899_v30 = vadd.f32 %v11194_v38, %v2872_v33 }
 0x85c   : > { %8030 = vrsqrt.f32 %v2833_v53  ;;  %v2834_v29 = vadd.f32 1e-05, %v2826_v16  ;;  %v6253_v52 = vcombine.high %v2932_v36, %v2936_v4  ;;  %v2940_v53 = vld [vmem:[#allocation15 + $0x88] sm:$0xff] }
 0x85d   : > { %v2874_v40 = vmul.f32 %v11183_v8, %v2847_v59  ;;  %v2875_v0 = vmul.f32 %v11189_v41, %v2848_v50  ;;  %v2944_v16 = vld [vmem:[#allocation15 + $0xa8] sm:$0xff] }
 0x85e   : > { %v8027_v6 = vpop.eup %8026  ;;  %8032 = vrsqrt.f32 %v2834_v29 }
 0x85f   : > { %v2849_v2 = vmul.f32 %v8027_v6, %v11112_v17  ;;  %v2850_v28 = vmul.f32 %v8027_v6, %v11115_v39  ;;  %v2817_v1 = vpop.xlane.xlu0 %2816  ;;  %v2902_v47 = vadd.f32 %v11197_v22, %v2875_v0  ;;  %v2901_v7 = vadd.f32 %v11194_v38, %v2874_v40 }
 0x860   : > { %v2827_v20 = vmul.f32 0.00390625, %v2817_v1  ;;  %v6261_v0 = vcombine.high %v2940_v53, %v2944_v16  ;;  %v6260_v1 = vcombine.low %v2940_v53, %v2944_v16 }
 0x861   : > { %v2820_v9 = vpop.xlane.xlu1 %2819  ;;  %v11211_v63 = vpack.c.bf16 %v2902_v47, %v2900_v43  ;;  %v11213_v60 = vpack.c.bf16 %v2901_v7, %v2899_v30  ;;  %v2877_v17 = vmul.f32 %v11189_v41, %v2850_v28  ;;  %v2876_v37 = vmul.f32 %v11183_v8, %v2849_v2 }
 0x862   : > { %v8029_v3 = vpop.eup %8028  ;;  %v2835_v13 = vadd.f32 1e-05, %v2827_v20  ;;  %v2828_v14 = vmul.f32 0.00390625, %v2820_v9  ;;  %v2956_v9 = vld [vmem:[#allocation15 + $0x108] sm:$0xff] }
 0x863   : > { %v2851_v39 = vmul.f32 %v8029_v3, %v11122_v24  ;;  %v2852_v33 = vmul.f32 %v8029_v3, %v11125_v27  ;;  %3765 = vmatprep.mubr.bf16.mxu0 %v11211_v63  ;;  %3911 = vmatprep.mubr.bf16.mxu1 %v11211_v63  ;;  %v6252_v24 = vcombine.low %v2932_v36, %v2936_v4  ;;  %v2960_v3 = vld [vmem:[#allocation15 + $0x128] sm:$0xff] }
 0x864   : > { %8034 = vrsqrt.f32 %v2835_v13  ;;  %v2836_v59 = vadd.f32 1e-05, %v2828_v14  ;;  %3766 = vmatmul.mubr.bf16.vlgmr.msra.gmra.mrb[16].mxu0 %v11213_v60  ;;  %3912 = vmatmul.mubr.bf16.vlgmr.msra.gmra.mrb[0].mxu1 %v11213_v60  ;;  %v2904_v40 = vadd.f32 %v11197_v22, %v2877_v17  ;;  %v2903_v30 = vadd.f32 %v11194_v38, %v2876_v37  ;;  %v2964_v37 = vld [vmem:[#allocation15 + $0x148] sm:$0xff] }
 0x865   : > { %3807 = vmatpush1.bf16.msra.mxu0 %v6244_v15  ;;  %v2879_v27 = vmul.f32 %v11189_v41, %v2852_v33  ;;  %v2878_v50 = vmul.f32 %v11183_v8, %v2851_v39  ;;  %v2952_v15 = vld [vmem:[#allocation15 + $0xe8] sm:$0xff]  ;;  %v6277_v39 = vcombine.high %v2956_v9, %v2960_v3 }
 0x866   : > { %v8031_v29 = vpop.eup %8030  ;;  %8036 = vrsqrt.f32 %v2836_v59  ;;  %3808 = vmatprep.subr.bf16.mxu0 %v6253_v52  ;;  %v6269_v4 = vcombine.high %v2948_v34, %v2952_v15  ;;  %v6268_v13 = vcombine.low %v2948_v34, %v2952_v15  ;;  %v2968_v59 = vld [vmem:[#allocation15 + $0x168] sm:$0xff] }
 0x867   : > { %v2854_v6 = vmul.f32 %v8031_v29, %v11135_v46  ;;  %v2906_v43 = vadd.f32 %v11197_v22, %v2879_v27  ;;  %v2905_v18 = vadd.f32 %v11194_v38, %v2878_v50  ;;  %v2853_v28 = vmul.f32 %v8031_v29, %v11132_v12 }
 0x868   : > { %v8033_v2 = vpop.eup %8032  ;;  %v6276_v50 = vcombine.low %v2956_v9, %v2960_v3  ;;  %v2992_v9 = vld [vmem:[#allocation15 + $0x228] sm:$0xff] }
 0x869   : > { %v2855_v47 = vmul.f32 %v8033_v2, %v11138_v57  ;;  %v2856_v7 = vmul.f32 %v8033_v2, %v11141_v62  ;;  %3809 = vmatpush1.bf16.msra.mxu0 %v6252_v24  ;;  %v11236_v36 = vpack.c.bf16 %v2906_v43, %v2904_v40  ;;  %v11238_v46 = vpack.c.bf16 %v2905_v18, %v2903_v30  ;;  %v2972_v30 = vld [vmem:[#allocation15 + $0x188] sm:$0xff] }
 0x86a   : > { %3810 = vmatprep.subr.bf16.mxu0 %v6261_v0  ;;  %v2881_v20 = vmul.f32 %v11189_v41, %v2854_v6  ;;  %v2880_v62 = vmul.f32 %v11183_v8, %v2853_v28  ;;  %v6285_v43 = vcombine.high %v2964_v37, %v2968_v59  ;;  %v2976_v18 = vld [vmem:[#allocation15 + $0x1a8] sm:$0xff] }
 0x86b   : > { %3775 = vmatprep.mubr.bf16.mxu0 %v11236_v36  ;;  %3921 = vmatprep.mubr.bf16.mxu1 %v11236_v36  ;;  %v2883_v12 = vmul.f32 %v11189_v41, %v2856_v7  ;;  %v2882_v57 = vmul.f32 %v11183_v8, %v2855_v47  ;;  %v6293_v28 = vcombine.high %v2972_v30, %v2976_v18  ;;  %v2980_v47 = vld [vmem:[#allocation15 + $0x1c8] sm:$0xff] }
 0x86c   : > { %3776 = vmatmul.mubr.bf16.gmra.mrb[20].mxu0 %v11238_v46  ;;  %3922 = vmatmul.mubr.bf16.gmra.mrb[4].mxu1 %v11238_v46  ;;  %v2908_v14 = vadd.f32 %v11197_v22, %v2881_v20  ;;  %v2907_v29 = vadd.f32 %v11194_v38, %v2880_v62  ;;  %v2984_v7 = vld [vmem:[#allocation15 + $0x1e8] sm:$0xff]  ;;  %v7803_v62 = vld [vmem:[#allocation17 + $0x14] ss:$8 sps:$4 sm:$0xff]  }
 0x86d   : > { %3811 = vmatpush1.bf16.msra.mxu0 %v6260_v1  ;;  %v2910_v52 = vadd.f32 %v11197_v22, %v2883_v12  ;;  %v2909_v33 = vadd.f32 %v11194_v38, %v2882_v57  ;;  %v2988_v12 = vld [vmem:[#allocation15 + $0x208] sm:$0xff] }
 0x86e   : > { %v8035_v17 = vpop.eup %8034  ;;  %3812 = vmatprep.subr.bf16.mxu0 %v6269_v4  ;;  %v7798_v3 = vld [vmem:[#allocation17] ss:$8 sps:$4 sm:$0xff]   ;;  %v7800_v57 = vld [vmem:[#allocation17 + $0x4] ss:$8 sps:$4 sm:$0xff]  }
 0x86f   : > { %v2858_v53 = vmul.f32 %v8035_v17, %v11155_v19  ;;  %v11252_v16 = vpack.c.bf16 %v2910_v52, %v2908_v14  ;;  %v2857_v27 = vmul.f32 %v8035_v17, %v11152_v32  ;;  %v11261_v19 = vpack.c.bf16 %v2909_v33, %v2907_v29  ;;  %5413 = vmatprep.subr.bf16.mxu1 %v7800_v57  ;;  %v2996_v14 = vld [vmem:[#allocation15 + $0x248] sm:$0xff]  ;;  %v7801_v17 = vld [vmem:[#allocation17 + $0x10] ss:$8 sps:$4 sm:$0xff]  }
 0x870   : > { %v8037_v24 = vpop.eup %8036  ;;  %v3000_v52 = vld [vmem:[#allocation15 + $0x268] sm:$0xff]  ;;  %5414 = vmatpush1.bf16.msra.mxu1 %v7798_v3  ;;  %v6308_v33 = vcombine.low %v2988_v12, %v2992_v9  ;;  %v7821_v3 = vld [vmem:[#allocation17 + $0x74] ss:$8 sps:$4 sm:$0xff]  }
 0x871   : > { %v2859_v40 = vmul.f32 %v8037_v24, %v11158_v35  ;;  %v2860_v0 = vmul.f32 %v8037_v24, %v11161_v45  ;;  %3813 = vmatpush1.bf16.msra.mxu0 %v6268_v13  ;;  %3785 = vmatprep.mubr.bf16.mxu0 %v11252_v16  ;;  %v2885_v6 = vmul.f32 %v11189_v41, %v2858_v53  ;;  %v7804_v24 = vld [vmem:[#allocation17 + $0x20] ss:$8 sps:$4 sm:$0xff]  }
 0x872   : > { %3931 = vmatprep.mubr.bf16.mxu1 %v11252_v16  ;;  %3814 = vmatprep.subr.bf16.mxu0 %v6277_v39  ;;  %v2884_v35 = vmul.f32 %v11183_v8, %v2857_v27  ;;  %v6284_v45 = vcombine.low %v2964_v37, %v2968_v59  ;;  %v6309_v13 = vcombine.high %v2988_v12, %v2992_v9  ;;  %v7806_v39 = vld [vmem:[#allocation17 + $0x24] ss:$8 sps:$4 sm:$0xff]   ;;  %v7809_v27 = vld [vmem:[#allocation17 + $0x34] ss:$8 sps:$4 sm:$0xff]   ;;  %v7816_v9 = vld [vmem:[#allocation17 + $0x60] ss:$8 sps:$4 sm:$0xff]  }
 0x873   : > { %v2887_v32 = vmul.f32 %v11189_v41, %v2860_v0  ;;  %v2886_v34 = vmul.f32 %v11183_v8, %v2859_v40  ;;  %v2912_v15 = vadd.f32 %v11197_v22, %v2885_v6  ;;  %v6292_v8 = vcombine.low %v2972_v30, %v2976_v18  ;;  %5415 = vmatprep.subr.bf16.mxu1 %v7803_v62  ;;  %v3004_v37 = vld [vmem:[#allocation15 + $0x288] sm:$0xff]  ;;  %v7807_v6 = vld [vmem:[#allocation17 + $0x30] ss:$8 sps:$4 sm:$0xff]  }
 0x874   : > { %3786 = vmatmul.mubr.bf16.gmra.mrb[24].mxu0 %v11261_v19  ;;  %3932 = vmatmul.mubr.bf16.gmra.mrb[8].mxu1 %v11261_v19  ;;  %v2911_v4 = vadd.f32 %v11194_v38, %v2884_v35  ;;  %v6317_v53 = vcombine.high %v2996_v14, %v3000_v52  ;;  %v3008_v59 = vld [vmem:[#allocation15 + $0x2a8] sm:$0xff] }
 0x875   : > { %3815 = vmatpush1.bf16.msra.mxu0 %v6276_v50  ;;  %v2914_v2 = vadd.f32 %v11197_v22, %v2887_v32  ;;  %v2913_v41 = vadd.f32 %v11194_v38, %v2886_v34  ;;  %v6301_v22 = vcombine.high %v2980_v47, %v2984_v7  ;;  %v6300_v38 = vcombine.low %v2980_v47, %v2984_v7  ;;  %v3012_v40 = vld [vmem:[#allocation15 + $0x2c8] sm:$0xff]  ;;  %v7813_v47 = vld [vmem:[#allocation17 + $0x50] ss:$8 sps:$4 sm:$0xff]  }
 0x876   : > { %3816 = vmatprep.subr.bf16.mxu0 %v6285_v43  ;;  %5416 = vmatpush1.bf16.msra.mxu1 %v7801_v17  ;;  %v6316_v50 = vcombine.low %v2996_v14, %v3000_v52  ;;  %v6325_v29 = vcombine.high %v3004_v37, %v3008_v59  ;;  %v3016_v0 = vld [vmem:[#allocation15 + $0x2e8] sm:$0xff]  ;;  %v6324_v32 = vcombine.low %v3004_v37, %v3008_v59  ;;  %v7819_v14 = vld [vmem:[#allocation17 + $0x70] ss:$8 sps:$4 sm:$0xff]  }
 0x877   : > { %v11271_v1 = vpack.c.bf16 %v2914_v2, %v2912_v15  ;;  %v11276_v20 = vpack.c.bf16 %v2913_v41, %v2911_v4  ;;  %5417 = vmatprep.subr.bf16.mxu1 %v7806_v39  ;;  %v7812_v43 = vld [vmem:[#allocation17 + $0x44] ss:$8 sps:$4 sm:$0xff]   ;;  %v6333_v30 = vcombine.high %v3012_v40, %v3016_v0  ;;  %v7810_v35 = vld [vmem:[#allocation17 + $0x40] ss:$8 sps:$4 sm:$0xff]   ;;  %v6332_v15 = vcombine.low %v3012_v40, %v3016_v0  ;;  %v2926_v39 = vld [vmem:[#allocation15 + $0x18] sm:$0xff] }
 0x878   : > { %v3020_v18 = vld [vmem:[#allocation15 + $0x308] sm:$0xff]  ;;  %v2934_v59 = vld [vmem:[#allocation15 + $0x58] sm:$0xff] }
 0x879   : > { %3817 = vmatpush1.bf16.msra.mxu0 %v6284_v45  ;;  %3795 = vmatprep.mubr.bf16.mxu0 %v11271_v1  ;;  %v3024_v34 = vld [vmem:[#allocation15 + $0x328] sm:$0xff]  ;;  %v7815_v45 = vld [vmem:[#allocation17 + $0x54] ss:$8 sps:$4 sm:$0xff]  }
 0x87a   : > { %3941 = vmatprep.mubr.bf16.mxu1 %v11271_v1  ;;  %3818 = vmatprep.subr.bf16.mxu0 %v6293_v28  ;;  %v6341_v2 = vcombine.high %v3020_v18, %v3024_v34  ;;  %v3028_v28 = vld [vmem:[#allocation15 + $0x348] sm:$0xff]  ;;  %v6340_v4 = vcombine.low %v3020_v18, %v3024_v34  ;;  %v2946_v40 = vld [vmem:[#allocation15 + $0xb8] sm:$0xff] }
 0x87b   : > { %5418 = vmatpush1.bf16.msra.mxu1 %v7804_v24  ;;  %v3032_v41 = vld [vmem:[#allocation15 + $0x368] sm:$0xff]  ;;  %v2938_v24 = vld [vmem:[#allocation15 + $0x78] sm:$0xff] }
 0x87c   : > { %3796 = vmatmul.mubr.bf16.gmra.mrb[28].mxu0 %v11276_v20  ;;  %3942 = vmatmul.mubr.bf16.gmra.mrb[12].mxu1 %v11276_v20  ;;  %v7818_v7 = vld [vmem:[#allocation17 + $0x64] ss:$8 sps:$4 sm:$0xff]   ;;  %v6348_v57 = vcombine.low %v3028_v28, %v3032_v41  ;;  %v6256_v0 = vcombine.low %v2934_v59, %v2938_v24  ;;  %v2958_v34 = vld [vmem:[#allocation15 + $0x118] sm:$0xff] }
 0x87d   : > { %3819 = vmatpush1.bf16.msra.mxu0 %v6292_v8  ;;  %3838 = vmatprep.mubr.bf16.mxu0 %v11211_v63  ;;  %v6349_v8 = vcombine.high %v3028_v28, %v3032_v41  ;;  %v3040_v12 = vld [vmem:[#allocation15 + $0x3a8] sm:$0xff]  ;;  %v2970_v28 = vld [vmem:[#allocation15 + $0x178] sm:$0xff] }
 0x87e   : > { %3820 = vmatprep.subr.bf16.mxu0 %v6301_v22  ;;  %5419 = vmatprep.subr.bf16.mxu1 %v7809_v27  ;;  %v3036_v22 = vld [vmem:[#allocation15 + $0x388] sm:$0xff] }
 0x87f   : > { %5420 = vmatpush1.bf16.msra.mxu1 %v7807_v6  ;;  %v3044_v62 = vld [vmem:[#allocation15 + $0x3c8] sm:$0xff]  ;;  %v6356_v52 = vcombine.low %v3036_v22, %v3040_v12 }
 0x880   : > { %5421 = vmatprep.subr.bf16.mxu1 %v7812_v43  ;;  %v2950_v43 = vld [vmem:[#allocation15 + $0xd8] sm:$0xff] }
 0x881   : > { %3821 = vmatpush1.bf16.msra.mxu0 %v6300_v38  ;;  %v6357_v38 = vcombine.high %v3036_v22, %v3040_v12  ;;  %v2982_v12 = vld [vmem:[#allocation15 + $0x1d8] sm:$0xff] }
 0x882   : > { %3822 = vmatprep.subr.bf16.mxu0 %v6309_v13  ;;  %v3048_v13 = vld [vmem:[#allocation15 + $0x3e8] sm:$0xff] }
 0x883   : > { %5422 = vmatpush1.bf16.msra.mxu1 %v7810_v35  ;;  %v6365_v17 = vcombine.high %v3044_v62, %v3048_v13  ;;  %v2962_v35 = vld [vmem:[#allocation15 + $0x138] sm:$0xff] }
 0x884   : > { %5423 = vmatprep.subr.bf16.mxu1 %v7815_v45  ;;  %v6280_v41 = vcombine.low %v2958_v34, %v2962_v35 }
 0x885   : > { %3823 = vmatpush1.bf16.msra.mxu0 %v6308_v33  ;;  %v2930_v33 = vld [vmem:[#allocation15 + $0x38] sm:$0xff] }
 0x886   : > { %3824 = vmatprep.subr.bf16.mxu0 %v6317_v53  ;;  %v6364_v53 = vcombine.low %v3044_v62, %v3048_v13  ;;  %v6249_v37 = vcombine.high %v2926_v39, %v2930_v33  ;;  %v6248_v27 = vcombine.low %v2926_v39, %v2930_v33  ;;  %v2990_v13 = vld [vmem:[#allocation15 + $0x218] sm:$0xff] }
 0x887   : > { %5424 = vmatpush1.bf16.msra.mxu1 %v7813_v47  ;;  %v7827_v39 = vld [vmem:[#allocation17 + $0x94] ss:$8 sps:$4 sm:$0xff]  }
 0x888   : > { %5425 = vmatprep.subr.bf16.mxu1 %v7818_v7  ;;  %v2974_v7 = vld [vmem:[#allocation15 + $0x198] sm:$0xff] }
 0x889   : > { %3825 = vmatpush1.bf16.msra.mxu0 %v6316_v50  ;;  %v6257_v50 = vcombine.high %v2934_v59, %v2938_v24  ;;  %v2998_v33 = vld [vmem:[#allocation15 + $0x258] sm:$0xff] }
 0x88a   : > { %3826 = vmatprep.subr.bf16.mxu0 %v6325_v29  ;;  %v2942_v29 = vld [vmem:[#allocation15 + $0x98] sm:$0xff] }
 0x88b   : > { %5426 = vmatpush1.bf16.msra.mxu1 %v7816_v9  ;;  %v6265_v6 = vcombine.high %v2942_v29, %v2946_v40  ;;  %v2986_v9 = vld [vmem:[#allocation15 + $0x1f8] sm:$0xff] }
 0x88c   : > { %5427 = vmatprep.subr.bf16.mxu1 %v7821_v3  ;;  %v7824_v3 = vld [vmem:[#allocation17 + $0x84] ss:$8 sps:$4 sm:$0xff]   ;;  %v6305_v62 = vcombine.high %v2982_v12, %v2986_v9 }
 0x88d   : > { %3827 = vmatpush1.bf16.msra.mxu0 %v6324_v32  ;;  %v2954_v32 = vld [vmem:[#allocation15 + $0xf8] sm:$0xff] }
 0x88e   : > { %3828 = vmatprep.subr.bf16.mxu0 %v6333_v30  ;;  %v6264_v30 = vcombine.low %v2942_v29, %v2946_v40  ;;  %v6273_v18 = vcombine.high %v2950_v43, %v2954_v32  ;;  %v6272_v45 = vcombine.low %v2950_v43, %v2954_v32  ;;  %v7830_v40 = vld [vmem:[#allocation17 + $0xa4] ss:$8 sps:$4 sm:$0xff]   ;;  %v3018_v43 = vld [vmem:[#allocation15 + $0x2f8] sm:$0xff] }
 0x88f   : > { %5428 = vmatpush1.bf16.msra.mxu1 %v7819_v14  ;;  %v2994_v14 = vld [vmem:[#allocation15 + $0x238] sm:$0xff] }
 0x890   : > { %5429 = vmatprep.subr.bf16.mxu1 %v7824_v3  ;;  %v6312_v59 = vcombine.low %v2990_v13, %v2994_v14  ;;  %v7834_v3 = vld [vmem:[#allocation17 + $0xc0] ss:$8 sps:$4 sm:$0xff]  }
 0x891   : > { %3829 = vmatpush1.bf16.msra.mxu0 %v6332_v15  ;;  %v6281_v15 = vcombine.high %v2958_v34, %v2962_v35  ;;  %v3026_v34 = vld [vmem:[#allocation15 + $0x338] sm:$0xff] }
 0x892   : > { %3830 = vmatprep.subr.bf16.mxu0 %v6341_v2  ;;  %v2966_v2 = vld [vmem:[#allocation15 + $0x158] sm:$0xff] }
 0x893   : > { %v6289_v47 = vcombine.high %v2966_v2, %v2970_v28 }
 0x895   : > { %3831 = vmatpush1.bf16.msra.mxu0 %v6340_v4  ;;  %v2978_v4 = vld [vmem:[#allocation15 + $0x1b8] sm:$0xff] }
 0x896   : > { %3832 = vmatprep.subr.bf16.mxu0 %v6349_v8  ;;  %v6288_v8 = vcombine.low %v2966_v2, %v2970_v28  ;;  %v6297_v22 = vcombine.high %v2974_v7, %v2978_v4  ;;  %v3034_v2 = vld [vmem:[#allocation15 + $0x378] sm:$0xff] }
 0x897   : > { %v7833_v28 = vld [vmem:[#allocation17 + $0xb4] ss:$8 sps:$4 sm:$0xff]  }
 0x899   : > { %3833 = vmatpush1.bf16.msra.mxu0 %v6348_v57  ;;  %v6296_v57 = vcombine.low %v2974_v7, %v2978_v4  ;;  %v3038_v4 = vld [vmem:[#allocation15 + $0x398] sm:$0xff] }
 0x89a   : > { %3834 = vmatprep.subr.bf16.mxu0 %v6357_v38  ;;  %v7822_v38 = vld [vmem:[#allocation17 + $0x80] ss:$8 sps:$4 sm:$0xff]  }
 0x89b   : > { %5430 = vmatpush1.bf16.msra.mxu1 %v7822_v38  ;;  %v3050_v38 = vld [vmem:[#allocation15 + $0x3f8] sm:$0xff] }
 0x89c   : > { %5431 = vmatprep.subr.bf16.mxu1 %v7827_v39  ;;  %v7842_v39 = vld [vmem:[#allocation17 + $0xe4] ss:$8 sps:$4 sm:$0xff]  }
 0x89d   : > { %3835 = vmatpush1.bf16.msra.mxu0 %v6356_v52  ;;  %v6304_v52 = vcombine.low %v2982_v12, %v2986_v9  ;;  %v7836_v12 = vld [vmem:[#allocation17 + $0xc4] ss:$8 sps:$4 sm:$0xff]  }
 0x89e   : > { %3836 = vmatprep.subr.bf16.mxu0 %v6365_v17  ;;  %v6313_v17 = vcombine.high %v2990_v13, %v2994_v14 }
 0x8a1   : > { %3837 = vmatpush1.bf16.msra.mxu0 %v6364_v53  ;;  %v3002_v53 = vld [vmem:[#allocation15 + $0x278] sm:$0xff] }
 0x8a2   : > { %3952 = vmatprep.subr.bf16.mxu0 %v6249_v37  ;;  %v7825_v37 = vld [vmem:[#allocation17 + $0x90] ss:$8 sps:$4 sm:$0xff]   ;;  %v6321_v24 = vcombine.high %v2998_v33, %v3002_v53  ;;  %v6320_v29 = vcombine.low %v2998_v33, %v3002_v53  ;;  %v7840_v33 = vld [vmem:[#allocation17 + $0xe0] ss:$8 sps:$4 sm:$0xff]   ;;  %v7845_v53 = vld [vmem:[#allocation17 + $0xf4] ss:$8 sps:$4 sm:$0xff]  }
 0x8a3   : > { %5432 = vmatpush1.bf16.msra.mxu1 %v7825_v37  ;;  %v7843_v37 = vld [vmem:[#allocation17 + $0xf0] ss:$8 sps:$4 sm:$0xff]  }
 0x8a4   : > { %3839 = vmatmul.mubr.bf16.vlgmr.msra.gmra.mrb[32].mxu0 %v11213_v60  ;;  %5433 = vmatprep.subr.bf16.mxu1 %v7830_v40 }
 0x8a5   : > { %3848 = vmatprep.mubr.bf16.mxu0 %v11236_v36  ;;  %3953 = vmatpush1.bf16.msra.mxu0 %v6248_v27  ;;  %v3006_v27 = vld [vmem:[#allocation15 + $0x298] sm:$0xff] }
 0x8a6   : > { %3954 = vmatprep.subr.bf16.mxu0 %v6257_v50  ;;  %v3010_v50 = vld [vmem:[#allocation15 + $0x2b8] sm:$0xff] }
 0x8a7   : > { %v6328_v32 = vcombine.low %v3006_v27, %v3010_v50 }
 0x8a9   : > { %3955 = vmatpush1.bf16.msra.mxu0 %v6256_v0  ;;  %v7828_v0 = vld [vmem:[#allocation17 + $0xa0] ss:$8 sps:$4 sm:$0xff]  }
 0x8aa   : > { %3956 = vmatprep.subr.bf16.mxu0 %v6265_v6  ;;  %v3014_v6 = vld [vmem:[#allocation15 + $0x2d8] sm:$0xff]  ;;  %5434 = vmatpush1.bf16.msra.mxu1 %v7828_v0 }
 0x8ab   : > { %v6336_v35 = vcombine.low %v3014_v6, %v3018_v43  ;;  %5435 = vmatprep.subr.bf16.mxu1 %v7833_v28 }
 0x8ac   : > { %3849 = vmatmul.mubr.bf16.gmra.mrb[36].mxu0 %v11238_v46 }
 0x8ad   : > { %3858 = vmatprep.mubr.bf16.mxu0 %v11252_v16  ;;  %3957 = vmatpush1.bf16.msra.mxu0 %v6264_v30  ;;  %v6337_v30 = vcombine.high %v3014_v6, %v3018_v43 }
 0x8ae   : > { %3958 = vmatprep.subr.bf16.mxu0 %v6273_v18  ;;  %v3022_v18 = vld [vmem:[#allocation15 + $0x318] sm:$0xff] }
 0x8b1   : > { %3959 = vmatpush1.bf16.msra.mxu0 %v6272_v45  ;;  %v6345_v45 = vcombine.high %v3022_v18, %v3026_v34 }
 0x8b2   : > { %3960 = vmatprep.subr.bf16.mxu0 %v6281_v15  ;;  %v3030_v15 = vld [vmem:[#allocation15 + $0x358] sm:$0xff] }
 0x8b3   : > { %v6353_v7 = vcombine.high %v3030_v15, %v3034_v2 }
 0x8b4   : > { %3859 = vmatmul.mubr.bf16.gmra.mrb[40].mxu0 %v11261_v19 }
 0x8b5   : > { %3868 = vmatprep.mubr.bf16.mxu0 %v11271_v1  ;;  %3961 = vmatpush1.bf16.msra.mxu0 %v6280_v41  ;;  %v6344_v41 = vcombine.low %v3022_v18, %v3026_v34 }
 0x8b6   : > { %3962 = vmatprep.subr.bf16.mxu0 %v6289_v47  ;;  %v7831_v47 = vld [vmem:[#allocation17 + $0xb0] ss:$8 sps:$4 sm:$0xff]  }
 0x8b7   : > { %5436 = vmatpush1.bf16.msra.mxu1 %v7831_v47 }
 0x8b8   : > { %5437 = vmatprep.subr.bf16.mxu1 %v7836_v12 }
 0x8b9   : > { %3963 = vmatpush1.bf16.msra.mxu0 %v6288_v8  ;;  %v3042_v8 = vld [vmem:[#allocation15 + $0x3b8] sm:$0xff] }
 0x8ba   : > { %3964 = vmatprep.subr.bf16.mxu0 %v6297_v22  ;;  %v6352_v22 = vcombine.low %v3030_v15, %v3034_v2  ;;  %v6361_v9 = vcombine.high %v3038_v4, %v3042_v8 }
 0x8bb   : > { %5438 = vmatpush1.bf16.msra.mxu1 %v7834_v3 }
 0x8bc   : > { %3869 = vmatmul.mubr.bf16.gmra.mrb[44].mxu0 %v11276_v20 }
 0x8bd   : > { %3965 = vmatpush1.bf16.msra.mxu0 %v6296_v57  ;;  %3984 = vmatprep.mubr.bf16.mxu0 %v11211_v63  ;;  %v6329_v63 = vcombine.high %v3006_v27, %v3010_v50  ;;  %v3046_v57 = vld [vmem:[#allocation15 + $0x3d8] sm:$0xff] }
 0x8be   : > { %3966 = vmatprep.subr.bf16.mxu0 %v6305_v62  ;;  %v6360_v62 = vcombine.low %v3038_v4, %v3042_v8  ;;  %v6369_v13 = vcombine.high %v3046_v57, %v3050_v38  ;;  %v6368_v14 = vcombine.low %v3046_v57, %v3050_v38 }
 0x8c1   : > { %3967 = vmatpush1.bf16.msra.mxu0 %v6304_v52  ;;  %v7839_v52 = vld [vmem:[#allocation17 + $0xd4] ss:$8 sps:$4 sm:$0xff]  }
 0x8c2   : > { %3968 = vmatprep.subr.bf16.mxu0 %v6313_v17  ;;  %v7837_v17 = vld [vmem:[#allocation17 + $0xd0] ss:$8 sps:$4 sm:$0xff]   ;;  %5439 = vmatprep.subr.bf16.mxu1 %v7839_v52 }
 0x8c3   : > { %5440 = vmatpush1.bf16.msra.mxu1 %v7837_v17 }
 0x8c4   : > { %5441 = vmatprep.subr.bf16.mxu1 %v7842_v39 }
 0x8c5   : > { %3969 = vmatpush1.bf16.msra.mxu0 %v6312_v59  ;;  %v7848_v59 = vld [vmem:[#allocation17 + $0x104] ss:$8 sps:$4 sm:$0xff]  }
 0x8c6   : > { %3970 = vmatprep.subr.bf16.mxu0 %v6321_v24 }
 0x8c7   : > { %5442 = vmatpush1.bf16.msra.mxu1 %v7840_v33  ;;  %v7903_v33 = vld [vmem:[#allocation17 + $0x310] ss:$8 sps:$4 sm:$0xff]  }
 0x8c8   : > { %5443 = vmatprep.subr.bf16.mxu1 %v7845_v53 }
 0x8c9   : > { %3971 = vmatpush1.bf16.msra.mxu0 %v6320_v29 }
 0x8ca   : > { %3972 = vmatprep.subr.bf16.mxu0 %v6329_v63 }
 0x8cb   : > { %5444 = vmatpush1.bf16.msra.mxu1 %v7843_v37 }
 0x8cc   : > { %5486 = vmatprep.subr.bf16.mxu1 %v7848_v59 }
 0x8cd   : > { %3973 = vmatpush1.bf16.msra.mxu0 %v6328_v32 }
 0x8ce   : > { %3974 = vmatprep.subr.bf16.mxu0 %v6337_v30 }
 0x8d1   : > { %3975 = vmatpush1.bf16.msra.mxu0 %v6336_v35 }
 0x8d2   : > { %3976 = vmatprep.subr.bf16.mxu0 %v6345_v45 }
 0x8d5   : > { %3977 = vmatpush1.bf16.msra.mxu0 %v6344_v41 }
 0x8d6   : > { %3978 = vmatprep.subr.bf16.mxu0 %v6353_v7  ;;  %v7897_v7 = vld [vmem:[#allocation17 + $0x300] ss:$8 sps:$4 sm:$0xff]  }
 0x8d9   : > { %3979 = vmatpush1.bf16.msra.mxu0 %v6352_v22 }
 0x8da   : > { %3980 = vmatprep.subr.bf16.mxu0 %v6361_v9  ;;  %v7899_v9 = vld [vmem:[#allocation17 + $0x304] ss:$8 sps:$4 sm:$0xff]  }
 0x8dd   : > { %3981 = vmatpush1.bf16.msra.mxu0 %v6360_v62 }
 0x8de   : > { %3982 = vmatprep.subr.bf16.mxu0 %v6369_v13  ;;  %v7905_v13 = vld [vmem:[#allocation17 + $0x314] ss:$8 sps:$4 sm:$0xff]  }
 0x8e1   : > { %3983 = vmatpush1.bf16.msra.mxu0 %v6368_v14 }
 0x8e2   : > { %5632 = vmatprep.subr.bf16.mxu0 %v7899_v9 }
 0x8e4   : > { %3985 = vmatmul.mubr.bf16.vlgmr.msra.gmra.mrb[48].mxu0 %v11213_v60  ;;  %v12714_v60 = vld [vmem:[#allocation42_spill] sm:$0xff] }
 0x8e5   : > { %3994 = vmatprep.mubr.bf16.mxu0 %v11236_v36  ;;  %v3071_v36 = vsub.s32 4, %v12714_v60  ;;  %v3063_v27 = vsub.s32 2, %v12714_v60  ;;  %5633 = vmatpush1.bf16.msra.mxu0 %v7897_v7 }
 0x8e6   : > { %5634 = vmatprep.subr.bf16.mxu0 %v7905_v13 }
 0x8e9   : > { %5635 = vmatpush1.bf16.msra.mxu0 %v7903_v33  ;;  %v7909_v33 = vld [vmem:[#allocation17 + $0x320] ss:$8 sps:$4 sm:$0xff]  }
 0x8ec   : > { %3995 = vmatmul.mubr.bf16.gmra.mrb[52].mxu0 %v11238_v46  ;;  %v11300_v46 = vld [vmem:[%s12715_s1] sm:$0xff] }
 0x8ed   : > { %4004 = vmatprep.mubr.bf16.mxu0 %v11252_v16  ;;  %v3075_v16 = vsub.s32 5, %v12714_v60  ;;  %v11305_v24 = vrot.slane %v11300_v46, %v12678_v10  ;;  %v11327_v34 = vrot.slane %v11300_v46, %v3063_v27  ;;  %v7945_v10 = vld [vmem:[#allocation17 + $0x380] ss:$8 sps:$4 sm:$0xff]  }
 0x8f4   : > { %4005 = vmatmul.mubr.bf16.gmra.mrb[56].mxu0 %v11261_v19  ;;  %v11308_v19 = vrot.slane %v11300_v46, %v3071_v36 }
 0x8f5   : > { %4014 = vmatprep.mubr.bf16.mxu0 %v11271_v1  ;;  %v11312_v1 = vrot.slane %v11300_v46, %v12679_v51 }
 0x8fc   : > { %4015 = vmatmul.mubr.bf16.gmra.mrb[60].mxu0 %v11276_v20  ;;  %v11315_v20 = vrot.slane %v11300_v46, %v3075_v16 }
 0x937   : > { %v3767_v50 = vpop.f32.mrb[16].mxu0  ;;  %v3913_v29 = vpop.f32.mrb[0].mxu1 }
 0x938   : > { %v3768_v40 = vadd.f32 %v3767_v50, %v11305_v24  ;;  %v3914_v63 = vadd.f32 %v3913_v29, %v11308_v19  ;;  %v3769_v0 = vpop.f32.mrb[17].mxu0  ;;  %v3915_v6 = vpop.f32.mrb[1].mxu1 }
 0x939   : > { %v11321_v43 = vadd.f32 %v3769_v0, %v11312_v1  ;;  %v11324_v32 = vadd.f32 %v3915_v6, %v11315_v20  ;;  %v3771_v30 = vpop.f32.mrb[18].mxu0  ;;  %v3917_v18 = vpop.f32.mrb[2].mxu1 }
 0x93a   : > { %v11330_v45 = vmul.f32 0.5, %v3768_v40  ;;  %v4089_v15 = vmul.f32 %v3768_v40, %v3768_v40  ;;  %v11332_v2 = vmul.f32 0.5, %v3914_v63  ;;  %v4093_v28 = vmul.f32 %v3914_v63, %v3914_v63  ;;  %v3773_v41 = vpop.f32.mrb[19].mxu0  ;;  %v3919_v47 = vpop.f32.mrb[3].mxu1 }
 0x93b   : > { %v4090_v4 = vmul.f32 %v11321_v43, %v11321_v43  ;;  %v4094_v8 = vmul.f32 %v11324_v32, %v11324_v32  ;;  %v3772_v22 = vadd.f32 %v3771_v30, %v11305_v24  ;;  %v3918_v12 = vadd.f32 %v3917_v18, %v11308_v19 }
 0x93c   : > { %v4153_v3 = vmul.f32 %v4089_v15, %v3768_v40  ;;  %v4157_v57 = vmul.f32 %v4093_v28, %v3914_v63  ;;  %v11341_v38 = vadd.f32 %v3773_v41, %v11312_v1  ;;  %v11344_v62 = vadd.f32 %v3919_v47, %v11315_v20 }
 0x93d   : > { %v4154_v14 = vmul.f32 %v4090_v4, %v11321_v43  ;;  %v4158_v52 = vmul.f32 %v4094_v8, %v11324_v32  ;;  %v11348_v17 = vmul.f32 0.5, %v3772_v22  ;;  %v4097_v39 = vmul.f32 %v3772_v22, %v3772_v22 }
 0x93e   : > { %v4217_v53 = vmul.f32 0.044715, %v4153_v3  ;;  %v4221_v37 = vmul.f32 0.044715, %v4157_v57  ;;  %v11350_v59 = vmul.f32 0.5, %v3918_v12  ;;  %v4101_v36 = vmul.f32 %v3918_v12, %v3918_v12 }
 0x93f   : > { %v4218_v16 = vmul.f32 0.044715, %v4154_v14  ;;  %v4222_v27 = vmul.f32 0.044715, %v4158_v52  ;;  %v4161_v50 = vmul.f32 %v4097_v39, %v3772_v22  ;;  %v4098_v29 = vmul.f32 %v11341_v38, %v11341_v38  ;;  %v3777_v0 = vpop.f32.mrb[20].mxu0  ;;  %v3923_v6 = vpop.f32.mrb[4].mxu1 }
 0x940   : > { %v4281_v30 = vadd.f32 %v4217_v53, %v3768_v40  ;;  %v4285_v18 = vadd.f32 %v4221_v37, %v3914_v63  ;;  %v4165_v15 = vmul.f32 %v4101_v36, %v3918_v12  ;;  %v4102_v28 = vmul.f32 %v11344_v62, %v11344_v62  ;;  %v3779_v41 = vpop.f32.mrb[21].mxu0  ;;  %v3925_v47 = vpop.f32.mrb[5].mxu1 }
 0x941   : > { %v4282_v4 = vadd.f32 %v4218_v16, %v11321_v43  ;;  %v4286_v7 = vadd.f32 %v4222_v27, %v11324_v32  ;;  %v4225_v8 = vmul.f32 0.044715, %v4161_v50  ;;  %v4162_v9 = vmul.f32 %v4098_v29, %v11341_v38  ;;  %v3781_v3 = vpop.f32.mrb[22].mxu0  ;;  %v3927_v57 = vpop.f32.mrb[6].mxu1 }
 0x942   : > { %v4345_v14 = vmul.f32 0.7978846, %v4281_v30  ;;  %v4349_v52 = vmul.f32 0.7978846, %v4285_v18  ;;  %v4229_v13 = vmul.f32 0.044715, %v4165_v15  ;;  %v4166_v40 = vmul.f32 %v4102_v28, %v11344_v62 }
 0x943   : > { %v4346_v63 = vmul.f32 0.7978846, %v4282_v4  ;;  %v4350_v39 = vmul.f32 0.7978846, %v4286_v7  ;;  %v4289_v53 = vadd.f32 %v4225_v8, %v3772_v22  ;;  %v4226_v37 = vmul.f32 0.044715, %v4162_v9 }
 0x944   : > { %8038 = vtanh.f32 %v4345_v14  ;;  %v4293_v36 = vadd.f32 %v4229_v13, %v3918_v12  ;;  %v4230_v16 = vmul.f32 0.044715, %v4166_v40  ;;  %v11361_v27 = vadd.f32 %v3777_v0, %v11305_v24  ;;  %v3783_v50 = vpop.f32.mrb[23].mxu0  ;;  %v3929_v29 = vpop.f32.mrb[7].mxu1  ;;  %v7911_v15 = vld [vmem:[#allocation17 + $0x324] ss:$8 sps:$4 sm:$0xff]  }
 0x945   : > { %8040 = vtanh.f32 %v4349_v52  ;;  %v4353_v35 = vmul.f32 0.7978846, %v4289_v53  ;;  %v4290_v30 = vadd.f32 %v4226_v37, %v11341_v38  ;;  %v11365_v18 = vadd.f32 %v3923_v6, %v11308_v19  ;;  %5636 = vmatprep.subr.bf16.mxu0 %v7911_v15 }
 0x946   : > { %8042 = vtanh.f32 %v4346_v63  ;;  %v4357_v22 = vmul.f32 0.7978846, %v4293_v36  ;;  %v4294_v28 = vadd.f32 %v4230_v16, %v11344_v62  ;;  %v4105_v12 = vmul.f32 %v11361_v27, %v11361_v27  ;;  %5637 = vmatpush1.bf16.msra.mxu0 %v7909_v33  ;;  %v7915_v63 = vld [vmem:[#allocation17 + $0x330] ss:$8 sps:$4 sm:$0xff]  }
 0x947   : > { %12716 = vst [vmem:[#allocation61_spill] sm:$0xff] %v11365_v18  ;;  %8044 = vtanh.f32 %v4350_v39  ;;  %v4354_v0 = vmul.f32 0.7978846, %v4290_v30  ;;  %v4109_v4 = vmul.f32 %v11365_v18, %v11365_v18  ;;  %v11373_v7 = vadd.f32 %v3779_v41, %v11312_v1  ;;  %v11375_v8 = vpop.f32.mrb[24].mxu0  ;;  %v11377_v6 = vpop.f32.mrb[8].mxu1 }
 0x948   : > { %8046 = vtanh.f32 %v4353_v35  ;;  %v4169_v9 = vmul.f32 %v4105_v12, %v11361_v27  ;;  %v11381_v14 = vadd.f32 %v3925_v47, %v11315_v20  ;;  %v11383_v52 = vpop.f32.mrb[25].mxu0  ;;  %v11385_v13 = vpop.f32.mrb[9].mxu1  ;;  %v12717_v40 = vsub.s32 3, %v12714_v60  ;;  %v7917_v39 = vld [vmem:[#allocation17 + $0x334] ss:$8 sps:$4 sm:$0xff]  }
 0x949   : > { %8048 = vtanh.f32 %v4357_v22  ;;  %v4173_v35 = vmul.f32 %v4109_v4, %v11365_v18  ;;  %v4106_v53 = vmul.f32 %v11373_v7, %v11373_v7  ;;  %v11396_v47 = vadd.f32 %v3781_v3, %v11305_v24  ;;  %v11398_v37 = vpop.f32.mrb[26].mxu0  ;;  %v11400_v36 = vpop.f32.mrb[10].mxu1  ;;  %5638 = vmatprep.subr.bf16.mxu0 %v7917_v39  ;;  %v7921_v39 = vld [vmem:[#allocation17 + $0x340] ss:$8 sps:$4 sm:$0xff]  }
 0x94a   : > { %v11390_v41 = vrot.slane %v11300_v46, %v12717_v40  ;;  %v4358_v16 = vmul.f32 0.7978846, %v4294_v28  ;;  %v4233_v30 = vmul.f32 0.044715, %v4169_v9  ;;  %v4110_v46 = vmul.f32 %v11381_v14, %v11381_v14  ;;  %v11407_v15 = vpop.f32.mrb[27].mxu0  ;;  %v11409_v22 = vpop.f32.mrb[11].mxu1  ;;  %5639 = vmatpush1.bf16.msra.mxu0 %v7915_v63 }
 0x94b   : > { %v11405_v33 = vadd.f32 %v3927_v57, %v11308_v19  ;;  %8050 = vtanh.f32 %v4354_v0  ;;  %v4237_v3 = vmul.f32 0.044715, %v4173_v35  ;;  %v4170_v12 = vmul.f32 %v4106_v53, %v11373_v7  ;;  %v7923_v28 = vld [vmem:[#allocation17 + $0x344] ss:$8 sps:$4 sm:$0xff]   ;;  %v7927_v63 = vld [vmem:[#allocation17 + $0x350] ss:$8 sps:$4 sm:$0xff]  }
 0x94c   : > { %v4113_v4 = vmul.f32 %v11396_v47, %v11396_v47  ;;  %v4297_v9 = vadd.f32 %v4233_v30, %v11361_v27  ;;  %v4174_v40 = vmul.f32 %v4110_v46, %v11381_v14  ;;  %v11419_v26 = vadd.f32 %v3783_v50, %v11312_v1  ;;  %5640 = vmatprep.subr.bf16.mxu0 %v7923_v28  ;;  %v7929_v30 = vld [vmem:[#allocation17 + $0x354] ss:$8 sps:$4 sm:$0xff]  }
 0x94d   : > { %12718 = vst [vmem:[#allocation62_spill] sm:$0xff] %v11405_v33  ;;  %v4117_v57 = vmul.f32 %v11405_v33, %v11405_v33  ;;  %v4301_v0 = vadd.f32 %v4237_v3, %v11365_v18  ;;  %v4234_v35 = vmul.f32 0.044715, %v4170_v12  ;;  %v11424_v55 = vadd.f32 %v3929_v29, %v11315_v20 }
 0x94e   : > { %v4177_v53 = vmul.f32 %v4113_v4, %v11396_v47  ;;  %v8039_v23 = vpop.eup %8038  ;;  %v4361_v46 = vmul.f32 0.7978846, %v4297_v9  ;;  %v4238_v42 = vmul.f32 0.044715, %v4174_v40  ;;  %v4114_v50 = vmul.f32 %v11419_v26, %v11419_v26  ;;  %5641 = vmatpush1.bf16.msra.mxu0 %v7921_v39 }
 0x94f   : > { %v4181_v48 = vmul.f32 %v4117_v57, %v11405_v33  ;;  %v8041_v44 = vpop.eup %8040  ;;  %v4473_v49 = vadd.f32 1.0, %v8039_v23  ;;  %v4365_v3 = vmul.f32 0.7978846, %v4301_v0  ;;  %v4298_v12 = vadd.f32 %v4234_v35, %v11373_v7  ;;  %v11430_v21 = vpop.f32.mrb[28].mxu0  ;;  %5642 = vmatprep.subr.bf16.mxu0 %v7929_v30 }
 0x950   : > { %v4241_v4 = vmul.f32 0.044715, %v4177_v53  ;;  %v11432_v29 = vpop.eup %8042  ;;  %v4477_v28 = vadd.f32 1.0, %v8041_v44  ;;  %8052 = vtanh.f32 %v4358_v16  ;;  %v4302_v9 = vadd.f32 %v4238_v42, %v11381_v14  ;;  %v11435_v57 = vpop.f32.mrb[12].mxu1 }
 0x951   : > { %v4245_v40 = vmul.f32 0.044715, %v4181_v48  ;;  %v11437_v61 = vpop.f32.mrb[29].mxu0  ;;  %v11439_v58 = vpop.eup %8044  ;;  %v11442_v23 = vmul.f32 %v4473_v49, %v11330_v45  ;;  %8054 = vtanh.f32 %v4361_v46  ;;  %v4362_v0 = vmul.f32 0.7978846, %v4298_v12 }
 0x952   : > { %v4305_v35 = vadd.f32 %v4241_v4, %v11396_v47  ;;  %v11445_v53 = vpop.f32.mrb[13].mxu1  ;;  %v11447_v44 = vpop.f32.mrb[30].mxu0  ;;  %8056 = vtanh.f32 %v4365_v3  ;;  %v4366_v42 = vmul.f32 0.7978846, %v4302_v9  ;;  %v4178_v39 = vmul.f32 %v4114_v50, %v11419_v26  ;;  %5643 = vmatpush1.bf16.msra.mxu0 %v7927_v63  ;;  %v7933_v50 = vld [vmem:[#allocation17 + $0x360] ss:$8 sps:$4 sm:$0xff]  }
 0x953   : > { %v8047_v48 = vpop.eup %8046  ;;  %v4309_v16 = vadd.f32 %v4245_v40, %v11405_v33  ;;  %v11451_v56 = vpop.f32.mrb[14].mxu1  ;;  %8058 = vtanh.f32 %v4362_v0  ;;  %v4118_v4 = vmul.f32 %v11424_v55, %v11424_v55  ;;  %v11460_v30 = vmul.f32 %v4477_v28, %v11332_v2 }
 0x954   : > { %v11453_v49 = vpop.f32.mrb[31].mxu0  ;;  %v8049_v45 = vpop.eup %8048  ;;  %v4481_v46 = vadd.f32 1.0, %v8047_v48  ;;  %v4369_v12 = vmul.f32 0.7978846, %v4305_v35  ;;  %8060 = vtanh.f32 %v4366_v42  ;;  %v4242_v9 = vmul.f32 0.044715, %v4178_v39 }
 0x955   : > { %v11457_v5 = vpop.f32.mrb[15].mxu1  ;;  %v4373_v3 = vmul.f32 0.7978846, %v4309_v16  ;;  %v11462_v40 = vpop.eup %8050  ;;  %v11464_v25 = vadd.f32 1.0, %v8049_v45  ;;  %v4182_v0 = vmul.f32 %v4118_v4, %v11424_v55  ;;  %v11469_v35 = vadd.f32 %v11375_v8, %v11305_v24  ;;  %v7935_v48 = vld [vmem:[#allocation17 + $0x364] ss:$8 sps:$4 sm:$0xff]  }
 0x956   : > { %8062 = vtanh.f32 %v4369_v12  ;;  %v11472_v2 = vmul.f32 %v4481_v46, %v11348_v17  ;;  %v4306_v28 = vadd.f32 %v4242_v9, %v11419_v26  ;;  %v11477_v63 = vadd.f32 %v11377_v6, %v11308_v19  ;;  %v7941_v42 = vld [vmem:[#allocation17 + $0x374] ss:$8 sps:$4 sm:$0xff]   ;;  %5644 = vmatprep.subr.bf16.mxu0 %v7935_v48 }
 0x957   : > { %8064 = vtanh.f32 %v4373_v3  ;;  %v4246_v16 = vmul.f32 0.044715, %v4182_v0  ;;  %v4121_v39 = vmul.f32 %v11469_v35, %v11469_v35  ;;  %v11483_v8 = vadd.f32 %v11383_v52, %v11312_v1  ;;  %5645 = vmatpush1.bf16.msra.mxu0 %v7933_v50  ;;  %v7939_v52 = vld [vmem:[#allocation17 + $0x370] ss:$8 sps:$4 sm:$0xff]   ;;  %v7947_v0 = vld [vmem:[#allocation17 + $0x384] ss:$8 sps:$4 sm:$0xff]  }
 0x958   : > { %12719 = vst [vmem:[#allocation63_spill] sm:$0xff] %v11477_v63  ;;  %v11487_v17 = vadd.f32 %v11385_v13, %v11315_v20  ;;  %v4370_v45 = vmul.f32 0.7978846, %v4306_v28  ;;  %v4125_v46 = vmul.f32 %v11477_v63, %v11477_v63  ;;  %v11493_v6 = vadd.f32 %v11398_v37, %v11305_v24  ;;  %5646 = vmatprep.subr.bf16.mxu0 %v7941_v42 }
 0x959   : > { %v11497_v12 = vadd.f32 %v11400_v36, %v11308_v19  ;;  %v4310_v4 = vadd.f32 %v4246_v16, %v11424_v55  ;;  %v4185_v13 = vmul.f32 %v4121_v39, %v11469_v35  ;;  %v4122_v3 = vmul.f32 %v11483_v8, %v11483_v8 }
 0x95a   : > { %12720 = vst [vmem:[#allocation64_spill] sm:$0xff] %v11487_v17  ;;  %v4126_v9 = vmul.f32 %v11487_v17, %v11487_v17  ;;  %v11505_v37 = vpop.eup %8052  ;;  %8066 = vtanh.f32 %v4370_v45  ;;  %v4189_v36 = vmul.f32 %v4125_v46, %v11477_v63  ;;  %v4129_v50 = vmul.f32 %v11493_v6, %v11493_v6 }
 0x95b   : > { %12721 = vst [vmem:[#allocation65_spill] sm:$0xff] %v11497_v12  ;;  %v4133_v48 = vmul.f32 %v11497_v12, %v11497_v12  ;;  %v11512_v28 = vpop.eup %8054  ;;  %v4374_v16 = vmul.f32 0.7978846, %v4310_v4  ;;  %v4249_v39 = vmul.f32 0.044715, %v4185_v13  ;;  %v4186_v54 = vmul.f32 %v4122_v3, %v11483_v8  ;;  %5647 = vmatpush1.bf16.msra.mxu0 %v7939_v52 }
 0x95c   : > { %v4190_v42 = vmul.f32 %v4126_v9, %v11487_v17  ;;  %v11516_v31 = vpop.eup %8056  ;;  %v4253_v11 = vmul.f32 0.044715, %v4189_v36  ;;  %v4193_v45 = vmul.f32 %v4129_v50, %v11493_v6  ;;  %v11522_v51 = vadd.f32 %v11407_v15, %v11312_v1  ;;  %5648 = vmatprep.subr.bf16.mxu0 %v7947_v0  ;;  %v7953_v9 = vld [vmem:[#allocation17 + $0x394] ss:$8 sps:$4 sm:$0xff]  }
 0x95d   : > { %12722 = vst [vmem:[#allocation66_spill] sm:$0xff] %v11516_v31  ;;  %v4197_v46 = vmul.f32 %v4133_v48, %v11497_v12  ;;  %v11524_v33 = vpop.eup %8058  ;;  %8068 = vtanh.f32 %v4374_v16  ;;  %v4313_v4 = vadd.f32 %v4249_v39, %v11469_v35  ;;  %v4250_v13 = vmul.f32 0.044715, %v4186_v54 }
 0x95e   : > { %v4254_v3 = vmul.f32 0.044715, %v4190_v42  ;;  %v11527_v36 = vpop.eup %8060  ;;  %v4317_v50 = vadd.f32 %v4253_v11, %v11477_v63  ;;  %v4257_v48 = vmul.f32 0.044715, %v4193_v45  ;;  %v4130_v15 = vmul.f32 %v11522_v51, %v11522_v51  ;;  %v7951_v63 = vld [vmem:[#allocation17 + $0x390] ss:$8 sps:$4 sm:$0xff]  }
 0x95f   : > { %v4261_v31 = vmul.f32 0.044715, %v4197_v46  ;;  %v4377_v18 = vmul.f32 0.7978846, %v4313_v4  ;;  %v4314_v16 = vadd.f32 %v4250_v13, %v11483_v8  ;;  %v11538_v54 = vadd.f32 %v11409_v22, %v11315_v20  ;;  %5649 = vmatpush1.bf16.msra.mxu0 %v7945_v10  ;;  %v7959_v22 = vld [vmem:[#allocation17 + $0x3a4] ss:$8 sps:$4 sm:$0xff]  }
 0x960   : > { %v11532_v52 = vpop.eup %8062  ;;  %v4318_v39 = vadd.f32 %v4254_v3, %v11487_v17  ;;  %v4381_v42 = vmul.f32 0.7978846, %v4317_v50  ;;  %v4321_v11 = vadd.f32 %v4257_v48, %v11493_v6  ;;  %v4194_v46 = vmul.f32 %v4130_v15, %v11522_v51  ;;  %5650 = vmatprep.subr.bf16.mxu0 %v7953_v9 }
 0x961   : > { %v11540_v0 = vpop.eup %8064  ;;  %v4325_v45 = vadd.f32 %v4261_v31, %v11497_v12  ;;  %8070 = vtanh.f32 %v4377_v18  ;;  %v4378_v4 = vmul.f32 0.7978846, %v4314_v16  ;;  %v4134_v3 = vmul.f32 %v11538_v54, %v11538_v54 }
 0x962   : > { %12723 = vst [vmem:[#allocation67_spill] sm:$0xff] %v11540_v0  ;;  %v4382_v13 = vmul.f32 0.7978846, %v4318_v39  ;;  %8072 = vtanh.f32 %v4381_v42  ;;  %v4385_v17 = vmul.f32 0.7978846, %v4321_v11  ;;  %v11550_v31 = vadd.f32 %v11430_v21, %v11305_v24 }
 0x963   : > { %v4389_v0 = vmul.f32 0.7978846, %v4325_v45  ;;  %v4258_v50 = vmul.f32 0.044715, %v4194_v46  ;;  %8074 = vtanh.f32 %v4378_v4  ;;  %v4198_v48 = vmul.f32 %v4134_v3, %v11538_v54  ;;  %5651 = vmatpush1.bf16.msra.mxu0 %v7951_v63  ;;  %v7957_v21 = vld [vmem:[#allocation17 + $0x3a0] ss:$8 sps:$4 sm:$0xff]  }
 0x964   : > { %v11554_v10 = vadd.f32 %v11435_v57, %v11308_v19  ;;  %v11556_v18 = vpop.eup %8066  ;;  %8076 = vtanh.f32 %v4382_v13  ;;  %v11561_v15 = vadd.f32 %v11437_v61, %v11312_v1  ;;  %v11565_v16 = vadd.f32 %v11445_v53, %v11315_v20  ;;  %5652 = vmatprep.subr.bf16.mxu0 %v7959_v22  ;;  %v7965_v11 = vld [vmem:[#allocation17 + $0x3b4] ss:$8 sps:$4 sm:$0xff]  }
 0x965   : > { %v4322_v9 = vadd.f32 %v4258_v50, %v11522_v51  ;;  %8078 = vtanh.f32 %v4385_v17  ;;  %v4262_v39 = vmul.f32 0.044715, %v4198_v48  ;;  %v4137_v57 = vmul.f32 %v11550_v31, %v11550_v31  ;;  %v7963_v50 = vld [vmem:[#allocation17 + $0x3b0] ss:$8 sps:$4 sm:$0xff]   ;;  %v7971_v48 = vld [vmem:[#allocation17 + $0x3c4] ss:$8 sps:$4 sm:$0xff]  }
 0x966   : > { %12724 = vst [vmem:[#allocation68_spill] sm:$0xff] %v11554_v10  ;;  %12725 = vst [vmem:[#allocation26_spill] sm:$0xff] %v11565_v16  ;;  %v4141_v42 = vmul.f32 %v11554_v10, %v11554_v10  ;;  %8080 = vtanh.f32 %v4389_v0  ;;  %v4138_v61 = vmul.f32 %v11561_v15, %v11561_v15  ;;  %v4142_v53 = vmul.f32 %v11565_v16, %v11565_v16 }
 0x967   : > { %v4386_v45 = vmul.f32 0.7978846, %v4322_v9  ;;  %v11575_v63 = vpop.eup %8068  ;;  %v4326_v17 = vadd.f32 %v4262_v39, %v11538_v54  ;;  %v4201_v46 = vmul.f32 %v4137_v57, %v11550_v31  ;;  %v11582_v13 = vadd.f32 %v11447_v44, %v11305_v24  ;;  %5653 = vmatpush1.bf16.msra.mxu0 %v7957_v21 }
 0x968   : > { %v4205_v4 = vmul.f32 %v4141_v42, %v11554_v10  ;;  %v4202_v0 = vmul.f32 %v4138_v61, %v11561_v15  ;;  %v4206_v3 = vmul.f32 %v4142_v53, %v11565_v16  ;;  %v11588_v22 = vadd.f32 %v11451_v56, %v11308_v19  ;;  %5654 = vmatprep.subr.bf16.mxu0 %v7965_v11 }
 0x969   : > { %8082 = vtanh.f32 %v4386_v45  ;;  %v4390_v9 = vmul.f32 0.7978846, %v4326_v17  ;;  %v4265_v39 = vmul.f32 0.044715, %v4201_v46  ;;  %v4145_v42 = vmul.f32 %v11582_v13, %v11582_v13 }
 0x96a   : > { %v4269_v57 = vmul.f32 0.044715, %v4205_v4  ;;  %v4266_v24 = vmul.f32 0.044715, %v4202_v0  ;;  %v4270_v44 = vmul.f32 0.044715, %v4206_v3  ;;  %v4149_v45 = vmul.f32 %v11588_v22, %v11588_v22 }
 0x96b   : > { %v11596_v61 = vadd.f32 %v11453_v49, %v11312_v1  ;;  %v11598_v56 = vpop.eup %8070  ;;  %8084 = vtanh.f32 %v4390_v9  ;;  %v4329_v19 = vadd.f32 %v4265_v39, %v11550_v31  ;;  %v4209_v53 = vmul.f32 %v4145_v42, %v11582_v13  ;;  %5655 = vmatpush1.bf16.msra.mxu0 %v7963_v50  ;;  %v7969_v49 = vld [vmem:[#allocation17 + $0x3c0] ss:$8 sps:$4 sm:$0xff]   ;;  %v7977_v0 = vld [vmem:[#allocation17 + $0x3d4] ss:$8 sps:$4 sm:$0xff]  }
 0x96c   : > { %v4333_v21 = vadd.f32 %v4269_v57, %v11554_v10  ;;  %v11603_v17 = vpop.eup %8072  ;;  %v4330_v11 = vadd.f32 %v4266_v24, %v11561_v15  ;;  %v4334_v46 = vadd.f32 %v4270_v44, %v11565_v16  ;;  %v4213_v4 = vmul.f32 %v4149_v45, %v11588_v22  ;;  %5656 = vmatprep.subr.bf16.mxu0 %v7971_v48 }
 0x96d   : > { %v4146_v1 = vmul.f32 %v11596_v61, %v11596_v61  ;;  %v11610_v3 = vpop.eup %8074  ;;  %v4393_v9 = vmul.f32 0.7978846, %v4329_v19  ;;  %v4273_v57 = vmul.f32 0.044715, %v4209_v53  ;;  %v11614_v42 = vadd.f32 %v11457_v5, %v11315_v20 }
 0x96e   : > { %v4397_v39 = vmul.f32 0.7978846, %v4333_v21  ;;  %v11616_v24 = vpop.eup %8076  ;;  %v4394_v44 = vmul.f32 0.7978846, %v4330_v11  ;;  %v4398_v45 = vmul.f32 0.7978846, %v4334_v46 }
 0x96f   : > { %v4277_v10 = vmul.f32 0.044715, %v4213_v4  ;;  %v4210_v16 = vmul.f32 %v4146_v1, %v11596_v61  ;;  %v11619_v50 = vpop.eup %8078  ;;  %8086 = vtanh.f32 %v4393_v9  ;;  %v4337_v12 = vadd.f32 %v4273_v57, %v11582_v13  ;;  %5657 = vmatpush1.bf16.msra.mxu0 %v7969_v49  ;;  %v7975_v11 = vld [vmem:[#allocation17 + $0x3d0] ss:$8 sps:$4 sm:$0xff]   ;;  %v7983_v9 = vld [vmem:[#allocation17 + $0x3e4] ss:$8 sps:$4 sm:$0xff]  }
 0x970   : > { %v4150_v19 = vmul.f32 %v11614_v42, %v11614_v42  ;;  %v4026_v21 = vmul.f32 0.5, %v11321_v43  ;;  %v11625_v5 = vpop.eup %8080  ;;  %8088 = vtanh.f32 %v4397_v39  ;;  %v4034_v53 = vmul.f32 0.5, %v11341_v38  ;;  %5658 = vmatprep.subr.bf16.mxu0 %v7977_v0  ;;  %v7981_v0 = vld [vmem:[#allocation17 + $0x3e0] ss:$8 sps:$4 sm:$0xff]  }
 0x971   : > { %v4341_v20 = vadd.f32 %v4277_v10, %v11588_v22  ;;  %v4274_v48 = vmul.f32 0.044715, %v4210_v16  ;;  %8090 = vtanh.f32 %v4394_v44  ;;  %v4401_v46 = vmul.f32 0.7978846, %v4337_v12 }
 0x972   : > { %v4214_v4 = vmul.f32 %v4150_v19, %v11614_v42  ;;  %v4474_v1 = vadd.f32 1.0, %v11432_v29  ;;  %8092 = vtanh.f32 %v4398_v45  ;;  %v4482_v10 = vadd.f32 1.0, %v11462_v40 }
 0x973   : > { %v8083_v57 = vpop.eup %8082  ;;  %v4405_v43 = vmul.f32 0.7978846, %v4341_v20  ;;  %v4338_v39 = vadd.f32 %v4274_v48, %v11596_v61  ;;  %8094 = vtanh.f32 %v4401_v46  ;;  %v4601_v49 = vpack.c.bf16 %v11472_v2, %v11442_v23  ;;  %5659 = vmatpush1.bf16.msra.mxu0 %v7975_v11  ;;  %v7989_v48 = vld [vmem:[#allocation17 + $0x3f4] ss:$8 sps:$4 sm:$0xff]   ;;  %v7846_v2 = vld [vmem:[#allocation17 + $0x100] ss:$8 sps:$4 sm:$0xff]  }
 0x974   : > { %v4278_v16 = vmul.f32 0.044715, %v4214_v4  ;;  %v4538_v38 = vmul.f32 %v4474_v1, %v4026_v21  ;;  %v4546_v44 = vmul.f32 %v4482_v10, %v4034_v53  ;;  %v4042_v29 = vmul.f32 0.5, %v11373_v7  ;;  %5660 = vmatprep.subr.bf16.mxu0 %v7983_v9  ;;  %v7851_v53 = vld [vmem:[#allocation17 + $0x114] ss:$8 sps:$4 sm:$0xff]  }
 0x975   : > { %8096 = vtanh.f32 %v4405_v43  ;;  %v4402_v12 = vmul.f32 0.7978846, %v4338_v39  ;;  %v11636_v19 = vpop.eup %8084  ;;  %v4050_v20 = vmul.f32 0.5, %v11419_v26  ;;  %v4490_v40 = vadd.f32 1.0, %v11524_v33 }
 0x976   : > { %v4342_v45 = vadd.f32 %v4278_v16, %v11614_v42  ;;  %v4498_v21 = vadd.f32 1.0, %v11556_v18  ;;  %v11644_v23 = vmul.f32 %v11464_v25, %v11350_v59  ;;  %v4602_v7 = vpack.c.bf16 %v4546_v44, %v4538_v38  ;;  %v7987_v18 = vld [vmem:[#allocation17 + $0x3f0] ss:$8 sps:$4 sm:$0xff]  }
 0x977   : > { %8098 = vtanh.f32 %v4402_v12  ;;  %v4041_v11 = vmul.f32 0.5, %v11361_v27  ;;  %v4554_v46 = vmul.f32 %v4490_v40, %v4042_v29  ;;  %v4049_v26 = vmul.f32 0.5, %v11396_v47  ;;  %v3840_v1 = vpop.f32.mrb[32].mxu0  ;;  %5661 = vmatpush1.bf16.msra.mxu0 %v7981_v0  ;;  %v7849_v44 = vld [vmem:[#allocation17 + $0x110] ss:$8 sps:$4 sm:$0xff]  }
 0x978   : > { %v4562_v4 = vmul.f32 %v4498_v21, %v4050_v20  ;;  %v4489_v33 = vadd.f32 1.0, %v11512_v28  ;;  %v11649_v9 = vmul.f32 0.7978846, %v4342_v45  ;;  %5445 = vmatprep.mubr.bf16.mxu1 %v4602_v7  ;;  %v4497_v25 = vadd.f32 1.0, %v11532_v52  ;;  %v3842_v39 = vpop.f32.mrb[33].mxu0  ;;  %5662 = vmatprep.subr.bf16.mxu0 %v7989_v48 }
 0x979   : > { %v4058_v59 = vmul.f32 0.5, %v11483_v8  ;;  %v4506_v43 = vadd.f32 1.0, %v11610_v3  ;;  %v8087_v27 = vpop.eup %8086  ;;  %5446 = vmatmul.mubr.bf16.vlgmr.msra.gmra.mrb[16].mxu1 %v4601_v49  ;;  %v4066_v47 = vmul.f32 0.5, %v11522_v51  ;;  %v4514_v28 = vadd.f32 1.0, %v8083_v57  ;;  %v3844_v38 = vpop.f32.mrb[34].mxu0 }
 0x97a   : > { %v4610_v10 = vpack.c.bf16 %v4562_v4, %v4554_v46  ;;  %v4553_v16 = vmul.f32 %v4489_v33, %v4041_v11  ;;  %v11655_v12 = vpop.eup %8088  ;;  %5487 = vmatpush1.bf16.msra.mxu1 %v7846_v2  ;;  %v4561_v52 = vmul.f32 %v4497_v25, %v4049_v26  ;;  %v4057_v8 = vmul.f32 0.5, %v11469_v35  ;;  %v3846_v0 = vpop.f32.mrb[35].mxu0  ;;  %v7854_v49 = vld [vmem:[#allocation17 + $0x124] ss:$8 sps:$4 sm:$0xff]  }
 0x97b   : > { %v4570_v29 = vmul.f32 %v4506_v43, %v4058_v59  ;;  %v4065_v3 = vmul.f32 0.5, %v11493_v6  ;;  %v8091_v45 = vpop.eup %8090  ;;  %5488 = vmatprep.subr.bf16.mxu1 %v7851_v53  ;;  %v4578_v20 = vmul.f32 %v4514_v28, %v4066_v47  ;;  %v4505_v51 = vadd.f32 1.0, %v11598_v56  ;;  %5663 = vmatpush1.bf16.msra.mxu0 %v7987_v18 }
 0x97c   : > { %5455 = vmatprep.mubr.bf16.mxu1 %v4610_v10  ;;  %v4513_v57 = vadd.f32 1.0, %v11619_v50  ;;  %v4074_v40 = vmul.f32 0.5, %v11561_v15  ;;  %v11662_v21 = vpop.eup %8092  ;;  %v4609_v48 = vpack.c.bf16 %v4561_v52, %v4553_v16  ;;  %v4082_v7 = vmul.f32 0.5, %v11596_v61  ;;  %v7852_v15 = vld [vmem:[#allocation17 + $0x120] ss:$8 sps:$4 sm:$0xff]  }
 0x97d   : > { %v4522_v35 = vadd.f32 1.0, %v8091_v45  ;;  %v4073_v6 = vmul.f32 0.5, %v11550_v31  ;;  %v8095_v2 = vpop.eup %8094  ;;  %v4618_v53 = vpack.c.bf16 %v4578_v20, %v4570_v29  ;;  %v11666_v11 = vmul.f32 %v4505_v51, %v4057_v8  ;;  %v7857_v31 = vld [vmem:[#allocation17 + $0x134] ss:$8 sps:$4 sm:$0xff]   ;;  %v7855_v8 = vld [vmem:[#allocation17 + $0x130] ss:$8 sps:$4 sm:$0xff]  }
 0x97e   : > { %v11668_v46 = vmul.f32 %v4513_v57, %v4065_v3  ;;  %v4081_v56 = vmul.f32 0.5, %v11582_v13  ;;  %5489 = vmatpush1.bf16.msra.mxu1 %v7849_v44  ;;  %v4521_v26 = vadd.f32 1.0, %v8087_v27  ;;  %v4529_v61 = vadd.f32 1.0, %v8095_v2  ;;  %v7860_v51 = vld [vmem:[#allocation17 + $0x144] ss:$8 sps:$4 sm:$0xff]  }
 0x97f   : > { %v11671_v50 = vpop.eup %8096  ;;  %v11673_v4 = vmul.f32 %v4522_v35, %v4074_v40  ;;  %v3841_v33 = vadd.f32 %v3840_v1, %v11327_v34  ;;  %5490 = vmatprep.subr.bf16.mxu1 %v7854_v49  ;;  %v3843_v25 = vadd.f32 %v3842_v39, %v11390_v41  ;;  %v3845_v59 = vadd.f32 %v3844_v38, %v11327_v34  ;;  %v3850_v43 = vpop.f32.mrb[36].mxu0 }
 0x980   : > { %v4617_v18 = vpack.c.bf16 %v11668_v46, %v11666_v11  ;;  %v11681_v13 = vadd.f32 %v3846_v0, %v11390_v41  ;;  %v11683_v16 = vmul.f32 %v4521_v26, %v4073_v6  ;;  %v11685_v27 = vmul.f32 %v4529_v61, %v4081_v56  ;;  %v3852_v28 = vpop.f32.mrb[37].mxu0  ;;  %v7858_v26 = vld [vmem:[#allocation17 + $0x140] ss:$8 sps:$4 sm:$0xff]  }
 0x981   : > { %v8099_v10 = vpop.eup %8098  ;;  %v11687_v47 = vmul.f32 0.5, %v3841_v33  ;;  %v4091_v1 = vmul.f32 %v3841_v33, %v3841_v33  ;;  %5456 = vmatmul.mubr.bf16.gmra.mrb[20].mxu1 %v4609_v48  ;;  %v4092_v52 = vmul.f32 %v3843_v25, %v3843_v25  ;;  %v11689_v29 = vmul.f32 0.5, %v3845_v59  ;;  %v3854_v38 = vpop.f32.mrb[38].mxu0 }
 0x982   : > { %v4530_v44 = vadd.f32 1.0, %v8099_v10  ;;  %v4099_v39 = vmul.f32 %v3845_v59, %v3845_v59  ;;  %5491 = vmatpush1.bf16.msra.mxu1 %v7852_v15  ;;  %5465 = vmatprep.mubr.bf16.mxu1 %v4618_v53  ;;  %v4625_v3 = vpack.c.bf16 %v11685_v27, %v11683_v16  ;;  %v4100_v45 = vmul.f32 %v11681_v13, %v11681_v13  ;;  %v3856_v49 = vpop.f32.mrb[39].mxu0  ;;  %v7872_v27 = vld [vmem:[#allocation17 + $0x184] ss:$8 sps:$4 sm:$0xff]  }
 0x983   : > { %v4155_v0 = vmul.f32 %v4091_v1, %v3841_v33  ;;  %v11695_v20 = vmul.f32 0.5, %v3843_v25  ;;  %5492 = vmatprep.subr.bf16.mxu1 %v7857_v31  ;;  %v4156_v40 = vmul.f32 %v4092_v52, %v3843_v25  ;;  %v11698_v35 = vadd.f32 %v3850_v43, %v11327_v34  ;;  %v7863_v1 = vld [vmem:[#allocation17 + $0x154] ss:$8 sps:$4 sm:$0xff]  }
 0x984   : > { %v4594_v57 = vmul.f32 %v4530_v44, %v4082_v7  ;;  %v4163_v48 = vmul.f32 %v4099_v39, %v3845_v59  ;;  %v4164_v2 = vmul.f32 %v4100_v45, %v11681_v13  ;;  %v11702_v53 = vadd.f32 %v3852_v28, %v11390_v41 }
 0x985   : > { %v4219_v6 = vmul.f32 0.044715, %v4155_v0  ;;  %v11705_v11 = vadd.f32 %v3854_v38, %v11327_v34  ;;  %v4220_v56 = vmul.f32 0.044715, %v4156_v40  ;;  %v4107_v7 = vmul.f32 %v11698_v35, %v11698_v35  ;;  %v7861_v38 = vld [vmem:[#allocation17 + $0x150] ss:$8 sps:$4 sm:$0xff]  }
 0x986   : > { %v4626_v46 = vpack.c.bf16 %v4594_v57, %v11673_v4  ;;  %v4227_v15 = vmul.f32 0.044715, %v4163_v48  ;;  %5493 = vmatpush1.bf16.msra.mxu1 %v7855_v8  ;;  %v4228_v31 = vmul.f32 0.044715, %v4164_v2  ;;  %v4108_v43 = vmul.f32 %v11702_v53, %v11702_v53  ;;  %v7866_v2 = vld [vmem:[#allocation17 + $0x164] ss:$8 sps:$4 sm:$0xff]  }
 0x987   : > { %v4283_v61 = vadd.f32 %v4219_v6, %v3841_v33  ;;  %v4115_v10 = vmul.f32 %v11705_v11, %v11705_v11  ;;  %5494 = vmatprep.subr.bf16.mxu1 %v7860_v51  ;;  %v4284_v28 = vadd.f32 %v4220_v56, %v3843_v25  ;;  %v4171_v4 = vmul.f32 %v4107_v7, %v11698_v35  ;;  %v3860_v39 = vpop.f32.mrb[40].mxu0 }
 0x988   : > { %v4291_v44 = vadd.f32 %v4227_v15, %v3845_v59  ;;  %v11716_v52 = vadd.f32 %v3856_v49, %v11390_v41  ;;  %v4292_v33 = vadd.f32 %v4228_v31, %v11681_v13  ;;  %v4172_v0 = vmul.f32 %v4108_v43, %v11702_v53  ;;  %v3862_v57 = vpop.f32.mrb[41].mxu0 }
 0x989   : > { %v4347_v8 = vmul.f32 0.7978846, %v4283_v61  ;;  %v4179_v45 = vmul.f32 %v4115_v10, %v11705_v11  ;;  %5466 = vmatmul.mubr.bf16.gmra.mrb[24].mxu1 %v4617_v18  ;;  %v4348_v51 = vmul.f32 0.7978846, %v4284_v28  ;;  %v4235_v25 = vmul.f32 0.044715, %v4171_v4 }
 0x98a   : > { %v4355_v40 = vmul.f32 0.7978846, %v4291_v44  ;;  %v4116_v59 = vmul.f32 %v11716_v52, %v11716_v52  ;;  %5495 = vmatpush1.bf16.msra.mxu1 %v7858_v26  ;;  %5475 = vmatprep.mubr.bf16.mxu1 %v4626_v46  ;;  %v4356_v49 = vmul.f32 0.7978846, %v4292_v33  ;;  %v4236_v48 = vmul.f32 0.044715, %v4172_v0 }
 0x98b   : > { %8100 = vtanh.f32 %v4347_v8  ;;  %v4243_v6 = vmul.f32 0.044715, %v4179_v45  ;;  %5496 = vmatprep.subr.bf16.mxu1 %v7863_v1  ;;  %v4299_v56 = vadd.f32 %v4235_v25, %v11698_v35  ;;  %v11726_v18 = vadd.f32 %v3860_v39, %v11327_v34  ;;  %v3864_v7 = vpop.f32.mrb[42].mxu0  ;;  %v7864_v28 = vld [vmem:[#allocation17 + $0x160] ss:$8 sps:$4 sm:$0xff]  }
 0x98c   : > { %8102 = vtanh.f32 %v4348_v51  ;;  %v4180_v15 = vmul.f32 %v4116_v59, %v11716_v52  ;;  %v4300_v61 = vadd.f32 %v4236_v48, %v11702_v53  ;;  %v11731_v26 = vadd.f32 %v3862_v57, %v11390_v41  ;;  %v3866_v31 = vpop.f32.mrb[43].mxu0  ;;  %v7869_v33 = vld [vmem:[#allocation17 + $0x174] ss:$8 sps:$4 sm:$0xff]  }
 0x98d   : > { %8104 = vtanh.f32 %v4355_v40  ;;  %v4307_v46 = vadd.f32 %v4243_v6, %v11705_v11  ;;  %v4363_v43 = vmul.f32 0.7978846, %v4299_v56  ;;  %v4123_v1 = vmul.f32 %v11726_v18, %v11726_v18  ;;  %v7867_v56 = vld [vmem:[#allocation17 + $0x170] ss:$8 sps:$4 sm:$0xff]  }
 0x98e   : > { %8106 = vtanh.f32 %v4356_v49  ;;  %v4244_v10 = vmul.f32 0.044715, %v4180_v15  ;;  %5497 = vmatpush1.bf16.msra.mxu1 %v7861_v38  ;;  %v4364_v44 = vmul.f32 0.7978846, %v4300_v61  ;;  %v4124_v39 = vmul.f32 %v11731_v26, %v11731_v26 }
 0x98f   : > { %v4371_v4 = vmul.f32 0.7978846, %v4307_v46  ;;  %v11738_v8 = vadd.f32 %v3864_v7, %v11327_v34  ;;  %5498 = vmatprep.subr.bf16.mxu1 %v7866_v2  ;;  %8108 = vtanh.f32 %v4363_v43  ;;  %v4187_v45 = vmul.f32 %v4123_v1, %v11726_v18  ;;  %v3870_v38 = vpop.f32.mrb[44].mxu0 }
 0x990   : > { %v4308_v0 = vadd.f32 %v4244_v10, %v11716_v52  ;;  %v11743_v57 = vadd.f32 %v3866_v31, %v11390_v41  ;;  %8110 = vtanh.f32 %v4364_v44  ;;  %v4188_v51 = vmul.f32 %v4124_v39, %v11731_v26  ;;  %v3872_v59 = vpop.f32.mrb[45].mxu0 }
 0x991   : > { %v4131_v40 = vmul.f32 %v11738_v8, %v11738_v8  ;;  %v11749_v25 = vadd.f32 %v3870_v38, %v11327_v34  ;;  %5476 = vmatmul.mubr.bf16.gmra.mrb[28].mxu1 %v4625_v3  ;;  %8112 = vtanh.f32 %v4371_v4  ;;  %v4251_v48 = vmul.f32 0.044715, %v4187_v45  ;;  %v3874_v2 = vpop.f32.mrb[46].mxu0 }
 0x992   : > { %v4372_v49 = vmul.f32 0.7978846, %v4308_v0  ;;  %v4132_v6 = vmul.f32 %v11743_v57, %v11743_v57  ;;  %5499 = vmatpush1.bf16.msra.mxu1 %v7864_v28  ;;  %v4252_v15 = vmul.f32 0.044715, %v4188_v51  ;;  %v11760_v46 = vadd.f32 %v3872_v59, %v11390_v41  ;;  %v3876_v16 = vpop.f32.mrb[47].mxu0 }
 0x993   : > { %v4195_v7 = vmul.f32 %v4131_v40, %v11738_v8  ;;  %v4139_v61 = vmul.f32 %v11749_v25, %v11749_v25  ;;  %5500 = vmatprep.subr.bf16.mxu1 %v7869_v33  ;;  %v4315_v3 = vadd.f32 %v4251_v48, %v11726_v18  ;;  %v11765_v43 = vadd.f32 %v3874_v2, %v11327_v34  ;;  %v7870_v34 = vld [vmem:[#allocation17 + $0x180] ss:$8 sps:$4 sm:$0xff]  }
 0x994   : > { %8114 = vtanh.f32 %v4372_v49  ;;  %v4196_v31 = vmul.f32 %v4132_v6, %v11743_v57  ;;  %v4316_v1 = vadd.f32 %v4252_v15, %v11731_v26  ;;  %v4140_v4 = vmul.f32 %v11760_v46, %v11760_v46 }
 0x995   : > { %v8101_v10 = vpop.eup %8100  ;;  %v4259_v28 = vmul.f32 0.044715, %v4195_v7  ;;  %v4203_v44 = vmul.f32 %v4139_v61, %v11749_v25  ;;  %v4379_v0 = vmul.f32 0.7978846, %v4315_v3  ;;  %v4147_v38 = vmul.f32 %v11765_v43, %v11765_v43  ;;  %v7875_v7 = vld [vmem:[#allocation17 + $0x194] ss:$8 sps:$4 sm:$0xff]  }
 0x996   : > { %v8103_v39 = vpop.eup %8102  ;;  %v4475_v33 = vadd.f32 1.0, %v8101_v10  ;;  %v4260_v45 = vmul.f32 0.044715, %v4196_v31  ;;  %5501 = vmatpush1.bf16.msra.mxu1 %v7867_v56  ;;  %v4380_v40 = vmul.f32 0.7978846, %v4316_v1  ;;  %v4204_v48 = vmul.f32 %v4140_v4, %v11760_v46 }
 0x997   : > { %v8105_v51 = vpop.eup %8104  ;;  %v4323_v59 = vadd.f32 %v4259_v28, %v11738_v8  ;;  %v4267_v49 = vmul.f32 0.044715, %v4203_v44  ;;  %5502 = vmatprep.subr.bf16.mxu1 %v7872_v27  ;;  %8116 = vtanh.f32 %v4379_v0  ;;  %v4211_v44 = vmul.f32 %v4147_v38, %v11765_v43  ;;  %v7873_v4 = vld [vmem:[#allocation17 + $0x190] ss:$8 sps:$4 sm:$0xff]  }
 0x998   : > { %v8107_v6 = vpop.eup %8106  ;;  %v11776_v2 = vmul.f32 %v4475_v33, %v11687_v47  ;;  %v4483_v15 = vadd.f32 1.0, %v8105_v51  ;;  %v4324_v61 = vadd.f32 %v4260_v45, %v11743_v57  ;;  %8118 = vtanh.f32 %v4380_v40  ;;  %v7878_v40 = vld [vmem:[#allocation17 + $0x1a4] ss:$8 sps:$4 sm:$0xff]  }
 0x999   : > { %v4387_v3 = vmul.f32 0.7978846, %v4323_v59  ;;  %v4331_v56 = vadd.f32 %v4267_v49, %v11749_v25  ;;  %v4268_v31 = vmul.f32 0.044715, %v4204_v48  ;;  %v8109_v10 = vpop.eup %8108  ;;  %v11785_v47 = vadd.f32 %v3876_v16, %v11390_v41 }
 0x99a   : > { %v11781_v1 = vmul.f32 %v4483_v15, %v11689_v29  ;;  %v4388_v28 = vmul.f32 0.7978846, %v4324_v61  ;;  %v8111_v27 = vpop.eup %8110  ;;  %5503 = vmatpush1.bf16.msra.mxu1 %v7870_v34  ;;  %v4036_v45 = vmul.f32 0.5, %v11681_v13  ;;  %v4275_v29 = vmul.f32 0.044715, %v4211_v44 }
 0x99b   : > { %8120 = vtanh.f32 %v4387_v3  ;;  %v4395_v33 = vmul.f32 0.7978846, %v4331_v56  ;;  %v4332_v0 = vadd.f32 %v4268_v31, %v11760_v46  ;;  %v8113_v51 = vpop.eup %8112  ;;  %5504 = vmatprep.subr.bf16.mxu1 %v7875_v7  ;;  %v4148_v38 = vmul.f32 %v11785_v47, %v11785_v47  ;;  %v7876_v61 = vld [vmem:[#allocation17 + $0x1a0] ss:$8 sps:$4 sm:$0xff]   ;;  %v7881_v3 = vld [vmem:[#allocation17 + $0x1b4] ss:$8 sps:$4 sm:$0xff]  }
 0x99c   : > { %8122 = vtanh.f32 %v4388_v28  ;;  %v4476_v59 = vadd.f32 1.0, %v8103_v39  ;;  %v4484_v16 = vadd.f32 1.0, %v8107_v6  ;;  %v4603_v34 = vpack.c.bf16 %v11781_v1, %v11776_v2 }
 0x99d   : > { %8124 = vtanh.f32 %v4395_v33  ;;  %v4396_v41 = vmul.f32 0.7978846, %v4332_v0  ;;  %v4339_v48 = vadd.f32 %v4275_v29, %v11765_v43  ;;  %v4212_v13 = vmul.f32 %v4148_v38, %v11785_v47 }
 0x99e   : > { %v8115_v49 = vpop.eup %8114  ;;  %v4540_v15 = vmul.f32 %v4476_v59, %v11695_v20  ;;  %v4044_v7 = vmul.f32 0.5, %v11702_v53  ;;  %5505 = vmatpush1.bf16.msra.mxu1 %v7873_v4  ;;  %v4548_v39 = vmul.f32 %v4484_v16, %v4036_v45  ;;  %v4052_v56 = vmul.f32 0.5, %v11716_v52 }
 0x99f   : > { %8126 = vtanh.f32 %v4396_v41  ;;  %v4492_v6 = vadd.f32 1.0, %v8111_v27  ;;  %5506 = vmatprep.subr.bf16.mxu1 %v7878_v40  ;;  %v4403_v31 = vmul.f32 0.7978846, %v4339_v48  ;;  %v4276_v28 = vmul.f32 0.044715, %v4212_v13 }
 0x9a0   : > { %v4500_v44 = vadd.f32 1.0, %v8115_v49  ;;  %v4043_v33 = vmul.f32 0.5, %v11698_v35  ;;  %v4604_v0 = vpack.c.bf16 %v4548_v39, %v4540_v15  ;;  %v4051_v20 = vmul.f32 0.5, %v11705_v11  ;;  %v7879_v40 = vld [vmem:[#allocation17 + $0x1b0] ss:$8 sps:$4 sm:$0xff]  }
 0x9a1   : > { %v11799_v29 = vmul.f32 %v4492_v6, %v4044_v7  ;;  %v4491_v53 = vadd.f32 1.0, %v8109_v10  ;;  %v8117_v4 = vpop.eup %8116  ;;  %8128 = vtanh.f32 %v4403_v31  ;;  %v4340_v38 = vadd.f32 %v4276_v28, %v11785_v47  ;;  %v7884_v10 = vld [vmem:[#allocation17 + $0x1c4] ss:$8 sps:$4 sm:$0xff]  }
 0x9a2   : > { %v11803_v45 = vmul.f32 %v4500_v44, %v4052_v56  ;;  %v4499_v52 = vadd.f32 1.0, %v8113_v51  ;;  %v8119_v27 = vpop.eup %8118  ;;  %8130 = vtanh.f32 %v11649_v9  ;;  %5507 = vmatpush1.bf16.msra.mxu1 %v7876_v61  ;;  %5518 = vmatprep.mubr.bf16.mxu1 %v4604_v0  ;;  %v4060_v59 = vmul.f32 0.5, %v11731_v26  ;;  %v7882_v56 = vld [vmem:[#allocation17 + $0x1c0] ss:$8 sps:$4 sm:$0xff]  }
 0x9a3   : > { %v11806_v35 = vmul.f32 %v4491_v53, %v4043_v33  ;;  %v4068_v11 = vmul.f32 0.5, %v11743_v57  ;;  %5508 = vmatprep.subr.bf16.mxu1 %v7881_v3  ;;  %v4404_v41 = vmul.f32 0.7978846, %v4340_v38  ;;  %v4508_v51 = vadd.f32 1.0, %v8119_v27 }
 0x9a4   : > { %v4612_v16 = vpack.c.bf16 %v11803_v45, %v11799_v29  ;;  %v11812_v49 = vmul.f32 %v4499_v52, %v4051_v20  ;;  %v4059_v9 = vmul.f32 0.5, %v11726_v18  ;;  %v4067_v13 = vmul.f32 0.5, %v11738_v8 }
 0x9a5   : > { %v8121_v48 = vpop.eup %8120  ;;  %v4507_v15 = vadd.f32 1.0, %v8117_v4  ;;  %v4076_v7 = vmul.f32 0.5, %v11760_v46  ;;  %8132 = vtanh.f32 %v4404_v41  ;;  %v11820_v3 = vmul.f32 0.5, %v11785_v47  ;;  %v7887_v46 = vld [vmem:[#allocation17 + $0x1d4] ss:$8 sps:$4 sm:$0xff]  }
 0x9a6   : > { %v8123_v26 = vpop.eup %8122  ;;  %v4611_v57 = vpack.c.bf16 %v11812_v49, %v11806_v35  ;;  %v4515_v61 = vadd.f32 1.0, %v8121_v48  ;;  %5509 = vmatpush1.bf16.msra.mxu1 %v7879_v40  ;;  %v11822_v31 = vmul.f32 %v4508_v51, %v4060_v59  ;;  %v4075_v8 = vmul.f32 0.5, %v11749_v25 }
 0x9a7   : > { %v8125_v39 = vpop.eup %8124  ;;  %v4516_v6 = vadd.f32 1.0, %v8123_v26  ;;  %v11824_v18 = vmul.f32 %v4507_v15, %v4059_v9  ;;  %5510 = vmatprep.subr.bf16.mxu1 %v7884_v10  ;;  %v4030_v33 = vmul.f32 0.5, %v11324_v32  ;;  %v4038_v47 = vmul.f32 0.5, %v11344_v62  ;;  %v7885_v32 = vld [vmem:[#allocation17 + $0x1d0] ss:$8 sps:$4 sm:$0xff]  }
 0x9a8   : > { %v11827_v28 = vmul.f32 %v4515_v61, %v4067_v13  ;;  %v4523_v44 = vadd.f32 1.0, %v8125_v39  ;;  %v4478_v53 = vadd.f32 1.0, %v11439_v58  ;;  %v4486_v4 = vadd.f32 1.0, %v11505_v37  ;;  %v7890_v10 = vld [vmem:[#allocation17 + $0x1e4] ss:$8 sps:$4 sm:$0xff]   ;;  %v12726_v39 = vld [vmem:[#allocation61_spill] sm:$0xff] }
 0x9a9   : > { %v8127_v0 = vpop.eup %8126  ;;  %v11831_v20 = vmul.f32 %v4516_v6, %v4068_v11  ;;  %v3079_v38 = vsub.s32 6, %v12714_v60  ;;  %v4083_v27 = vmul.f32 0.5, %v11765_v43  ;;  %v3083_v37 = vsub.s32 7, %v12714_v60  ;;  %v8166_v43 = vld [vmem:[%s12715_s1] sm:$0xff] }
 0x9aa   : > { %v4619_v25 = vpack.c.bf16 %v11827_v28, %v11824_v18  ;;  %v4524_v52 = vadd.f32 1.0, %v8127_v0  ;;  %v11839_v40 = vmul.f32 %v4523_v44, %v4075_v8  ;;  %5511 = vmatpush1.bf16.msra.mxu1 %v7882_v56  ;;  %v11843_v59 = vmul.f32 %v4478_v53, %v4030_v33  ;;  %v12727_v6 = vld [vmem:[#allocation62_spill] sm:$0xff]  ;;  %v12729_v0 = vld [vmem:[#allocation67_spill] sm:$0xff] }
 0x9ab   : > { %v4620_v62 = vpack.c.bf16 %v11831_v20, %v11822_v31  ;;  %v11845_v58 = vmul.f32 %v4486_v4, %v4038_v47  ;;  %v8129_v11 = vpop.eup %8128  ;;  %5512 = vmatprep.subr.bf16.mxu1 %v7887_v46  ;;  %v11853_v51 = vrot.slane %v8166_v43, %v3079_v38  ;;  %v4605_v48 = vpack.c.bf16 %v11644_v23, %v11460_v30  ;;  %v12728_v46 = vld [vmem:[#allocation66_spill] sm:$0xff]  ;;  %v12730_v4 = vld [vmem:[#allocation64_spill] sm:$0xff] }
 0x9ac   : > { %v11848_v41 = vmul.f32 %v4524_v52, %v4076_v7  ;;  %v4046_v9 = vmul.f32 0.5, %v11381_v14  ;;  %v8131_v13 = vpop.eup %8130  ;;  %v4531_v15 = vadd.f32 1.0, %v8129_v11  ;;  %v4054_v26 = vmul.f32 0.5, %v11424_v55  ;;  %v7888_v33 = vld [vmem:[#allocation17 + $0x1e0] ss:$8 sps:$4 sm:$0xff]  }
 0x9ad   : > { %v4606_v60 = vpack.c.bf16 %v11845_v58, %v11843_v59  ;;  %v4494_v7 = vadd.f32 1.0, %v11527_v36  ;;  %v4502_v61 = vadd.f32 1.0, %v11575_v63  ;;  %v4045_v56 = vmul.f32 0.5, %v12726_v39  ;;  %v7893_v36 = vld [vmem:[#allocation17 + $0x1f4] ss:$8 sps:$4 sm:$0xff]  }
 0x9ae   : > { %v4053_v8 = vmul.f32 0.5, %v12727_v6  ;;  %v4493_v44 = vadd.f32 1.0, %v12728_v46  ;;  %5513 = vmatpush1.bf16.msra.mxu1 %v7885_v32  ;;  %v11866_v14 = vmul.f32 %v4531_v15, %v4083_v27  ;;  %v4501_v53 = vadd.f32 1.0, %v12729_v0  ;;  %v12733_v0 = vld [vmem:[#allocation26_spill] sm:$0xff]  ;;  %v8173_v23 = vld [vmem:[#allocation17 + $0x334] ss:$8 sps:$4 sm:$0xff]  }
 0x9af   : > { %v11868_v47 = vmul.f32 %v4494_v7, %v4046_v9  ;;  %v4062_v55 = vmul.f32 0.5, %v12730_v4  ;;  %v8133_v38 = vpop.eup %8132  ;;  %5514 = vmatprep.subr.bf16.mxu1 %v7890_v10  ;;  %v11872_v63 = vmul.f32 %v4502_v61, %v4054_v26  ;;  %v4070_v11 = vmul.f32 0.5, %v11538_v54  ;;  %v12731_v61 = vld [vmem:[#allocation63_spill] sm:$0xff]  ;;  %v7891_v54 = vld [vmem:[#allocation17 + $0x1f0] ss:$8 sps:$4 sm:$0xff]  }
 0x9b0   : > { %v11874_v52 = vmul.f32 %v4493_v44, %v4045_v56  ;;  %v4510_v32 = vadd.f32 1.0, %v11616_v24  ;;  %v4532_v39 = vadd.f32 1.0, %v8133_v38  ;;  %v4627_v27 = vpack.c.bf16 %v11866_v14, %v11839_v40  ;;  %v8172_v30 = vld [vmem:[#allocation17 + $0x320] ss:$8 sps:$4 sm:$0xff]  }
 0x9b1   : > { %v11880_v9 = vmul.f32 %v4501_v53, %v4053_v8  ;;  %v4518_v15 = vadd.f32 1.0, %v11636_v19  ;;  %v11883_v7 = vrot.slane %v8166_v43, %v3083_v37  ;;  %v4614_v10 = vpack.c.bf16 %v11872_v63, %v11868_v47  ;;  %v7896_v37 = vld [vmem:[#allocation17 + $0x204] ss:$8 sps:$4 sm:$0xff]   ;;  %v12732_v43 = vld [vmem:[#allocation65_spill] sm:$0xff]  ;;  %v8176_v63 = vld [vmem:[#allocation17 + $0x340] ss:$8 sps:$4 sm:$0xff]  }
 0x9b2   : > { %v11887_v26 = vmul.f32 %v4510_v32, %v4062_v55  ;;  %v4061_v56 = vmul.f32 0.5, %v12731_v61  ;;  %5515 = vmatpush1.bf16.msra.mxu1 %v7888_v33  ;;  %v11891_v24 = vmul.f32 %v4532_v39, %v11820_v3  ;;  %v4509_v19 = vadd.f32 1.0, %v11603_v17  ;;  %v7894_v39 = vld [vmem:[#allocation17 + $0x200] ss:$8 sps:$4 sm:$0xff]   ;;  %v8175_v47 = vld [vmem:[#allocation17 + $0x344] ss:$8 sps:$4 sm:$0xff]  }
 0x9b3   : > { %v4613_v6 = vpack.c.bf16 %v11880_v9, %v11874_v52  ;;  %v11895_v8 = vmul.f32 %v4518_v15, %v4070_v11  ;;  %5516 = vmatprep.subr.bf16.mxu1 %v7893_v36  ;;  %v4069_v46 = vmul.f32 0.5, %v12732_v43  ;;  %v4517_v44 = vadd.f32 1.0, %v11625_v5  ;;  %v12734_v5 = vld [vmem:[#allocation68_spill] sm:$0xff] }
 0x9b4   : > { %v4078_v53 = vmul.f32 0.5, %v12733_v0  ;;  %v4526_v33 = vadd.f32 1.0, %v11662_v21  ;;  %v4628_v3 = vpack.c.bf16 %v11891_v24, %v11848_v41  ;;  %v4086_v55 = vmul.f32 0.5, %v11614_v42  ;;  %v7902_v42 = vld [vmem:[#allocation17 + $0x214] ss:$8 sps:$4 sm:$0xff]  }
 0x9b5   : > { %v4622_v4 = vpack.c.bf16 %v11895_v8, %v11887_v26  ;;  %v4534_v38 = vadd.f32 1.0, %v8131_v13  ;;  %v11907_v17 = vmul.f32 %v4509_v19, %v4061_v56  ;;  %v11909_v36 = vmul.f32 %v4517_v44, %v4069_v46  ;;  %v8177_v52 = vld [vmem:[#allocation17 + $0x354] ss:$8 sps:$4 sm:$0xff]   ;;  %v8178_v9 = vld [vmem:[#allocation17 + $0x350] ss:$8 sps:$4 sm:$0xff]  }
 0x9b6   : > { %v11911_v11 = vmul.f32 %v4526_v33, %v4078_v53  ;;  %v4077_v32 = vmul.f32 0.5, %v12734_v5  ;;  %5517 = vmatpush1.bf16.msra.mxu1 %v7891_v54  ;;  %v4085_v15 = vmul.f32 0.5, %v11588_v22  ;;  %v4525_v61 = vadd.f32 1.0, %v11655_v12  ;;  %v8181_v8 = vld [vmem:[#allocation17 + $0x374] ss:$8 sps:$4 sm:$0xff]  }
 0x9b7   : > { %v11914_v21 = vmul.f32 %v4534_v38, %v4086_v55  ;;  %v4533_v43 = vadd.f32 1.0, %v11671_v50  ;;  %5559 = vmatprep.subr.bf16.mxu1 %v7896_v37  ;;  %v3986_v13 = vpop.f32.mrb[48].mxu0  ;;  %v4621_v56 = vpack.c.bf16 %v11909_v36, %v11907_v17  ;;  %v7900_v50 = vld [vmem:[#allocation17 + $0x210] ss:$8 sps:$4 sm:$0xff]   ;;  %v7908_v38 = vld [vmem:[#allocation17 + $0x224] ss:$8 sps:$4 sm:$0xff]  }
 0x9b8   : > { %v3987_v19 = vadd.f32 %v3986_v13, %v11853_v51  ;;  %v3988_v46 = vpop.f32.mrb[49].mxu0  ;;  %v11924_v44 = vmul.f32 %v4525_v61, %v4077_v32  ;;  %v8183_v17 = vld [vmem:[#allocation17 + $0x384] ss:$8 sps:$4 sm:$0xff]   ;;  %v8184_v36 = vld [vmem:[#allocation17 + $0x380] ss:$8 sps:$4 sm:$0xff]  }
 0x9b9   : > { %v4630_v54 = vpack.c.bf16 %v11914_v21, %v11911_v11  ;;  %v11926_v0 = vmul.f32 %v4533_v43, %v4085_v15  ;;  %5519 = vmatmul.mubr.bf16.vlgmr.msra.gmra.mrb[16].mxu1 %v4603_v34  ;;  %v3989_v22 = vadd.f32 %v3988_v46, %v11883_v7  ;;  %v3990_v12 = vpop.f32.mrb[50].mxu0  ;;  %v7906_v15 = vld [vmem:[#allocation17 + $0x220] ss:$8 sps:$4 sm:$0xff]   ;;  %v8185_v11 = vld [vmem:[#allocation17 + $0x394] ss:$8 sps:$4 sm:$0xff]  }
 0x9ba   : > { %5560 = vmatpush1.bf16.msra.mxu1 %v7894_v39  ;;  %5528 = vmatprep.mubr.bf16.mxu1 %v4612_v16  ;;  %v4095_v37 = vmul.f32 %v3987_v19, %v3987_v19  ;;  %v3991_v53 = vadd.f32 %v3990_v12, %v11853_v51  ;;  %v3992_v33 = vpop.f32.mrb[51].mxu0  ;;  %v7914_v16 = vld [vmem:[#allocation17 + $0x234] ss:$8 sps:$4 sm:$0xff]   ;;  %v8186_v21 = vld [vmem:[#allocation17 + $0x390] ss:$8 sps:$4 sm:$0xff]  }
 0x9bb   : > { %5561 = vmatprep.subr.bf16.mxu1 %v7902_v42  ;;  %v4096_v2 = vmul.f32 %v3989_v22, %v3989_v22  ;;  %v3993_v1 = vadd.f32 %v3992_v33, %v11883_v7  ;;  %v12735_v26 = vpack.c.bf16 %v11926_v0, %v11924_v44  ;;  %v8189_v44 = vld [vmem:[#allocation17 + $0x3b4] ss:$8 sps:$4 sm:$0xff]   ;;  %v8190_v0 = vld [vmem:[#allocation17 + $0x3b0] ss:$8 sps:$4 sm:$0xff]  }
 0x9bc   : > { %v4159_v34 = vmul.f32 %v4095_v37, %v3987_v19  ;;  %v4103_v5 = vmul.f32 %v3991_v53, %v3991_v53  ;;  %v11945_v37 = vmul.f32 0.5, %v3987_v19 }
 0x9bd   : > { %v4160_v32 = vmul.f32 %v4096_v2, %v3989_v22  ;;  %v4104_v39 = vmul.f32 %v3993_v1, %v3993_v1 }
 0x9be   : > { %5562 = vmatpush1.bf16.msra.mxu1 %v7900_v50  ;;  %v4223_v29 = vmul.f32 0.044715, %v4159_v34  ;;  %v4167_v45 = vmul.f32 %v4103_v5, %v3991_v53  ;;  %v7912_v34 = vld [vmem:[#allocation17 + $0x230] ss:$8 sps:$4 sm:$0xff]  }
 0x9bf   : > { %5563 = vmatprep.subr.bf16.mxu1 %v7908_v38  ;;  %v4224_v61 = vmul.f32 0.044715, %v4160_v32  ;;  %v4168_v43 = vmul.f32 %v4104_v39, %v3993_v1  ;;  %v3996_v13 = vpop.f32.mrb[52].mxu0 }
 0x9c0   : > { %v4287_v46 = vadd.f32 %v4223_v29, %v3987_v19  ;;  %v4231_v12 = vmul.f32 0.044715, %v4167_v45  ;;  %v11940_v42 = vadd.f32 %v3996_v13, %v11853_v51  ;;  %v3998_v55 = vpop.f32.mrb[53].mxu0  ;;  %v11960_v13 = vmul.f32 0.5, %v3989_v22 }
 0x9c1   : > { %5529 = vmatmul.mubr.bf16.gmra.mrb[20].mxu1 %v4611_v57  ;;  %v4288_v50 = vadd.f32 %v4224_v61, %v3989_v22  ;;  %v4232_v33 = vmul.f32 0.044715, %v4168_v43  ;;  %v3999_v38 = vadd.f32 %v3998_v55, %v11883_v7  ;;  %v4000_v2 = vpop.f32.mrb[54].mxu0  ;;  %v7920_v57 = vld [vmem:[#allocation17 + $0x244] ss:$8 sps:$4 sm:$0xff]  }
 0x9c2   : > { %5564 = vmatpush1.bf16.msra.mxu1 %v7906_v15  ;;  %5538 = vmatprep.mubr.bf16.mxu1 %v4620_v62  ;;  %v4351_v5 = vmul.f32 0.7978846, %v4287_v46  ;;  %v4295_v32 = vadd.f32 %v4231_v12, %v3991_v53  ;;  %v4111_v39 = vmul.f32 %v11940_v42, %v11940_v42  ;;  %v11954_v35 = vadd.f32 %v4000_v2, %v11853_v51  ;;  %v4002_v49 = vpop.f32.mrb[55].mxu0 }
 0x9c3   : > { %5565 = vmatprep.subr.bf16.mxu1 %v7914_v16  ;;  %v4352_v19 = vmul.f32 0.7978846, %v4288_v50  ;;  %v4296_v55 = vadd.f32 %v4232_v33, %v3993_v1  ;;  %v4112_v29 = vmul.f32 %v3999_v38, %v3999_v38  ;;  %v4003_v15 = vadd.f32 %v4002_v49, %v11883_v7  ;;  %v7918_v16 = vld [vmem:[#allocation17 + $0x240] ss:$8 sps:$4 sm:$0xff]   ;;  %v7926_v33 = vld [vmem:[#allocation17 + $0x254] ss:$8 sps:$4 sm:$0xff]  }
 0x9c4   : > { %8134 = vtanh.f32 %v4351_v5  ;;  %v4359_v45 = vmul.f32 0.7978846, %v4295_v32  ;;  %v4175_v31 = vmul.f32 %v4111_v39, %v11940_v42  ;;  %v4119_v20 = vmul.f32 %v11954_v35, %v11954_v35 }
 0x9c5   : > { %v4360_v62 = vmul.f32 0.7978846, %v4296_v55  ;;  %v4176_v61 = vmul.f32 %v4112_v29, %v3999_v38  ;;  %v4120_v43 = vmul.f32 %v4003_v15, %v4003_v15  ;;  %v11962_v46 = vmul.f32 0.5, %v3991_v53 }
 0x9c6   : > { %5566 = vmatpush1.bf16.msra.mxu1 %v7912_v34  ;;  %8136 = vtanh.f32 %v4359_v45  ;;  %v4239_v12 = vmul.f32 0.044715, %v4175_v31  ;;  %v4183_v50 = vmul.f32 %v4119_v20, %v11954_v35  ;;  %v11965_v39 = vmul.f32 0.5, %v3993_v1  ;;  %v7924_v45 = vld [vmem:[#allocation17 + $0x250] ss:$8 sps:$4 sm:$0xff]  }
 0x9c7   : > { %5567 = vmatprep.subr.bf16.mxu1 %v7920_v57  ;;  %8138 = vtanh.f32 %v4352_v19  ;;  %v4240_v2 = vmul.f32 0.044715, %v4176_v61  ;;  %v4184_v5 = vmul.f32 %v4120_v43, %v4003_v15  ;;  %v4006_v32 = vpop.f32.mrb[56].mxu0  ;;  %v11971_v55 = vmul.f32 0.5, %v3999_v38 }
 0x9c8   : > { %v4303_v49 = vadd.f32 %v4239_v12, %v11940_v42  ;;  %v4247_v22 = vmul.f32 0.044715, %v4183_v50  ;;  %v11969_v34 = vadd.f32 %v4006_v32, %v11853_v51  ;;  %v4008_v53 = vpop.f32.mrb[57].mxu0  ;;  %8140 = vtanh.f32 %v4360_v62 }
 0x9c9   : > { %5539 = vmatmul.mubr.bf16.gmra.mrb[24].mxu1 %v4619_v25  ;;  %v4304_v57 = vadd.f32 %v4240_v2, %v3999_v38  ;;  %v4248_v19 = vmul.f32 0.044715, %v4184_v5  ;;  %v11977_v29 = vadd.f32 %v4008_v53, %v11883_v7  ;;  %v4010_v1 = vpop.f32.mrb[58].mxu0  ;;  %v11985_v25 = vmul.f32 0.5, %v4003_v15  ;;  %v7932_v38 = vld [vmem:[#allocation17 + $0x264] ss:$8 sps:$4 sm:$0xff]  }
 0x9ca   : > { %5568 = vmatpush1.bf16.msra.mxu1 %v7918_v16  ;;  %5548 = vmatprep.mubr.bf16.mxu1 %v4628_v3  ;;  %v4367_v31 = vmul.f32 0.7978846, %v4303_v49  ;;  %v4311_v20 = vadd.f32 %v4247_v22, %v11954_v35  ;;  %v4127_v18 = vmul.f32 %v11969_v34, %v11969_v34  ;;  %v4012_v28 = vpop.f32.mrb[59].mxu0  ;;  %v11990_v16 = vadd.f32 %v4010_v1, %v11853_v51  ;;  %v7930_v2 = vld [vmem:[#allocation17 + $0x260] ss:$8 sps:$4 sm:$0xff]  }
 0x9cb   : > { %5569 = vmatprep.subr.bf16.mxu1 %v7926_v33  ;;  %v4368_v62 = vmul.f32 0.7978846, %v4304_v57  ;;  %v4312_v61 = vadd.f32 %v4248_v19, %v4003_v15  ;;  %v4128_v43 = vmul.f32 %v11977_v29, %v11977_v29  ;;  %v11994_v3 = vadd.f32 %v4012_v28, %v11883_v7  ;;  %v7938_v5 = vld [vmem:[#allocation17 + $0x274] ss:$8 sps:$4 sm:$0xff]  }
 0x9cc   : > { %8142 = vtanh.f32 %v4367_v31  ;;  %v4375_v41 = vmul.f32 0.7978846, %v4311_v20  ;;  %v4191_v24 = vmul.f32 %v4127_v18, %v11969_v34  ;;  %v11998_v33 = vmul.f32 0.5, %v11940_v42 }
 0x9cd   : > { %8144 = vtanh.f32 %v4368_v62  ;;  %v4376_v12 = vmul.f32 0.7978846, %v4312_v61  ;;  %v4192_v50 = vmul.f32 %v4128_v43, %v11977_v29  ;;  %v4135_v49 = vmul.f32 %v11990_v16, %v11990_v16 }
 0x9ce   : > { %v8135_v15 = vpop.eup %8134  ;;  %5570 = vmatpush1.bf16.msra.mxu1 %v7924_v45  ;;  %8146 = vtanh.f32 %v4375_v41  ;;  %v4255_v32 = vmul.f32 0.044715, %v4191_v24  ;;  %v4136_v22 = vmul.f32 %v11994_v3, %v11994_v3  ;;  %v12005_v42 = vmul.f32 0.5, %v11954_v35 }
 0x9cf   : > { %5571 = vmatprep.subr.bf16.mxu1 %v7932_v38  ;;  %v4479_v53 = vadd.f32 1.0, %v8135_v15  ;;  %8148 = vtanh.f32 %v4376_v12  ;;  %v4256_v57 = vmul.f32 0.044715, %v4192_v50  ;;  %v4016_v19 = vpop.f32.mrb[60].mxu0  ;;  %v4199_v31 = vmul.f32 %v4135_v49, %v11990_v16  ;;  %v7936_v38 = vld [vmem:[#allocation17 + $0x270] ss:$8 sps:$4 sm:$0xff]  }
 0x9d0   : > { %v8137_v1 = vpop.eup %8136  ;;  %v4319_v45 = vadd.f32 %v4255_v32, %v11969_v34  ;;  %v4200_v20 = vmul.f32 %v4136_v22, %v11994_v3  ;;  %v12011_v18 = vadd.f32 %v4016_v19, %v11853_v51  ;;  %v4018_v28 = vpop.f32.mrb[61].mxu0  ;;  %v7944_v15 = vld [vmem:[#allocation17 + $0x284] ss:$8 sps:$4 sm:$0xff]  }
 0x9d1   : > { %v8139_v62 = vpop.eup %8138  ;;  %5549 = vmatmul.mubr.bf16.gmra.mrb[28].mxu1 %v4627_v27  ;;  %v12017_v35 = vmul.f32 %v4479_v53, %v11945_v37  ;;  %v4487_v61 = vadd.f32 1.0, %v8137_v1  ;;  %v4320_v43 = vadd.f32 %v4256_v57, %v11977_v29  ;;  %v12021_v41 = vadd.f32 %v4018_v28, %v11883_v7  ;;  %v4020_v24 = vpop.f32.mrb[62].mxu0  ;;  %v7950_v28 = vld [vmem:[#allocation17 + $0x294] ss:$8 sps:$4 sm:$0xff]  }
 0x9d2   : > { %5572 = vmatpush1.bf16.msra.mxu1 %v7930_v2  ;;  %5591 = vmatprep.mubr.bf16.mxu1 %v4606_v60  ;;  %v4383_v12 = vmul.f32 0.7978846, %v4319_v45  ;;  %v4263_v50 = vmul.f32 0.044715, %v4199_v31  ;;  %v4264_v40 = vmul.f32 0.044715, %v4200_v20  ;;  %v4143_v14 = vmul.f32 %v12011_v18, %v12011_v18  ;;  %v8141_v27 = vpop.eup %8140 }
 0x9d3   : > { %5573 = vmatprep.subr.bf16.mxu1 %v7938_v5  ;;  %v12029_v37 = vmul.f32 %v4487_v61, %v11962_v46  ;;  %v4384_v32 = vmul.f32 0.7978846, %v4320_v43  ;;  %v4144_v2 = vmul.f32 %v12021_v41, %v12021_v41  ;;  %v12034_v49 = vadd.f32 %v4020_v24, %v11853_v51  ;;  %v4022_v59 = vpop.f32.mrb[63].mxu0  ;;  %v7942_v5 = vld [vmem:[#allocation17 + $0x280] ss:$8 sps:$4 sm:$0xff]  }
 0x9d4   : > { %8150 = vtanh.f32 %v4383_v12  ;;  %v4327_v58 = vadd.f32 %v4263_v50, %v11990_v16  ;;  %v4328_v60 = vadd.f32 %v4264_v40, %v11994_v3  ;;  %v4207_v22 = vmul.f32 %v4143_v14, %v12011_v18 }
 0x9d5   : > { %8152 = vtanh.f32 %v4384_v32  ;;  %v4208_v46 = vmul.f32 %v4144_v2, %v12021_v41  ;;  %v4151_v53 = vmul.f32 %v12034_v49, %v12034_v49  ;;  %v12043_v57 = vadd.f32 %v4022_v59, %v11883_v7  ;;  %v7948_v32 = vld [vmem:[#allocation17 + $0x290] ss:$8 sps:$4 sm:$0xff]  }
 0x9d6   : > { %v8143_v51 = vpop.eup %8142  ;;  %5574 = vmatpush1.bf16.msra.mxu1 %v7936_v38  ;;  %v4391_v19 = vmul.f32 0.7978846, %v4327_v58  ;;  %v4392_v1 = vmul.f32 0.7978846, %v4328_v60  ;;  %v4271_v45 = vmul.f32 0.044715, %v4207_v22  ;;  %v4607_v31 = vpack.c.bf16 %v12029_v37, %v12017_v35 }
 0x9d7   : > { %v8145_v20 = vpop.eup %8144  ;;  %5575 = vmatprep.subr.bf16.mxu1 %v7944_v15  ;;  %v4272_v61 = vmul.f32 0.044715, %v4208_v46  ;;  %v4215_v43 = vmul.f32 %v4151_v53, %v12034_v49  ;;  %v4152_v24 = vmul.f32 %v12043_v57, %v12043_v57  ;;  %v4480_v12 = vadd.f32 1.0, %v8139_v62  ;;  %v7956_v60 = vld [vmem:[#allocation17 + $0x2a4] ss:$8 sps:$4 sm:$0xff]  }
 0x9d8   : > { %v8147_v7 = vpop.eup %8146  ;;  %8154 = vtanh.f32 %v4391_v19  ;;  %v4335_v38 = vadd.f32 %v4271_v45, %v12011_v18  ;;  %v4488_v50 = vadd.f32 1.0, %v8141_v27  ;;  %v4496_v40 = vadd.f32 1.0, %v8145_v20 }
 0x9d9   : > { %v8149_v14 = vpop.eup %8148  ;;  %8156 = vtanh.f32 %v4392_v1  ;;  %v4336_v35 = vadd.f32 %v4272_v61, %v12021_v41  ;;  %v4279_v37 = vmul.f32 0.044715, %v4215_v43  ;;  %v4216_v15 = vmul.f32 %v4152_v24, %v12043_v57  ;;  %v7962_v24 = vld [vmem:[#allocation17 + $0x2b4] ss:$8 sps:$4 sm:$0xff]  }
 0x9da   : > { %5576 = vmatpush1.bf16.msra.mxu1 %v7942_v5  ;;  %v4399_v2 = vmul.f32 0.7978846, %v4335_v38  ;;  %v4544_v59 = vmul.f32 %v4480_v12, %v11960_v13  ;;  %v4552_v62 = vmul.f32 %v4488_v50, %v11965_v39  ;;  %v4504_v58 = vadd.f32 1.0, %v8149_v14  ;;  %v7960_v50 = vld [vmem:[#allocation17 + $0x2b0] ss:$8 sps:$4 sm:$0xff]  }
 0x9db   : > { %5577 = vmatprep.subr.bf16.mxu1 %v7950_v28  ;;  %v4400_v22 = vmul.f32 0.7978846, %v4336_v35  ;;  %v4343_v27 = vadd.f32 %v4279_v37, %v12034_v49  ;;  %v4280_v46 = vmul.f32 0.044715, %v4216_v15  ;;  %v4560_v53 = vmul.f32 %v4496_v40, %v11971_v55  ;;  %v7954_v28 = vld [vmem:[#allocation17 + $0x2a0] ss:$8 sps:$4 sm:$0xff]  }
 0x9dc   : > { %8158 = vtanh.f32 %v4399_v2  ;;  %v4608_v19 = vpack.c.bf16 %v4552_v62, %v4544_v59  ;;  %v4568_v1 = vmul.f32 %v4504_v58, %v11985_v25  ;;  %v4495_v5 = vadd.f32 1.0, %v8143_v51  ;;  %v7966_v58 = vld [vmem:[#allocation17 + $0x2c0] ss:$8 sps:$4 sm:$0xff]  }
 0x9dd   : > { %8160 = vtanh.f32 %v4400_v22  ;;  %v4407_v45 = vmul.f32 0.7978846, %v4343_v27  ;;  %v4344_v13 = vadd.f32 %v4280_v46, %v12043_v57  ;;  %v4503_v20 = vadd.f32 1.0, %v8147_v7 }
 0x9de   : > { %v8151_v39 = vpop.eup %8150  ;;  %5578 = vmatpush1.bf16.msra.mxu1 %v7948_v32  ;;  %5664 = vmatprep.mubr.bf16.mxu0 %v4608_v19  ;;  %v4616_v61 = vpack.c.bf16 %v4568_v1, %v4560_v53  ;;  %v4559_v12 = vmul.f32 %v4495_v5, %v11998_v33  ;;  %v4063_v35 = vmul.f32 0.5, %v11969_v34  ;;  %v4071_v37 = vmul.f32 0.5, %v11990_v16  ;;  %v7974_v16 = vld [vmem:[#allocation17 + $0x2d4] ss:$8 sps:$4 sm:$0xff]   ;;  %v7972_v53 = vld [vmem:[#allocation17 + $0x2d0] ss:$8 sps:$4 sm:$0xff]  }
 0x9df   : > { %v8153_v43 = vpop.eup %8152  ;;  %5579 = vmatprep.subr.bf16.mxu1 %v7956_v60  ;;  %8162 = vtanh.f32 %v4407_v45  ;;  %v4408_v55 = vmul.f32 0.7978846, %v4344_v13  ;;  %5665 = vmatmul.mubr.bf16.vlgmr.msra.gmra.mrb[64].mxu0 %v4607_v31  ;;  %v4567_v25 = vmul.f32 %v4503_v20, %v12005_v42  ;;  %v4511_v51 = vadd.f32 1.0, %v8151_v39  ;;  %v7968_v31 = vld [vmem:[#allocation17 + $0x2c4] ss:$8 sps:$4 sm:$0xff]  }
 0x9e0   : > { %5674 = vmatprep.mubr.bf16.mxu0 %v4616_v61  ;;  %v4512_v40 = vadd.f32 1.0, %v8153_v43  ;;  %v4064_v33 = vmul.f32 0.5, %v11977_v29  ;;  %v4072_v42 = vmul.f32 0.5, %v11994_v3  ;;  %v4079_v1 = vmul.f32 0.5, %v12011_v18  ;;  %v7980_v20 = vld [vmem:[#allocation17 + $0x2e4] ss:$8 sps:$4 sm:$0xff]  }
 0x9e1   : > { %8164 = vtanh.f32 %v4408_v55  ;;  %v4615_v38 = vpack.c.bf16 %v4567_v25, %v4559_v12  ;;  %v12065_v2 = vmul.f32 %v4511_v51, %v4063_v35  ;;  %v4087_v5 = vmul.f32 0.5, %v12034_v49  ;;  %v7978_v55 = vld [vmem:[#allocation17 + $0x2e0] ss:$8 sps:$4 sm:$0xff]   ;;  %v7986_v25 = vld [vmem:[#allocation17 + $0x2f4] ss:$8 sps:$4 sm:$0xff]  }
 0x9e2   : > { %v8155_v7 = vpop.eup %8154  ;;  %5580 = vmatpush1.bf16.msra.mxu1 %v7954_v28  ;;  %v12069_v60 = vmul.f32 %v4512_v40, %v4064_v33  ;;  %v4080_v39 = vmul.f32 0.5, %v12021_v41  ;;  %v4088_v28 = vmul.f32 0.5, %v12043_v57  ;;  %v7984_v57 = vld [vmem:[#allocation17 + $0x2f0] ss:$8 sps:$4 sm:$0xff]   ;;  %v8167_v51 = vld [vmem:[#allocation17 + $0x304] ss:$8 sps:$4 sm:$0xff]  }
 0x9e3   : > { %v8157_v14 = vpop.eup %8156  ;;  %5581 = vmatprep.subr.bf16.mxu1 %v7962_v24  ;;  %v4519_v15 = vadd.f32 1.0, %v8155_v7  ;;  %v8169_v7 = vld [vmem:[#allocation17 + $0x314] ss:$8 sps:$4 sm:$0xff]   ;;  %v8171_v40 = vld [vmem:[#allocation17 + $0x324] ss:$8 sps:$4 sm:$0xff]  }
 0x9e4   : > { %v4520_v32 = vadd.f32 1.0, %v8157_v14  ;;  %v8191_v14 = vld [vmem:[#allocation17 + $0x3c4] ss:$8 sps:$4 sm:$0xff]   ;;  %v8192_v35 = vld [vmem:[#allocation17 + $0x3c0] ss:$8 sps:$4 sm:$0xff]  }
 0x9e5   : > { %v12067_v59 = vmul.f32 %v4519_v15, %v4071_v37  ;;  %v8193_v37 = vld [vmem:[#allocation17 + $0x3d4] ss:$8 sps:$4 sm:$0xff]   ;;  %v8194_v15 = vld [vmem:[#allocation17 + $0x3d0] ss:$8 sps:$4 sm:$0xff]   ;;  %v8196_v33 = vld [vmem:[#allocation17 + $0x3e0] ss:$8 sps:$4 sm:$0xff]  }
 0x9e6   : > { %v8159_v62 = vpop.eup %8158  ;;  %5582 = vmatpush1.bf16.msra.mxu1 %v7960_v50  ;;  %v12071_v22 = vmul.f32 %v4520_v32, %v4072_v42  ;;  %v8170_v50 = vld [vmem:[#allocation17 + $0x310] ss:$8 sps:$4 sm:$0xff]   ;;  %v8197_v42 = vld [vmem:[#allocation17 + $0x3f4] ss:$8 sps:$4 sm:$0xff]  }
 0x9e7   : > { %v8161_v34 = vpop.eup %8160  ;;  %5583 = vmatprep.subr.bf16.mxu1 %v7968_v31  ;;  %5675 = vmatmul.mubr.bf16.gmra.mrb[68].mxu0 %v4615_v38  ;;  %v4623_v29 = vpack.c.bf16 %v12067_v59, %v12065_v2  ;;  %v4527_v27 = vadd.f32 1.0, %v8159_v62  ;;  %v8168_v38 = vld [vmem:[#allocation17 + $0x300] ss:$8 sps:$4 sm:$0xff]   ;;  %v8195_v31 = vld [vmem:[#allocation17 + $0x3e4] ss:$8 sps:$4 sm:$0xff]   ;;  %v12737_v59 = vld [vmem:[#allocation52_spill] sm:$0xff] }
 0x9e8   : > { %v4624_v3 = vpack.c.bf16 %v12071_v22, %v12069_v60  ;;  %v4528_v19 = vadd.f32 1.0, %v8161_v34  ;;  %v8198_v32 = vld [vmem:[#allocation17 + $0x3f0] ss:$8 sps:$4 sm:$0xff]   ;;  %v4761_v2 = vld [vmem:[%s12736_s16] sm:$0x3]  ;;  %s9170_s16 = smov [#allocation18]  }
 0x9e9   : > { %v8163_v46 = vpop.eup %8162  ;;  %v12081_v43 = vmul.f32 %v4527_v27, %v4079_v1  ;;  %s8401_s6 = sshll.u32 %s9170_s16, 4  ;;  %s8402_s6 = int_to_ptr.vmem [resolvable:$false] %s8401_s6 }
 0x9ea   : > { %5584 = vmatpush1.bf16.msra.mxu1 %v7966_v58  ;;  %v4535_v45 = vadd.f32 1.0, %v8163_v46  ;;  %v12085_v12 = vmul.f32 %v4528_v19, %v4080_v39  ;;  %v12738_v46 = vld [vmem:[#allocation51_spill] sm:$0xff]  ;;  %s8403_s9 = scalar_lea.vmem %s8402_s6, 4096  ;;  %p8404_p9 = scmp.lt.s32.totalorder %s12182_s23, %s8402_s6 }
 0x9eb   : > { %v8165_v13 = vpop.eup %8164  ;;  %5585 = vmatprep.subr.bf16.mxu1 %v7974_v16  ;;  %p8405_p1 = scmp.lt.s32.totalorder %s8403_s9, %s8397_s7 }
 0x9ec   : > { %v4536_v61 = vadd.f32 1.0, %v8165_v13  ;;  %v12083_v24 = vmul.f32 %v4535_v45, %v4087_v5 }
 0x9ed   : > { %p8406_p11 = por %p8405_p1, %p8404_p9 }
 0x9ee   : > { %5586 = vmatpush1.bf16.msra.mxu1 %v7972_v53  ;;  %v12087_v18 = vmul.f32 %v4536_v61, %v4088_v28  ;;  %v4631_v49 = vpack.c.bf16 %v12083_v24, %v12081_v43  ;;  %v12133_v53 = vrot.slane %v4761_v2, %v12738_v46  ;;  %v12739_v24 = vld [vmem:[#allocation43_spill] sm:$0xff]  ;;  %v12753_v46 = vld [vmem:[#allocation57_spill] sm:$0xff] }
 0x9ef   : > { %5587 = vmatprep.subr.bf16.mxu1 %v7980_v20  ;;  %p8407_p12 = pnand %p8406_p11, %p8400_p8 }
 0x9f0   : > { %v4632_v41 = vpack.c.bf16 %v12087_v18, %v12085_v12  ;;  %v12740_v18 = vld [vmem:[#allocation44_spill] sm:$0xff] }
 0x9f2   : > { %5588 = vmatpush1.bf16.msra.mxu1 %v7978_v55 }
 0x9f3   : > { %5589 = vmatprep.subr.bf16.mxu1 %v7986_v25 }
 0x9f6   : > { %5590 = vmatpush1.bf16.msra.mxu1 %v7984_v57 }
 0x9f7   : > { %6635 = vmatprep.subr.bf16.mxu1 %v8167_v51  ;;  %v12742_v51 = vld [vmem:[#allocation46_spill] sm:$0xff] }
 0x9f9   : > { %5592 = vmatmul.mubr.bf16.vlgmr.msra.gmra.mrb[16].mxu1 %v4605_v48  ;;  %v8174_v48 = vld [vmem:[#allocation17 + $0x330] ss:$8 sps:$4 sm:$0xff]  }
 0x9fa   : > { %5601 = vmatprep.mubr.bf16.mxu1 %v4614_v10  ;;  %6651 = vmatpush1.bf16.msra.mxu1 %v8168_v38  ;;  %v8179_v10 = vld [vmem:[#allocation17 + $0x364] ss:$8 sps:$4 sm:$0xff]  }
 0x9fb   : > { %6636 = vmatprep.subr.bf16.mxu1 %v8169_v7 }
 0x9fe   : > { %6652 = vmatpush1.bf16.msra.mxu1 %v8170_v50 }
 0x9ff   : > { %6637 = vmatprep.subr.bf16.mxu1 %v8171_v40 }
 0xa01   : > { %5602 = vmatmul.mubr.bf16.gmra.mrb[20].mxu1 %v4613_v6  ;;  %v8180_v6 = vld [vmem:[#allocation17 + $0x360] ss:$8 sps:$4 sm:$0xff]  }
 0xa02   : > { %5611 = vmatprep.mubr.bf16.mxu1 %v4622_v4  ;;  %6653 = vmatpush1.bf16.msra.mxu1 %v8172_v30  ;;  %v8182_v4 = vld [vmem:[#allocation17 + $0x370] ss:$8 sps:$4 sm:$0xff]  }
 0xa03   : > { %6638 = vmatprep.subr.bf16.mxu1 %v8173_v23 }
 0xa06   : > { %6654 = vmatpush1.bf16.msra.mxu1 %v8174_v48 }
 0xa07   : > { %6639 = vmatprep.subr.bf16.mxu1 %v8175_v47 }
 0xa09   : > { %5612 = vmatmul.mubr.bf16.gmra.mrb[24].mxu1 %v4621_v56  ;;  %v8187_v56 = vld [vmem:[#allocation17 + $0x3a4] ss:$8 sps:$4 sm:$0xff]  }
 0xa0a   : > { %5621 = vmatprep.mubr.bf16.mxu1 %v4630_v54  ;;  %6655 = vmatpush1.bf16.msra.mxu1 %v8176_v63  ;;  %v8188_v54 = vld [vmem:[#allocation17 + $0x3a0] ss:$8 sps:$4 sm:$0xff]  }
 0xa0b   : > { %6640 = vmatprep.subr.bf16.mxu1 %v8177_v52 }
 0xa0e   : > { %6656 = vmatpush1.bf16.msra.mxu1 %v8178_v9 }
 0xa0f   : > { %6641 = vmatprep.subr.bf16.mxu1 %v8179_v10  ;;  %v12743_v10 = vld [vmem:[#allocation47_spill] sm:$0xff] }
 0xa11   : > { %5622 = vmatmul.mubr.bf16.gmra.mrb[28].mxu1 %v12735_v26 }
 0xa12   : > { %6657 = vmatpush1.bf16.msra.mxu1 %v8180_v6  ;;  %5684 = vmatprep.mubr.bf16.mxu1 %v4624_v3 }
 0xa13   : > { %6642 = vmatprep.subr.bf16.mxu1 %v8181_v8  ;;  %v12744_v8 = vld [vmem:[#allocation48_spill] sm:$0xff] }
 0xa16   : > { %6658 = vmatpush1.bf16.msra.mxu1 %v8182_v4 }
 0xa17   : > { %6643 = vmatprep.subr.bf16.mxu1 %v8183_v17 }
 0xa1a   : > { %6659 = vmatpush1.bf16.msra.mxu1 %v8184_v36  ;;  %v12745_v36 = vld [vmem:[#allocation49_spill] sm:$0xff] }
 0xa1b   : > { %6644 = vmatprep.subr.bf16.mxu1 %v8185_v11 }
 0xa1e   : > { %6660 = vmatpush1.bf16.msra.mxu1 %v8186_v21  ;;  %v12746_v21 = vld [vmem:[#allocation50_spill] sm:$0xff] }
 0xa1f   : > { %6645 = vmatprep.subr.bf16.mxu1 %v8187_v56 }
 0xa22   : > { %6661 = vmatpush1.bf16.msra.mxu1 %v8188_v54 }
 0xa23   : > { %6646 = vmatprep.subr.bf16.mxu1 %v8189_v44 }
 0xa26   : > { %6662 = vmatpush1.bf16.msra.mxu1 %v8190_v0 }
 0xa27   : > { %6647 = vmatprep.subr.bf16.mxu1 %v8191_v14 }
 0xa2a   : > { %6663 = vmatpush1.bf16.msra.mxu1 %v8192_v35 }
 0xa2b   : > { %6648 = vmatprep.subr.bf16.mxu1 %v8193_v37  ;;  %v12749_v37 = vld [vmem:[#allocation53_spill] sm:$0xff] }
 0xa2e   : > { %6664 = vmatpush1.bf16.msra.mxu1 %v8194_v15 }
 0xa2f   : > { %6649 = vmatprep.subr.bf16.mxu1 %v8195_v31 }
 0xa32   : > { %6665 = vmatpush1.bf16.msra.mxu1 %v8196_v33 }
 0xa33   : > { %6650 = vmatprep.subr.bf16.mxu1 %v8197_v42  ;;  %v12750_v42 = vld [vmem:[#allocation54_spill] sm:$0xff] }
 0xa36   : > { %6666 = vmatpush1.bf16.msra.mxu1 %v8198_v32 }
 0xa39   : > { %5685 = vmatmul.mubr.bf16.vlgmr.msra.gmra.mrb[24].mxu1 %v4623_v29  ;;  %v12130_v29 = vrot.slane %v4761_v2, %v12737_v59 }
 0xa3a   : > { %5694 = vmatprep.mubr.bf16.mxu1 %v4632_v41  ;;  %v12741_v41 = vld [vmem:[#allocation45_spill] sm:$0xff] }
 0xa41   : > { %5695 = vmatmul.mubr.bf16.gmra.mrb[28].mxu1 %v4631_v49 }
 0xab2   : > { %v5666_v62 = vpop.f32.mrb[64].mxu0 }
 0xab3   : > { %v5668_v58 = vpop.f32.mrb[65].mxu0 }
 0xab4   : > { %v5670_v60 = vpop.f32.mrb[66].mxu0 }
 0xab5   : > { %v5672_v22 = vpop.f32.mrb[67].mxu0 }
 0xaba   : > { %v5676_v34 = vpop.f32.mrb[68].mxu0 }
 0xabb   : > { %v5678_v16 = vpop.f32.mrb[69].mxu0 }
 0xabc   : > { %v5680_v3 = vpop.f32.mrb[70].mxu0 }
 0xabd   : > { %v5682_v27 = vpop.f32.mrb[71].mxu0 }
 0xacc   : > { %v5593_v19 = vpop.f32.mrb[16].mxu1 }
 0xacd   : > { %v6667_v1 = vadd.f32 %v5593_v19, %v12130_v29  ;;  %v5595_v5 = vpop.f32.mrb[17].mxu1 }
 0xace   : > { %v6669_v45 = vadd.f32 %v5595_v5, %v12133_v53  ;;  %v5597_v13 = vpop.f32.mrb[18].mxu1 }
 0xacf   : > { %v6668_v20 = vadd.f32 %v6667_v1, %v5666_v62  ;;  %v6671_v39 = vadd.f32 %v5597_v13, %v12130_v29  ;;  %v5599_v28 = vpop.f32.mrb[19].mxu1 }
 0xad0   : > { %v6670_v61 = vadd.f32 %v6669_v45, %v5668_v58  ;;  %v6673_v43 = vadd.f32 %v5599_v28, %v12133_v53  ;;  %v12751_v58 = vld [vmem:[#allocation55_spill] sm:$0xff]  ;;  %v12754_v45 = vld [vmem:[#allocation58_spill] sm:$0xff] }
 0xad1   : > { %v5705_v55 = vadd.f32 %v6668_v20, %v12739_v24  ;;  %v6672_v12 = vadd.f32 %v6671_v39, %v5670_v60  ;;  %v12755_v39 = vld [vmem:[#allocation59_spill] sm:$0xff] }
 0xad2   : > { %v5706_v49 = vadd.f32 %v6670_v61, %v12740_v18  ;;  %v6674_v25 = vadd.f32 %v6673_v43, %v5672_v22  ;;  %v12752_v22 = vld [vmem:[#allocation56_spill] sm:$0xff] }
 0xad3   : > { %5721 = vst [vmem:[%s9915_s21] sm:$0xff] %v5705_v55  ;;  %v5707_v57 = vadd.f32 %v6672_v12, %v12741_v41  ;;  %v12756_v61 = vld [vmem:[#allocation60_spill] sm:$0xff] }
 0xad4   : > { %5722 = vst [vmem:[%s9915_s21 + $0x8] sm:$0xff] %v5706_v49  ;;  %v5708_v38 = vadd.f32 %v6674_v25, %v12742_v51  ;;  %v5603_v7 = vpop.f32.mrb[20].mxu1 }
 0xad5   : > { %5723 = vst [vmem:[%s9915_s21 + $0x10] sm:$0xff] %v5707_v57  ;;  %v6675_v50 = vadd.f32 %v5603_v7, %v12130_v29  ;;  %v5605_v40 = vpop.f32.mrb[21].mxu1 }
 0xad6   : > { %5724 = vst [vmem:[%s9915_s21 + $0x18] sm:$0xff] %v5708_v38  ;;  %v6677_v30 = vadd.f32 %v5605_v40, %v12133_v53  ;;  %v5607_v23 = vpop.f32.mrb[22].mxu1 }
 0xad7   : > { %v6676_v48 = vadd.f32 %v6675_v50, %v5676_v34  ;;  %v6679_v47 = vadd.f32 %v5607_v23, %v12130_v29  ;;  %v5609_v63 = vpop.f32.mrb[23].mxu1 }
 0xad8   : > { %v6678_v52 = vadd.f32 %v6677_v30, %v5678_v16  ;;  %v6681_v9 = vadd.f32 %v5609_v63, %v12133_v53 }
 0xad9   : > { %v5709_v26 = vadd.f32 %v6676_v48, %v12743_v10  ;;  %v6680_v6 = vadd.f32 %v6679_v47, %v5680_v3 }
 0xada   : > { %v5710_v4 = vadd.f32 %v6678_v52, %v12744_v8  ;;  %v6682_v17 = vadd.f32 %v6681_v9, %v5682_v27 }
 0xadb   : > { %5725 = vst [vmem:[%s9915_s21 + $0x20] sm:$0xff] %v5709_v26  ;;  %v5711_v11 = vadd.f32 %v6680_v6, %v12745_v36 }
 0xadc   : > { %5726 = vst [vmem:[%s9915_s21 + $0x28] sm:$0xff] %v5710_v4  ;;  %v5712_v56 = vadd.f32 %v6682_v17, %v12746_v21 }
 0xadd   : > { %5727 = vst [vmem:[%s9915_s21 + $0x30] sm:$0xff] %v5711_v11 }
 0xade   : > { %5728 = vst [vmem:[%s9915_s21 + $0x38] sm:$0xff] %v5712_v56 }
 0xb0c   : > { %v5686_v54 = vpop.f32.mrb[24].mxu1 }
 0xb0d   : > { %v6683_v44 = vadd.f32 %v5686_v54, %v12130_v29  ;;  %v5688_v0 = vpop.f32.mrb[25].mxu1 }
 0xb0e   : > { %v6684_v14 = vadd.f32 %v5688_v0, %v12133_v53  ;;  %v5690_v35 = vpop.f32.mrb[26].mxu1 }
 0xb0f   : > { %v5713_v15 = vadd.f32 %v6683_v44, %v12749_v37  ;;  %v6685_v31 = vadd.f32 %v5690_v35, %v12130_v29  ;;  %v5692_v33 = vpop.f32.mrb[27].mxu1 }
 0xb10   : > { %v5714_v32 = vadd.f32 %v6684_v14, %v12750_v42  ;;  %v6686_v62 = vadd.f32 %v5692_v33, %v12133_v53 }
 0xb11   : > { %5729 = vst [vmem:[%s9915_s21 + $0x40] sm:$0xff] %v5713_v15  ;;  %v5715_v60 = vadd.f32 %v6685_v31, %v12751_v58 }
 0xb12   : > { %5730 = vst [vmem:[%s9915_s21 + $0x48] sm:$0xff] %v5714_v32  ;;  %v5716_v34 = vadd.f32 %v6686_v62, %v12752_v22 }
 0xb13   : > { %5731 = vst [vmem:[%s9915_s21 + $0x50] sm:$0xff] %v5715_v60 }
 0xb14   : > { %5732 = vst [vmem:[%s9915_s21 + $0x58] sm:$0xff] %v5716_v34  ;;  %v5696_v16 = vpop.f32.mrb[28].mxu1 }
 0xb15   : > { %v6687_v3 = vadd.f32 %v5696_v16, %v12130_v29  ;;  %v5698_v27 = vpop.f32.mrb[29].mxu1 }
 0xb16   : > { %v6688_v2 = vadd.f32 %v5698_v27, %v12133_v53  ;;  %v5700_v59 = vpop.f32.mrb[30].mxu1 }
 0xb17   : > { %v5717_v19 = vadd.f32 %v6687_v3, %v12753_v46  ;;  %v6689_v1 = vadd.f32 %v5700_v59, %v12130_v29  ;;  %v5702_v5 = vpop.f32.mrb[31].mxu1 }
 0xb18   : > { %v5718_v13 = vadd.f32 %v6688_v2, %v12754_v45  ;;  %v6690_v20 = vadd.f32 %v5702_v5, %v12133_v53 }
 0xb19   : > { %5733 = vst [vmem:[%s9915_s21 + $0x60] sm:$0xff] %v5717_v19  ;;  %v5719_v28 = vadd.f32 %v6689_v1, %v12755_v39 }
 0xb1a   : > { %5734 = vst [vmem:[%s9915_s21 + $0x68] sm:$0xff] %v5718_v13  ;;  %v5720_v43 = vadd.f32 %v6690_v20, %v12756_v61 }
 0xb1b   : > { %5735 = vst [vmem:[%s9915_s21 + $0x70] sm:$0xff] %v5719_v28 }
 0xb1c   : > { %5736 = vst [vmem:[%s9915_s21 + $0x78] sm:$0xff] %v5720_v43 }
 0xb1d   : > { %8410 = shalt.err (!%p8407_p12)
}
 0xb1e   : > { %s8411_s21 = scalar_lea.hbm %s12189_s8, 2048  ;;  %s8415_s22 = scalar_lea.hbm %s12757_s13, 8192 }
 0xb1f   : > { %p8412_p13 = scmp.ne.s32.totalorder %s12189_s8, %s8411_s21  ;;  %p8416_p4 = scmp.lt.u32.totalorder %s12189_s8, %s12757_s13 }
 0xb20   : > { %p8417_p2 = scmp.lt.u32.totalorder %s8415_s22, %s8411_s21  ;;  %p8419_p7 = scmp.lt.u32.totalorder %s8411_s21, %s12189_s8 }
 0xb21   : > { %p8413_p0 = pnand %p8412_p13, %p12758_p5 }
 0xb22   : > { %p8418_p10 = por %p8417_p2, %p8416_p4 }
 0xb23   : > { %p8414_p3 = pneg %p8413_p0 }
 0xb24   : > { %p8420_p6 = por %p8419_p7, %p8418_p10 }
 0xb26   : > { %p8421_p8 = pnand %p8420_p6, %p8414_p3 }
 0xb28   : > { %8424 = shalt.err (!%p8421_p8)
}
 0xb29   : > { %s9171_s25 = smov 256   ;;  %s9172_s7 = smov 16  }
 0xb2a   : > { %6757 = dma.vmem_to_hbm [thread:$0]  (%p12758_p5), %s12182_s23, 2048, %s12189_s8, %s5738_s14, %s9171_s25, %s9171_s25, %s9172_s7  }
 0xb2b PF: > { %p6799_p9 = scmp.ge.s32.totalorder %s8831_s20, 2  ;;  %s5769_s16 = sand.u32 1, %s8803_s29  }
 0xb2c   : > { %p12759_p1 = scmp.ne.s32.totalorder %s12390_s2, 0  ;;  %s5770_s6 = scalar_lea.sflag [#allocation8], %s5769_s16 }
 0xb2e   : > { %p6783_p11 = pnand %p6799_p9, %p12759_p1 }
 0xb30   : > { %8798 = dma.done.wait (!%p6783_p11), %s5770_s6, 2048  }
 0xb31   : > { %8800 = vsyncadd (!%p6783_p11), %s5770_s6, 4294965248  ;;  %s33_s20 = sadd.s32 1, %s8831_s20   ;;  %s12760_s5 = smov %s12773_s17 }
 0xb32   : > { %p30_p12 = scmp.ge.s32.totalorder %s33_s20, 6   ;;  %s12761_s29 = smov %s8807_s30 }
 0xb33   : > { %s12762_s30 = smov %s8811_s15  ;;  %s12763_s15 = smov %s9497_s24 }
 0xb34   : > { %s12764_s16 = smov %s8823_s18  ;;  %s12765_s17 = smov %s8827_s19 }
 0xb35   : > { %s12766_s18 = smov %s12769_s26  ;;  %s12767_s19 = smov %s12760_s5 }
 0xb36   :  { %32 = sbr.rel (!%p30_p12) target bundleno = 23 (0x17), region = 170 }
 0xb3d   :  { %5775 = vsyncpa [#allocation7], 1 }
 0xb3e   :  { %5777 = vsyncpa [#allocation7 + $0x1], 1 }
 0xb3f   :  { %5778 = vsyncpa [#allocation10], 1 }
 0xb40   :  { %5779 = vsyncpa [#allocation13], 1 }
 0xb41   :  { %5780 = vsyncpa [#allocation16], 1 }
 0xb42   :  { %5781 = vsyncpa [#allocation8], 1 }
 0xb43   :  { %5783 = vsyncpa [#allocation8 + $0x1], 1 }

</bundles_post_ra>
